<compile_context>
chip_gen: v5e
topology: v5e:2x2
jax: 0.10.0
libtpu: 0.0.40
codegen_flags: <defaults>
</compile_context>

<pallas_src>
import math

import jax
import jax.numpy as jnp
from jax.experimental import pallas as pl
from jax.experimental.pallas import tpu as pltpu


# ------------------------------ helpers --------------------------------------
def _permute_gate_cols(a):
    """Reorder the last (4H) axis from PyTorch [i, f, g, o] to [i, f, o, g]."""
    H = a.shape[-1] // 4
    return jnp.concatenate(
        [a[..., :2 * H], a[..., 3 * H:], a[..., 2 * H:3 * H]], axis=-1)


def _lstm_cell(gates, c_prev, H):
    """gates: (B, 4H) pre-activation in permuted order [i, f, o, g]."""
    sig = jax.nn.sigmoid(gates[:, :3 * H])     # i, f, o  (EUP, 3H lanes)
    g_g = jnp.tanh(gates[:, 3 * H:])           # g        (EUP, H lanes)
    i_g = sig[:, 0 * H:1 * H]
    f_g = sig[:, 1 * H:2 * H]
    o_g = sig[:, 2 * H:3 * H]
    c_new = f_g * c_prev + i_g * g_g
    h_new = o_g * jnp.tanh(c_new)
    return h_new, c_new


# ------------------------------ fused kernel body -----------------------------
def _make_fused_lstm_kernel(num_layers, hidden_size, time_block, batch_block):
    H = hidden_size
    # inputs: x, wih0, whh0, b0, (w_stacked, b) per upper layer, fc_w, fc_b
    n_in = 4 + 2 * (num_layers - 1) + 2

    def kernel(*refs):
        in_refs = refs[:n_in]
        out_ref = refs[n_in]
        state_refs = refs[n_in + 1:]          # h0, c0, h1, c1, ... (VMEM, f32)

        x_ref = in_refs[0]                    # (TT, Bt, I_pad)  bf16
        t_blk = pl.program_id(1)

        @pl.when(t_blk == 0)
        def _init():
            for s in state_refs:
                s[...] = jnp.zeros_like(s)

        # ---- hoisted weight / bias loads (once per grid step, not per t) ----
        wih0 = in_refs[1][...]                                    # (I_pad, 4H) bf16
        whh0 = in_refs[2][...]                                    # (H, 4H)     bf16
        b0 = jnp.broadcast_to(in_refs[3][...], (batch_block, 4 * H))   # f32
        upper = []
        for l in range(num_layers - 1):
            wstk = in_refs[4 + 2 * l][...]                        # (2H, 4H)    bf16
            b = jnp.broadcast_to(in_refs[5 + 2 * l][...], (batch_block, 4 * H))
            upper.append((wstk, b))

        # Pull recurrent state into registers for the unrolled time window.
        state = [s[...] for s in state_refs]

        for tt in range(time_block):          # fully unrolled window
            # ---- layer 0: x-projection (not recurrence-dependent) + h@W_hh ----
            h_prev, c_prev = state[0], state[1]
            gates = (
                jnp.dot(x_ref[tt], wih0, preferred_element_type=jnp.float32)
                + jnp.dot(h_prev.astype(jnp.bfloat16), whh0,
                          preferred_element_type=jnp.float32)
                + b0)
            h_new, c_new = _lstm_cell(gates, c_prev, H)
            state[0], state[1] = h_new, c_new
            x_in = h_new

            # ---- layers 1..L-1: single fused K=2H matmul on [x_in, h_prev] ----
            for l in range(1, num_layers):
                wstk, b = upper[l - 1]
                h_prev, c_prev = state[2 * l], state[2 * l + 1]
                xh = jnp.concatenate(
                    [x_in.astype(jnp.bfloat16), h_prev.astype(jnp.bfloat16)],
                    axis=-1)                                      # (Bt, 2H) bf16
                gates = jnp.dot(xh, wstk,
                                preferred_element_type=jnp.float32) + b
                h_new, c_new = _lstm_cell(gates, c_prev, H)
                state[2 * l], state[2 * l + 1] = h_new, c_new
                x_in = h_new

        # Persist recurrent state for the next time block.
        for s, v in zip(state_refs, state):
            s[...] = v

        # Fused FC head: only the top layer's last-timestep hidden is needed.
        @pl.when(t_blk == pl.num_programs(1) - 1)
        def _final():
            h_top = state[2 * (num_layers - 1)]
            out_ref[...] = (
                jnp.dot(h_top, in_refs[n_in - 2][...],
                        preferred_element_type=jnp.float32)
                + in_refs[n_in - 1][...])

    return kernel


# --------------------------------- forward -----------------------------------
def lstm_forward(x, params, *, time_block=None, batch_block=None):
    """x: (B, T, I) -> (B,)   (matches PyTorch: fc(out[:, -1, :]).squeeze(1))."""
    x = x.astype(jnp.float32)
    B, T, I = x.shape
    layers = params["layers"]
    num_layers = len(layers)
    H = layers[0][1].shape[1]                 # w_hh: (4H, H)
    O = params["fc_w"].shape[0]

    # ---- pad batch / input-feature dims to full 8-sublane tiles --------------
    B_pad = ((B + 7) // 8) * 8
    I_pad = ((I + 7) // 8) * 8

    if time_block is None:
        # Latency-bound kernel: bigger unrolled windows amortize per-grid-step
        # overhead and let the scheduler wavefront layer l@t+1 vs layer l+1@t.
        time_block = T if T <= 32 else next(
            d for d in (32, 16, 8, 4, 2, 1) if T % d == 0)
    if batch_block is None:
        batch_block = B_pad
        # v7x: shard the parallel batch axis across the 2 TensorCores when the
        # padded batch still splits into full 8-sublane tiles.
        try:
            num_tc = getattr(jax.local_devices()[0], "num_cores", 1) or 1
        except Exception:  # pragma: no cover
            num_tc = 1
        if num_tc > 1 and B_pad % (8 * num_tc) == 0:
            batch_block = B_pad // num_tc
    assert T % time_block == 0 and B_pad % batch_block == 0

    # ---- operand prep: bf16 matmul operands, permuted / fused weights --------
    x_tbi = jnp.transpose(x, (1, 0, 2))                           # (T, B, I)
    x_tbi = jnp.pad(x_tbi, ((0, 0), (0, B_pad - B), (0, I_pad - I)))
    x_tbi = x_tbi.astype(jnp.bfloat16)

    w_ih0, w_hh0, b_ih0, b_hh0 = layers[0]
    wih0_t = _permute_gate_cols(jnp.transpose(w_ih0))             # (I, 4H)
    wih0_t = jnp.pad(wih0_t, ((0, I_pad - I), (0, 0))).astype(jnp.bfloat16)
    whh0_t = _permute_gate_cols(jnp.transpose(w_hh0)).astype(jnp.bfloat16)
    b0 = _permute_gate_cols((b_ih0 + b_hh0).reshape(1, 4 * H))    # f32

    inputs = [x_tbi, wih0_t, whh0_t, b0]
    in_specs = [
        pl.BlockSpec((time_block, batch_block, I_pad), lambda bb, tb: (tb, bb, 0)),
        pl.BlockSpec((I_pad, 4 * H), lambda bb, tb: (0, 0)),
        pl.BlockSpec((H, 4 * H), lambda bb, tb: (0, 0)),
        pl.BlockSpec((1, 4 * H), lambda bb, tb: (0, 0)),
    ]
    for (w_ih, w_hh, b_ih, b_hh) in layers[1:]:
        # Stack [W_ih^T; W_hh^T] -> one (2H, 4H) weight => one K=2H dot/step.
        w_stk = _permute_gate_cols(
            jnp.concatenate([jnp.transpose(w_ih), jnp.transpose(w_hh)], axis=0)
        ).astype(jnp.bfloat16)
        b = _permute_gate_cols((b_ih + b_hh).reshape(1, 4 * H))
        inputs += [w_stk, b]
        in_specs += [
            pl.BlockSpec((2 * H, 4 * H), lambda bb, tb: (0, 0)),
            pl.BlockSpec((1, 4 * H), lambda bb, tb: (0, 0)),
        ]
    inputs += [jnp.transpose(params["fc_w"]), params["fc_b"].reshape(1, O)]
    in_specs += [
        pl.BlockSpec((H, O), lambda bb, tb: (0, 0)),
        pl.BlockSpec((1, O), lambda bb, tb: (0, 0)),
    ]

    out = pl.pallas_call(
        _make_fused_lstm_kernel(num_layers, H, time_block, batch_block),
        out_shape=jax.ShapeDtypeStruct((B_pad, O), jnp.float32),
        grid_spec=pltpu.PrefetchScalarGridSpec(
            num_scalar_prefetch=0,
            grid=(B_pad // batch_block, T // time_block),
            in_specs=in_specs,
            out_specs=pl.BlockSpec((batch_block, O), lambda bb, tb: (bb, 0)),
            scratch_shapes=[pltpu.VMEM((batch_block, H), jnp.float32)
                            for _ in range(2 * num_layers)],
        ),
        compiler_params=pltpu.CompilerParams(
            # batch blocks are independent (megacore-shardable on v7x);
            # the time axis carries the recurrence -> sequential.
            dimension_semantics=("parallel", "arbitrary")),
    )(*inputs)
    return out[:B, 0]


# ------------------------------ param construction ---------------------------
def init_params(key, input_size, hidden_size, output_size, num_layers):
    """Deterministic init mirroring the PyTorch module:
       - nn.LSTM default uniform(-1/sqrt(H), 1/sqrt(H)) for all LSTM params
       - fc: kaiming_normal_ weight, zero bias
    """
    params = {"layers": []}
    stdv = 1.0 / math.sqrt(hidden_size)
    for l in range(num_layers):
        in_sz = input_size if l == 0 else hidden_size
        key, k1, k2, k3, k4 = jax.random.split(key, 5)
        w_ih = jax.random.uniform(k1, (4 * hidden_size, in_sz),
                                  minval=-stdv, maxval=stdv, dtype=jnp.float32)
        w_hh = jax.random.uniform(k2, (4 * hidden_size, hidden_size),
                                  minval=-stdv, maxval=stdv, dtype=jnp.float32)
        b_ih = jax.random.uniform(k3, (4 * hidden_size,),
                                  minval=-stdv, maxval=stdv, dtype=jnp.float32)
        b_hh = jax.random.uniform(k4, (4 * hidden_size,),
                                  minval=-stdv, maxval=stdv, dtype=jnp.float32)
        params["layers"].append((w_ih, w_hh, b_ih, b_hh))
    key, kf = jax.random.split(key)
    fc_std = math.sqrt(2.0 / hidden_size)       # kaiming_normal_, fan_in, ReLU gain
    params["fc_w"] = fc_std * jax.random.normal(
        kf, (output_size, hidden_size), dtype=jnp.float32)
    params["fc_b"] = jnp.zeros((output_size,), dtype=jnp.float32)
    return params


if __name__ == "__main__":
    # Small shapes consistent with the module's forward: x is (B, T, input_size)
    B, T = 2, 8
    INPUT_SIZE, HIDDEN_SIZE, OUTPUT_SIZE, NUM_LAYERS = 4, 32, 1, 3

    key = jax.random.PRNGKey(0)
    key, kx = jax.random.split(key)
    x = jax.random.normal(kx, (B, T, INPUT_SIZE), dtype=jnp.float32)

    params = init_params(key, INPUT_SIZE, HIDDEN_SIZE, OUTPUT_SIZE, NUM_LAYERS)

    out = lstm_forward(x, params)
    out = jax.block_until_ready(out)
    assert out.shape == (B,), out.shape
    print("KERNEL_OK")
</pallas_src>

<mosaic_0001>
module attributes {stable_mosaic.version = 11 : i64} {
  func.func @kernel(%arg0: i32, %arg1: i32, %arg2: memref<8x8x8xbf16, #tpu.memory_space<vmem>>, %arg3: memref<8x128xbf16, #tpu.memory_space<vmem>>, %arg4: memref<32x128xbf16, #tpu.memory_space<vmem>>, %arg5: memref<1x128xf32, #tpu.memory_space<vmem>>, %arg6: memref<64x128xbf16, #tpu.memory_space<vmem>>, %arg7: memref<1x128xf32, #tpu.memory_space<vmem>>, %arg8: memref<64x128xbf16, #tpu.memory_space<vmem>>, %arg9: memref<1x128xf32, #tpu.memory_space<vmem>>, %arg10: memref<32x1xf32, #tpu.memory_space<vmem>>, %arg11: memref<1x1xf32, #tpu.memory_space<vmem>>, %arg12: memref<8x1xf32, #tpu.memory_space<vmem>>, %arg13: memref<8x32xf32, #tpu.memory_space<vmem>>, %arg14: memref<8x32xf32, #tpu.memory_space<vmem>>, %arg15: memref<8x32xf32, #tpu.memory_space<vmem>>, %arg16: memref<8x32xf32, #tpu.memory_space<vmem>>, %arg17: memref<8x32xf32, #tpu.memory_space<vmem>>, %arg18: memref<8x32xf32, #tpu.memory_space<vmem>>) attributes {dimension_semantics = [#tpu.dimension_semantics<parallel>, #tpu.dimension_semantics<arbitrary>], iteration_bounds = array<i64: 1, 1>, scalar_prefetch = 0 : i64, scratch_operands = 6 : i64, tpu.core_type = #tpu.core_type<tc>, window_params = [{transform_indices = @transform_0, window_bounds = array<i64: 8, 8, 8>}, {pipeline_mode = #tpu.pipeline_mode<synchronous>, transform_indices = @transform_1, window_bounds = array<i64: 8, 128>}, {pipeline_mode = #tpu.pipeline_mode<synchronous>, transform_indices = @transform_2, window_bounds = array<i64: 32, 128>}, {pipeline_mode = #tpu.pipeline_mode<synchronous>, transform_indices = @transform_3, window_bounds = array<i64: 1, 128>}, {pipeline_mode = #tpu.pipeline_mode<synchronous>, transform_indices = @transform_4, window_bounds = array<i64: 64, 128>}, {pipeline_mode = #tpu.pipeline_mode<synchronous>, transform_indices = @transform_5, window_bounds = array<i64: 1, 128>}, {pipeline_mode = #tpu.pipeline_mode<synchronous>, transform_indices = @transform_6, window_bounds = array<i64: 64, 128>}, {pipeline_mode = #tpu.pipeline_mode<synchronous>, transform_indices = @transform_7, window_bounds = array<i64: 1, 128>}, {pipeline_mode = #tpu.pipeline_mode<synchronous>, transform_indices = @transform_8, window_bounds = array<i64: 32, 1>}, {pipeline_mode = #tpu.pipeline_mode<synchronous>, transform_indices = @transform_9, window_bounds = array<i64: 1, 1>}, {transform_indices = @transform_10, window_bounds = array<i64: 8, 1>}]} {
    %c0_i32 = arith.constant 0 : i32
    %0 = arith.cmpi eq, %arg1, %c0_i32 : i32
    %1 = arith.extui %0 : i1 to i32
    %c0_i32_0 = arith.constant 0 : i32
    %2 = arith.cmpi ne, %1, %c0_i32_0 : i32
    scf.if %2 {
      %cst_112 = arith.constant 0.000000e+00 : f32
      %551 = vector.broadcast %cst_112 : f32 to vector<8x32xf32>
      %c0_113 = arith.constant 0 : index
      %c0_114 = arith.constant 0 : index
      %552 = vector.load %arg13[%c0_113, %c0_114] : memref<8x32xf32, #tpu.memory_space<vmem>>, vector<8x32xf32>
      tpu.vector_store %arg13[%c0_113, %c0_114], %551 {strides = array<i32>} : memref<8x32xf32, #tpu.memory_space<vmem>>, vector<8x32xf32>,
      %cst_115 = arith.constant 0.000000e+00 : f32
      %553 = vector.broadcast %cst_115 : f32 to vector<8x32xf32>
      %c0_116 = arith.constant 0 : index
      %c0_117 = arith.constant 0 : index
      %554 = vector.load %arg14[%c0_116, %c0_117] : memref<8x32xf32, #tpu.memory_space<vmem>>, vector<8x32xf32>
      tpu.vector_store %arg14[%c0_116, %c0_117], %553 {strides = array<i32>} : memref<8x32xf32, #tpu.memory_space<vmem>>, vector<8x32xf32>,
      %cst_118 = arith.constant 0.000000e+00 : f32
      %555 = vector.broadcast %cst_118 : f32 to vector<8x32xf32>
      %c0_119 = arith.constant 0 : index
      %c0_120 = arith.constant 0 : index
      %556 = vector.load %arg15[%c0_119, %c0_120] : memref<8x32xf32, #tpu.memory_space<vmem>>, vector<8x32xf32>
      tpu.vector_store %arg15[%c0_119, %c0_120], %555 {strides = array<i32>} : memref<8x32xf32, #tpu.memory_space<vmem>>, vector<8x32xf32>,
      %cst_121 = arith.constant 0.000000e+00 : f32
      %557 = vector.broadcast %cst_121 : f32 to vector<8x32xf32>
      %c0_122 = arith.constant 0 : index
      %c0_123 = arith.constant 0 : index
      %558 = vector.load %arg16[%c0_122, %c0_123] : memref<8x32xf32, #tpu.memory_space<vmem>>, vector<8x32xf32>
      tpu.vector_store %arg16[%c0_122, %c0_123], %557 {strides = array<i32>} : memref<8x32xf32, #tpu.memory_space<vmem>>, vector<8x32xf32>,
      %cst_124 = arith.constant 0.000000e+00 : f32
      %559 = vector.broadcast %cst_124 : f32 to vector<8x32xf32>
      %c0_125 = arith.constant 0 : index
      %c0_126 = arith.constant 0 : index
      %560 = vector.load %arg17[%c0_125, %c0_126] : memref<8x32xf32, #tpu.memory_space<vmem>>, vector<8x32xf32>
      tpu.vector_store %arg17[%c0_125, %c0_126], %559 {strides = array<i32>} : memref<8x32xf32, #tpu.memory_space<vmem>>, vector<8x32xf32>,
      %cst_127 = arith.constant 0.000000e+00 : f32
      %561 = vector.broadcast %cst_127 : f32 to vector<8x32xf32>
      %c0_128 = arith.constant 0 : index
      %c0_129 = arith.constant 0 : index
      %562 = vector.load %arg18[%c0_128, %c0_129] : memref<8x32xf32, #tpu.memory_space<vmem>>, vector<8x32xf32>
      tpu.vector_store %arg18[%c0_128, %c0_129], %561 {strides = array<i32>} : memref<8x32xf32, #tpu.memory_space<vmem>>, vector<8x32xf32>,
    } else {
    }
    %c0 = arith.constant 0 : index
    %c0_1 = arith.constant 0 : index
    %3 = vector.load %arg3[%c0, %c0_1] : memref<8x128xbf16, #tpu.memory_space<vmem>>, vector<8x128xbf16>
    %c0_2 = arith.constant 0 : index
    %c0_3 = arith.constant 0 : index
    %4 = vector.load %arg4[%c0_2, %c0_3] : memref<32x128xbf16, #tpu.memory_space<vmem>>, vector<32x128xbf16>
    %c0_4 = arith.constant 0 : index
    %c0_5 = arith.constant 0 : index
    %5 = vector.load %arg5[%c0_4, %c0_5] : memref<1x128xf32, #tpu.memory_space<vmem>>, vector<1x128xf32>
    %6 = vector.shape_cast %5 : vector<1x128xf32> to vector<1x128xf32>
    %7 = vector.broadcast %6 : vector<1x128xf32> to vector<8x128xf32>
    %c0_6 = arith.constant 0 : index
    %c0_7 = arith.constant 0 : index
    %8 = vector.load %arg6[%c0_6, %c0_7] : memref<64x128xbf16, #tpu.memory_space<vmem>>, vector<64x128xbf16>
    %c0_8 = arith.constant 0 : index
    %c0_9 = arith.constant 0 : index
    %9 = vector.load %arg7[%c0_8, %c0_9] : memref<1x128xf32, #tpu.memory_space<vmem>>, vector<1x128xf32>
    %10 = vector.shape_cast %9 : vector<1x128xf32> to vector<1x128xf32>
    %11 = vector.broadcast %10 : vector<1x128xf32> to vector<8x128xf32>
    %c0_10 = arith.constant 0 : index
    %c0_11 = arith.constant 0 : index
    %12 = vector.load %arg8[%c0_10, %c0_11] : memref<64x128xbf16, #tpu.memory_space<vmem>>, vector<64x128xbf16>
    %c0_12 = arith.constant 0 : index
    %c0_13 = arith.constant 0 : index
    %13 = vector.load %arg9[%c0_12, %c0_13] : memref<1x128xf32, #tpu.memory_space<vmem>>, vector<1x128xf32>
    %14 = vector.shape_cast %13 : vector<1x128xf32> to vector<1x128xf32>
    %15 = vector.broadcast %14 : vector<1x128xf32> to vector<8x128xf32>
    %c0_14 = arith.constant 0 : index
    %c0_15 = arith.constant 0 : index
    %16 = vector.load %arg13[%c0_14, %c0_15] : memref<8x32xf32, #tpu.memory_space<vmem>>, vector<8x32xf32>
    %c0_16 = arith.constant 0 : index
    %c0_17 = arith.constant 0 : index
    %17 = vector.load %arg14[%c0_16, %c0_17] : memref<8x32xf32, #tpu.memory_space<vmem>>, vector<8x32xf32>
    %c0_18 = arith.constant 0 : index
    %c0_19 = arith.constant 0 : index
    %18 = vector.load %arg15[%c0_18, %c0_19] : memref<8x32xf32, #tpu.memory_space<vmem>>, vector<8x32xf32>
    %c0_20 = arith.constant 0 : index
    %c0_21 = arith.constant 0 : index
    %19 = vector.load %arg16[%c0_20, %c0_21] : memref<8x32xf32, #tpu.memory_space<vmem>>, vector<8x32xf32>
    %c0_22 = arith.constant 0 : index
    %c0_23 = arith.constant 0 : index
    %20 = vector.load %arg17[%c0_22, %c0_23] : memref<8x32xf32, #tpu.memory_space<vmem>>, vector<8x32xf32>
    %c0_24 = arith.constant 0 : index
    %c0_25 = arith.constant 0 : index
    %21 = vector.load %arg18[%c0_24, %c0_25] : memref<8x32xf32, #tpu.memory_space<vmem>>, vector<8x32xf32>
    %c0_26 = arith.constant 0 : index
    %c0_27 = arith.constant 0 : index
    %c0_28 = arith.constant 0 : index
    %22 = vector.load %arg2[%c0_26, %c0_27, %c0_28] : memref<8x8x8xbf16, #tpu.memory_space<vmem>>, vector<1x8x8xbf16>
    %23 = vector.shape_cast %22 : vector<1x8x8xbf16> to vector<8x8xbf16>
    %cst = arith.constant dense<0.000000e+00> : vector<8x128xf32>
    %24 = tpu.matmul %23, %3, %cst {dimension_numbers = #tpu.dot_dimension_numbers<[1], [0], [0], [1], [0, 0, 1, 1], [], []>} : vector<8x8xbf16>, vector<8x128xbf16>, vector<8x128xf32> -> vector<8x128xf32>
    %25 = arith.truncf %16 : vector<8x32xf32> to vector<8x32xbf16>
    %cst_29 = arith.constant dense<0.000000e+00> : vector<8x128xf32>
    %26 = tpu.matmul %25, %4, %cst_29 {dimension_numbers = #tpu.dot_dimension_numbers<[1], [0], [0], [1], [0, 0, 1, 1], [], []>} : vector<8x32xbf16>, vector<32x128xbf16>, vector<8x128xf32> -> vector<8x128xf32>
    %27 = arith.addf %24, %26 : vector<8x128xf32>
    %28 = arith.addf %27, %7 : vector<8x128xf32>
    %29 = vector.extract_strided_slice %28 {offsets = [0, 0], sizes = [8, 96], strides = [1, 1]} : vector<8x128xf32> to vector<8x96xf32>
    %30 = arith.negf %29 : vector<8x96xf32>
    %31 = math.exp %30 : vector<8x96xf32>
    %cst_30 = arith.constant 1.000000e+00 : f32
    %32 = vector.broadcast %cst_30 : f32 to vector<8x96xf32>
    %33 = arith.addf %32, %31 : vector<8x96xf32>
    %34 = arith.divf %32, %33 : vector<8x96xf32>
    %35 = vector.extract_strided_slice %28 {offsets = [0, 96], sizes = [8, 32], strides = [1, 1]} : vector<8x128xf32> to vector<8x32xf32>
    %36 = math.tanh %35 : vector<8x32xf32>
    %37 = vector.extract_strided_slice %34 {offsets = [0, 0], sizes = [8, 32], strides = [1, 1]} : vector<8x96xf32> to vector<8x32xf32>
    %38 = vector.extract_strided_slice %34 {offsets = [0, 32], sizes = [8, 32], strides = [1, 1]} : vector<8x96xf32> to vector<8x32xf32>
    %39 = vector.extract_strided_slice %34 {offsets = [0, 64], sizes = [8, 32], strides = [1, 1]} : vector<8x96xf32> to vector<8x32xf32>
    %40 = arith.mulf %38, %17 : vector<8x32xf32>
    %41 = arith.mulf %37, %36 : vector<8x32xf32>
    %42 = arith.addf %40, %41 : vector<8x32xf32>
    %43 = math.tanh %42 : vector<8x32xf32>
    %44 = arith.mulf %39, %43 : vector<8x32xf32>
    %45 = arith.truncf %44 : vector<8x32xf32> to vector<8x32xbf16>
    %46 = arith.truncf %18 : vector<8x32xf32> to vector<8x32xbf16>
    %47 = tpu.concatenate %45, %46 in 1 : vector<8x32xbf16>, vector<8x32xbf16> -> vector<8x64xbf16>
    %cst_31 = arith.constant dense<0.000000e+00> : vector<8x128xf32>
    %48 = tpu.matmul %47, %8, %cst_31 {dimension_numbers = #tpu.dot_dimension_numbers<[1], [0], [0], [1], [0, 0, 1, 1], [], []>} : vector<8x64xbf16>, vector<64x128xbf16>, vector<8x128xf32> -> vector<8x128xf32>
    %49 = arith.addf %48, %11 : vector<8x128xf32>
    %50 = vector.extract_strided_slice %49 {offsets = [0, 0], sizes = [8, 96], strides = [1, 1]} : vector<8x128xf32> to vector<8x96xf32>
    %51 = arith.negf %50 : vector<8x96xf32>
    %52 = math.exp %51 : vector<8x96xf32>
    %cst_32 = arith.constant 1.000000e+00 : f32
    %53 = vector.broadcast %cst_32 : f32 to vector<8x96xf32>
    %54 = arith.addf %53, %52 : vector<8x96xf32>
    %55 = arith.divf %53, %54 : vector<8x96xf32>
    %56 = vector.extract_strided_slice %49 {offsets = [0, 96], sizes = [8, 32], strides = [1, 1]} : vector<8x128xf32> to vector<8x32xf32>
    %57 = math.tanh %56 : vector<8x32xf32>
    %58 = vector.extract_strided_slice %55 {offsets = [0, 0], sizes = [8, 32], strides = [1, 1]} : vector<8x96xf32> to vector<8x32xf32>
    %59 = vector.extract_strided_slice %55 {offsets = [0, 32], sizes = [8, 32], strides = [1, 1]} : vector<8x96xf32> to vector<8x32xf32>
    %60 = vector.extract_strided_slice %55 {offsets = [0, 64], sizes = [8, 32], strides = [1, 1]} : vector<8x96xf32> to vector<8x32xf32>
    %61 = arith.mulf %59, %19 : vector<8x32xf32>
    %62 = arith.mulf %58, %57 : vector<8x32xf32>
    %63 = arith.addf %61, %62 : vector<8x32xf32>
    %64 = math.tanh %63 : vector<8x32xf32>
    %65 = arith.mulf %60, %64 : vector<8x32xf32>
    %66 = arith.truncf %65 : vector<8x32xf32> to vector<8x32xbf16>
    %67 = arith.truncf %20 : vector<8x32xf32> to vector<8x32xbf16>
    %68 = tpu.concatenate %66, %67 in 1 : vector<8x32xbf16>, vector<8x32xbf16> -> vector<8x64xbf16>
    %cst_33 = arith.constant dense<0.000000e+00> : vector<8x128xf32>
    %69 = tpu.matmul %68, %12, %cst_33 {dimension_numbers = #tpu.dot_dimension_numbers<[1], [0], [0], [1], [0, 0, 1, 1], [], []>} : vector<8x64xbf16>, vector<64x128xbf16>, vector<8x128xf32> -> vector<8x128xf32>
    %70 = arith.addf %69, %15 : vector<8x128xf32>
    %71 = vector.extract_strided_slice %70 {offsets = [0, 0], sizes = [8, 96], strides = [1, 1]} : vector<8x128xf32> to vector<8x96xf32>
    %72 = arith.negf %71 : vector<8x96xf32>
    %73 = math.exp %72 : vector<8x96xf32>
    %cst_34 = arith.constant 1.000000e+00 : f32
    %74 = vector.broadcast %cst_34 : f32 to vector<8x96xf32>
    %75 = arith.addf %74, %73 : vector<8x96xf32>
    %76 = arith.divf %74, %75 : vector<8x96xf32>
    %77 = vector.extract_strided_slice %70 {offsets = [0, 96], sizes = [8, 32], strides = [1, 1]} : vector<8x128xf32> to vector<8x32xf32>
    %78 = math.tanh %77 : vector<8x32xf32>
    %79 = vector.extract_strided_slice %76 {offsets = [0, 0], sizes = [8, 32], strides = [1, 1]} : vector<8x96xf32> to vector<8x32xf32>
    %80 = vector.extract_strided_slice %76 {offsets = [0, 32], sizes = [8, 32], strides = [1, 1]} : vector<8x96xf32> to vector<8x32xf32>
    %81 = vector.extract_strided_slice %76 {offsets = [0, 64], sizes = [8, 32], strides = [1, 1]} : vector<8x96xf32> to vector<8x32xf32>
    %82 = arith.mulf %80, %21 : vector<8x32xf32>
    %83 = arith.mulf %79, %78 : vector<8x32xf32>
    %84 = arith.addf %82, %83 : vector<8x32xf32>
    %85 = math.tanh %84 : vector<8x32xf32>
    %86 = arith.mulf %81, %85 : vector<8x32xf32>
    %c1 = arith.constant 1 : index
    %c0_35 = arith.constant 0 : index
    %c0_36 = arith.constant 0 : index
    %87 = vector.load %arg2[%c1, %c0_35, %c0_36] : memref<8x8x8xbf16, #tpu.memory_space<vmem>>, vector<1x8x8xbf16>
    %88 = vector.shape_cast %87 : vector<1x8x8xbf16> to vector<8x8xbf16>
    %cst_37 = arith.constant dense<0.000000e+00> : vector<8x128xf32>
    %89 = tpu.matmul %88, %3, %cst_37 {dimension_numbers = #tpu.dot_dimension_numbers<[1], [0], [0], [1], [0, 0, 1, 1], [], []>} : vector<8x8xbf16>, vector<8x128xbf16>, vector<8x128xf32> -> vector<8x128xf32>
    %90 = arith.truncf %44 : vector<8x32xf32> to vector<8x32xbf16>
    %cst_38 = arith.constant dense<0.000000e+00> : vector<8x128xf32>
    %91 = tpu.matmul %90, %4, %cst_38 {dimension_numbers = #tpu.dot_dimension_numbers<[1], [0], [0], [1], [0, 0, 1, 1], [], []>} : vector<8x32xbf16>, vector<32x128xbf16>, vector<8x128xf32> -> vector<8x128xf32>
    %92 = arith.addf %89, %91 : vector<8x128xf32>
    %93 = arith.addf %92, %7 : vector<8x128xf32>
    %94 = vector.extract_strided_slice %93 {offsets = [0, 0], sizes = [8, 96], strides = [1, 1]} : vector<8x128xf32> to vector<8x96xf32>
    %95 = arith.negf %94 : vector<8x96xf32>
    %96 = math.exp %95 : vector<8x96xf32>
    %cst_39 = arith.constant 1.000000e+00 : f32
    %97 = vector.broadcast %cst_39 : f32 to vector<8x96xf32>
    %98 = arith.addf %97, %96 : vector<8x96xf32>
    %99 = arith.divf %97, %98 : vector<8x96xf32>
    %100 = vector.extract_strided_slice %93 {offsets = [0, 96], sizes = [8, 32], strides = [1, 1]} : vector<8x128xf32> to vector<8x32xf32>
    %101 = math.tanh %100 : vector<8x32xf32>
    %102 = vector.extract_strided_slice %99 {offsets = [0, 0], sizes = [8, 32], strides = [1, 1]} : vector<8x96xf32> to vector<8x32xf32>
    %103 = vector.extract_strided_slice %99 {offsets = [0, 32], sizes = [8, 32], strides = [1, 1]} : vector<8x96xf32> to vector<8x32xf32>
    %104 = vector.extract_strided_slice %99 {offsets = [0, 64], sizes = [8, 32], strides = [1, 1]} : vector<8x96xf32> to vector<8x32xf32>
    %105 = arith.mulf %103, %42 : vector<8x32xf32>
    %106 = arith.mulf %102, %101 : vector<8x32xf32>
    %107 = arith.addf %105, %106 : vector<8x32xf32>
    %108 = math.tanh %107 : vector<8x32xf32>
    %109 = arith.mulf %104, %108 : vector<8x32xf32>
    %110 = arith.truncf %109 : vector<8x32xf32> to vector<8x32xbf16>
    %111 = arith.truncf %65 : vector<8x32xf32> to vector<8x32xbf16>
    %112 = tpu.concatenate %110, %111 in 1 : vector<8x32xbf16>, vector<8x32xbf16> -> vector<8x64xbf16>
    %cst_40 = arith.constant dense<0.000000e+00> : vector<8x128xf32>
    %113 = tpu.matmul %112, %8, %cst_40 {dimension_numbers = #tpu.dot_dimension_numbers<[1], [0], [0], [1], [0, 0, 1, 1], [], []>} : vector<8x64xbf16>, vector<64x128xbf16>, vector<8x128xf32> -> vector<8x128xf32>
    %114 = arith.addf %113, %11 : vector<8x128xf32>
    %115 = vector.extract_strided_slice %114 {offsets = [0, 0], sizes = [8, 96], strides = [1, 1]} : vector<8x128xf32> to vector<8x96xf32>
    %116 = arith.negf %115 : vector<8x96xf32>
    %117 = math.exp %116 : vector<8x96xf32>
    %cst_41 = arith.constant 1.000000e+00 : f32
    %118 = vector.broadcast %cst_41 : f32 to vector<8x96xf32>
    %119 = arith.addf %118, %117 : vector<8x96xf32>
    %120 = arith.divf %118, %119 : vector<8x96xf32>
    %121 = vector.extract_strided_slice %114 {offsets = [0, 96], sizes = [8, 32], strides = [1, 1]} : vector<8x128xf32> to vector<8x32xf32>
    %122 = math.tanh %121 : vector<8x32xf32>
    %123 = vector.extract_strided_slice %120 {offsets = [0, 0], sizes = [8, 32], strides = [1, 1]} : vector<8x96xf32> to vector<8x32xf32>
    %124 = vector.extract_strided_slice %120 {offsets = [0, 32], sizes = [8, 32], strides = [1, 1]} : vector<8x96xf32> to vector<8x32xf32>
    %125 = vector.extract_strided_slice %120 {offsets = [0, 64], sizes = [8, 32], strides = [1, 1]} : vector<8x96xf32> to vector<8x32xf32>
    %126 = arith.mulf %124, %63 : vector<8x32xf32>
    %127 = arith.mulf %123, %122 : vector<8x32xf32>
    %128 = arith.addf %126, %127 : vector<8x32xf32>
    %129 = math.tanh %128 : vector<8x32xf32>
    %130 = arith.mulf %125, %129 : vector<8x32xf32>
    %131 = arith.truncf %130 : vector<8x32xf32> to vector<8x32xbf16>
    %132 = arith.truncf %86 : vector<8x32xf32> to vector<8x32xbf16>
    %133 = tpu.concatenate %131, %132 in 1 : vector<8x32xbf16>, vector<8x32xbf16> -> vector<8x64xbf16>
    %cst_42 = arith.constant dense<0.000000e+00> : vector<8x128xf32>
    %134 = tpu.matmul %133, %12, %cst_42 {dimension_numbers = #tpu.dot_dimension_numbers<[1], [0], [0], [1], [0, 0, 1, 1], [], []>} : vector<8x64xbf16>, vector<64x128xbf16>, vector<8x128xf32> -> vector<8x128xf32>
    %135 = arith.addf %134, %15 : vector<8x128xf32>
    %136 = vector.extract_strided_slice %135 {offsets = [0, 0], sizes = [8, 96], strides = [1, 1]} : vector<8x128xf32> to vector<8x96xf32>
    %137 = arith.negf %136 : vector<8x96xf32>
    %138 = math.exp %137 : vector<8x96xf32>
    %cst_43 = arith.constant 1.000000e+00 : f32
    %139 = vector.broadcast %cst_43 : f32 to vector<8x96xf32>
    %140 = arith.addf %139, %138 : vector<8x96xf32>
    %141 = arith.divf %139, %140 : vector<8x96xf32>
    %142 = vector.extract_strided_slice %135 {offsets = [0, 96], sizes = [8, 32], strides = [1, 1]} : vector<8x128xf32> to vector<8x32xf32>
    %143 = math.tanh %142 : vector<8x32xf32>
    %144 = vector.extract_strided_slice %141 {offsets = [0, 0], sizes = [8, 32], strides = [1, 1]} : vector<8x96xf32> to vector<8x32xf32>
    %145 = vector.extract_strided_slice %141 {offsets = [0, 32], sizes = [8, 32], strides = [1, 1]} : vector<8x96xf32> to vector<8x32xf32>
    %146 = vector.extract_strided_slice %141 {offsets = [0, 64], sizes = [8, 32], strides = [1, 1]} : vector<8x96xf32> to vector<8x32xf32>
    %147 = arith.mulf %145, %84 : vector<8x32xf32>
    %148 = arith.mulf %144, %143 : vector<8x32xf32>
    %149 = arith.addf %147, %148 : vector<8x32xf32>
    %150 = math.tanh %149 : vector<8x32xf32>
    %151 = arith.mulf %146, %150 : vector<8x32xf32>
    %c2 = arith.constant 2 : index
    %c0_44 = arith.constant 0 : index
    %c0_45 = arith.constant 0 : index
    %152 = vector.load %arg2[%c2, %c0_44, %c0_45] : memref<8x8x8xbf16, #tpu.memory_space<vmem>>, vector<1x8x8xbf16>
    %153 = vector.shape_cast %152 : vector<1x8x8xbf16> to vector<8x8xbf16>
    %cst_46 = arith.constant dense<0.000000e+00> : vector<8x128xf32>
    %154 = tpu.matmul %153, %3, %cst_46 {dimension_numbers = #tpu.dot_dimension_numbers<[1], [0], [0], [1], [0, 0, 1, 1], [], []>} : vector<8x8xbf16>, vector<8x128xbf16>, vector<8x128xf32> -> vector<8x128xf32>
    %155 = arith.truncf %109 : vector<8x32xf32> to vector<8x32xbf16>
    %cst_47 = arith.constant dense<0.000000e+00> : vector<8x128xf32>
    %156 = tpu.matmul %155, %4, %cst_47 {dimension_numbers = #tpu.dot_dimension_numbers<[1], [0], [0], [1], [0, 0, 1, 1], [], []>} : vector<8x32xbf16>, vector<32x128xbf16>, vector<8x128xf32> -> vector<8x128xf32>
    %157 = arith.addf %154, %156 : vector<8x128xf32>
    %158 = arith.addf %157, %7 : vector<8x128xf32>
    %159 = vector.extract_strided_slice %158 {offsets = [0, 0], sizes = [8, 96], strides = [1, 1]} : vector<8x128xf32> to vector<8x96xf32>
    %160 = arith.negf %159 : vector<8x96xf32>
    %161 = math.exp %160 : vector<8x96xf32>
    %cst_48 = arith.constant 1.000000e+00 : f32
    %162 = vector.broadcast %cst_48 : f32 to vector<8x96xf32>
    %163 = arith.addf %162, %161 : vector<8x96xf32>
    %164 = arith.divf %162, %163 : vector<8x96xf32>
    %165 = vector.extract_strided_slice %158 {offsets = [0, 96], sizes = [8, 32], strides = [1, 1]} : vector<8x128xf32> to vector<8x32xf32>
    %166 = math.tanh %165 : vector<8x32xf32>
    %167 = vector.extract_strided_slice %164 {offsets = [0, 0], sizes = [8, 32], strides = [1, 1]} : vector<8x96xf32> to vector<8x32xf32>
    %168 = vector.extract_strided_slice %164 {offsets = [0, 32], sizes = [8, 32], strides = [1, 1]} : vector<8x96xf32> to vector<8x32xf32>
    %169 = vector.extract_strided_slice %164 {offsets = [0, 64], sizes = [8, 32], strides = [1, 1]} : vector<8x96xf32> to vector<8x32xf32>
    %170 = arith.mulf %168, %107 : vector<8x32xf32>
    %171 = arith.mulf %167, %166 : vector<8x32xf32>
    %172 = arith.addf %170, %171 : vector<8x32xf32>
    %173 = math.tanh %172 : vector<8x32xf32>
    %174 = arith.mulf %169, %173 : vector<8x32xf32>
    %175 = arith.truncf %174 : vector<8x32xf32> to vector<8x32xbf16>
    %176 = arith.truncf %130 : vector<8x32xf32> to vector<8x32xbf16>
    %177 = tpu.concatenate %175, %176 in 1 : vector<8x32xbf16>, vector<8x32xbf16> -> vector<8x64xbf16>
    %cst_49 = arith.constant dense<0.000000e+00> : vector<8x128xf32>
    %178 = tpu.matmul %177, %8, %cst_49 {dimension_numbers = #tpu.dot_dimension_numbers<[1], [0], [0], [1], [0, 0, 1, 1], [], []>} : vector<8x64xbf16>, vector<64x128xbf16>, vector<8x128xf32> -> vector<8x128xf32>
    %179 = arith.addf %178, %11 : vector<8x128xf32>
    %180 = vector.extract_strided_slice %179 {offsets = [0, 0], sizes = [8, 96], strides = [1, 1]} : vector<8x128xf32> to vector<8x96xf32>
    %181 = arith.negf %180 : vector<8x96xf32>
    %182 = math.exp %181 : vector<8x96xf32>
    %cst_50 = arith.constant 1.000000e+00 : f32
    %183 = vector.broadcast %cst_50 : f32 to vector<8x96xf32>
    %184 = arith.addf %183, %182 : vector<8x96xf32>
    %185 = arith.divf %183, %184 : vector<8x96xf32>
    %186 = vector.extract_strided_slice %179 {offsets = [0, 96], sizes = [8, 32], strides = [1, 1]} : vector<8x128xf32> to vector<8x32xf32>
    %187 = math.tanh %186 : vector<8x32xf32>
    %188 = vector.extract_strided_slice %185 {offsets = [0, 0], sizes = [8, 32], strides = [1, 1]} : vector<8x96xf32> to vector<8x32xf32>
    %189 = vector.extract_strided_slice %185 {offsets = [0, 32], sizes = [8, 32], strides = [1, 1]} : vector<8x96xf32> to vector<8x32xf32>
    %190 = vector.extract_strided_slice %185 {offsets = [0, 64], sizes = [8, 32], strides = [1, 1]} : vector<8x96xf32> to vector<8x32xf32>
    %191 = arith.mulf %189, %128 : vector<8x32xf32>
    %192 = arith.mulf %188, %187 : vector<8x32xf32>
    %193 = arith.addf %191, %192 : vector<8x32xf32>
    %194 = math.tanh %193 : vector<8x32xf32>
    %195 = arith.mulf %190, %194 : vector<8x32xf32>
    %196 = arith.truncf %195 : vector<8x32xf32> to vector<8x32xbf16>
    %197 = arith.truncf %151 : vector<8x32xf32> to vector<8x32xbf16>
    %198 = tpu.concatenate %196, %197 in 1 : vector<8x32xbf16>, vector<8x32xbf16> -> vector<8x64xbf16>
    %cst_51 = arith.constant dense<0.000000e+00> : vector<8x128xf32>
    %199 = tpu.matmul %198, %12, %cst_51 {dimension_numbers = #tpu.dot_dimension_numbers<[1], [0], [0], [1], [0, 0, 1, 1], [], []>} : vector<8x64xbf16>, vector<64x128xbf16>, vector<8x128xf32> -> vector<8x128xf32>
    %200 = arith.addf %199, %15 : vector<8x128xf32>
    %201 = vector.extract_strided_slice %200 {offsets = [0, 0], sizes = [8, 96], strides = [1, 1]} : vector<8x128xf32> to vector<8x96xf32>
    %202 = arith.negf %201 : vector<8x96xf32>
    %203 = math.exp %202 : vector<8x96xf32>
    %cst_52 = arith.constant 1.000000e+00 : f32
    %204 = vector.broadcast %cst_52 : f32 to vector<8x96xf32>
    %205 = arith.addf %204, %203 : vector<8x96xf32>
    %206 = arith.divf %204, %205 : vector<8x96xf32>
    %207 = vector.extract_strided_slice %200 {offsets = [0, 96], sizes = [8, 32], strides = [1, 1]} : vector<8x128xf32> to vector<8x32xf32>
    %208 = math.tanh %207 : vector<8x32xf32>
    %209 = vector.extract_strided_slice %206 {offsets = [0, 0], sizes = [8, 32], strides = [1, 1]} : vector<8x96xf32> to vector<8x32xf32>
    %210 = vector.extract_strided_slice %206 {offsets = [0, 32], sizes = [8, 32], strides = [1, 1]} : vector<8x96xf32> to vector<8x32xf32>
    %211 = vector.extract_strided_slice %206 {offsets = [0, 64], sizes = [8, 32], strides = [1, 1]} : vector<8x96xf32> to vector<8x32xf32>
    %212 = arith.mulf %210, %149 : vector<8x32xf32>
    %213 = arith.mulf %209, %208 : vector<8x32xf32>
    %214 = arith.addf %212, %213 : vector<8x32xf32>
    %215 = math.tanh %214 : vector<8x32xf32>
    %216 = arith.mulf %211, %215 : vector<8x32xf32>
    %c3 = arith.constant 3 : index
    %c0_53 = arith.constant 0 : index
    %c0_54 = arith.constant 0 : index
    %217 = vector.load %arg2[%c3, %c0_53, %c0_54] : memref<8x8x8xbf16, #tpu.memory_space<vmem>>, vector<1x8x8xbf16>
    %218 = vector.shape_cast %217 : vector<1x8x8xbf16> to vector<8x8xbf16>
    %cst_55 = arith.constant dense<0.000000e+00> : vector<8x128xf32>
    %219 = tpu.matmul %218, %3, %cst_55 {dimension_numbers = #tpu.dot_dimension_numbers<[1], [0], [0], [1], [0, 0, 1, 1], [], []>} : vector<8x8xbf16>, vector<8x128xbf16>, vector<8x128xf32> -> vector<8x128xf32>
    %220 = arith.truncf %174 : vector<8x32xf32> to vector<8x32xbf16>
    %cst_56 = arith.constant dense<0.000000e+00> : vector<8x128xf32>
    %221 = tpu.matmul %220, %4, %cst_56 {dimension_numbers = #tpu.dot_dimension_numbers<[1], [0], [0], [1], [0, 0, 1, 1], [], []>} : vector<8x32xbf16>, vector<32x128xbf16>, vector<8x128xf32> -> vector<8x128xf32>
    %222 = arith.addf %219, %221 : vector<8x128xf32>
    %223 = arith.addf %222, %7 : vector<8x128xf32>
    %224 = vector.extract_strided_slice %223 {offsets = [0, 0], sizes = [8, 96], strides = [1, 1]} : vector<8x128xf32> to vector<8x96xf32>
    %225 = arith.negf %224 : vector<8x96xf32>
    %226 = math.exp %225 : vector<8x96xf32>
    %cst_57 = arith.constant 1.000000e+00 : f32
    %227 = vector.broadcast %cst_57 : f32 to vector<8x96xf32>
    %228 = arith.addf %227, %226 : vector<8x96xf32>
    %229 = arith.divf %227, %228 : vector<8x96xf32>
    %230 = vector.extract_strided_slice %223 {offsets = [0, 96], sizes = [8, 32], strides = [1, 1]} : vector<8x128xf32> to vector<8x32xf32>
    %231 = math.tanh %230 : vector<8x32xf32>
    %232 = vector.extract_strided_slice %229 {offsets = [0, 0], sizes = [8, 32], strides = [1, 1]} : vector<8x96xf32> to vector<8x32xf32>
    %233 = vector.extract_strided_slice %229 {offsets = [0, 32], sizes = [8, 32], strides = [1, 1]} : vector<8x96xf32> to vector<8x32xf32>
    %234 = vector.extract_strided_slice %229 {offsets = [0, 64], sizes = [8, 32], strides = [1, 1]} : vector<8x96xf32> to vector<8x32xf32>
    %235 = arith.mulf %233, %172 : vector<8x32xf32>
    %236 = arith.mulf %232, %231 : vector<8x32xf32>
    %237 = arith.addf %235, %236 : vector<8x32xf32>
    %238 = math.tanh %237 : vector<8x32xf32>
    %239 = arith.mulf %234, %238 : vector<8x32xf32>
    %240 = arith.truncf %239 : vector<8x32xf32> to vector<8x32xbf16>
    %241 = arith.truncf %195 : vector<8x32xf32> to vector<8x32xbf16>
    %242 = tpu.concatenate %240, %241 in 1 : vector<8x32xbf16>, vector<8x32xbf16> -> vector<8x64xbf16>
    %cst_58 = arith.constant dense<0.000000e+00> : vector<8x128xf32>
    %243 = tpu.matmul %242, %8, %cst_58 {dimension_numbers = #tpu.dot_dimension_numbers<[1], [0], [0], [1], [0, 0, 1, 1], [], []>} : vector<8x64xbf16>, vector<64x128xbf16>, vector<8x128xf32> -> vector<8x128xf32>
    %244 = arith.addf %243, %11 : vector<8x128xf32>
    %245 = vector.extract_strided_slice %244 {offsets = [0, 0], sizes = [8, 96], strides = [1, 1]} : vector<8x128xf32> to vector<8x96xf32>
    %246 = arith.negf %245 : vector<8x96xf32>
    %247 = math.exp %246 : vector<8x96xf32>
    %cst_59 = arith.constant 1.000000e+00 : f32
    %248 = vector.broadcast %cst_59 : f32 to vector<8x96xf32>
    %249 = arith.addf %248, %247 : vector<8x96xf32>
    %250 = arith.divf %248, %249 : vector<8x96xf32>
    %251 = vector.extract_strided_slice %244 {offsets = [0, 96], sizes = [8, 32], strides = [1, 1]} : vector<8x128xf32> to vector<8x32xf32>
    %252 = math.tanh %251 : vector<8x32xf32>
    %253 = vector.extract_strided_slice %250 {offsets = [0, 0], sizes = [8, 32], strides = [1, 1]} : vector<8x96xf32> to vector<8x32xf32>
    %254 = vector.extract_strided_slice %250 {offsets = [0, 32], sizes = [8, 32], strides = [1, 1]} : vector<8x96xf32> to vector<8x32xf32>
    %255 = vector.extract_strided_slice %250 {offsets = [0, 64], sizes = [8, 32], strides = [1, 1]} : vector<8x96xf32> to vector<8x32xf32>
    %256 = arith.mulf %254, %193 : vector<8x32xf32>
    %257 = arith.mulf %253, %252 : vector<8x32xf32>
    %258 = arith.addf %256, %257 : vector<8x32xf32>
    %259 = math.tanh %258 : vector<8x32xf32>
    %260 = arith.mulf %255, %259 : vector<8x32xf32>
    %261 = arith.truncf %260 : vector<8x32xf32> to vector<8x32xbf16>
    %262 = arith.truncf %216 : vector<8x32xf32> to vector<8x32xbf16>
    %263 = tpu.concatenate %261, %262 in 1 : vector<8x32xbf16>, vector<8x32xbf16> -> vector<8x64xbf16>
    %cst_60 = arith.constant dense<0.000000e+00> : vector<8x128xf32>
    %264 = tpu.matmul %263, %12, %cst_60 {dimension_numbers = #tpu.dot_dimension_numbers<[1], [0], [0], [1], [0, 0, 1, 1], [], []>} : vector<8x64xbf16>, vector<64x128xbf16>, vector<8x128xf32> -> vector<8x128xf32>
    %265 = arith.addf %264, %15 : vector<8x128xf32>
    %266 = vector.extract_strided_slice %265 {offsets = [0, 0], sizes = [8, 96], strides = [1, 1]} : vector<8x128xf32> to vector<8x96xf32>
    %267 = arith.negf %266 : vector<8x96xf32>
    %268 = math.exp %267 : vector<8x96xf32>
    %cst_61 = arith.constant 1.000000e+00 : f32
    %269 = vector.broadcast %cst_61 : f32 to vector<8x96xf32>
    %270 = arith.addf %269, %268 : vector<8x96xf32>
    %271 = arith.divf %269, %270 : vector<8x96xf32>
    %272 = vector.extract_strided_slice %265 {offsets = [0, 96], sizes = [8, 32], strides = [1, 1]} : vector<8x128xf32> to vector<8x32xf32>
    %273 = math.tanh %272 : vector<8x32xf32>
    %274 = vector.extract_strided_slice %271 {offsets = [0, 0], sizes = [8, 32], strides = [1, 1]} : vector<8x96xf32> to vector<8x32xf32>
    %275 = vector.extract_strided_slice %271 {offsets = [0, 32], sizes = [8, 32], strides = [1, 1]} : vector<8x96xf32> to vector<8x32xf32>
    %276 = vector.extract_strided_slice %271 {offsets = [0, 64], sizes = [8, 32], strides = [1, 1]} : vector<8x96xf32> to vector<8x32xf32>
    %277 = arith.mulf %275, %214 : vector<8x32xf32>
    %278 = arith.mulf %274, %273 : vector<8x32xf32>
    %279 = arith.addf %277, %278 : vector<8x32xf32>
    %280 = math.tanh %279 : vector<8x32xf32>
    %281 = arith.mulf %276, %280 : vector<8x32xf32>
    %c4 = arith.constant 4 : index
    %c0_62 = arith.constant 0 : index
    %c0_63 = arith.constant 0 : index
    %282 = vector.load %arg2[%c4, %c0_62, %c0_63] : memref<8x8x8xbf16, #tpu.memory_space<vmem>>, vector<1x8x8xbf16>
    %283 = vector.shape_cast %282 : vector<1x8x8xbf16> to vector<8x8xbf16>
    %cst_64 = arith.constant dense<0.000000e+00> : vector<8x128xf32>
    %284 = tpu.matmul %283, %3, %cst_64 {dimension_numbers = #tpu.dot_dimension_numbers<[1], [0], [0], [1], [0, 0, 1, 1], [], []>} : vector<8x8xbf16>, vector<8x128xbf16>, vector<8x128xf32> -> vector<8x128xf32>
    %285 = arith.truncf %239 : vector<8x32xf32> to vector<8x32xbf16>
    %cst_65 = arith.constant dense<0.000000e+00> : vector<8x128xf32>
    %286 = tpu.matmul %285, %4, %cst_65 {dimension_numbers = #tpu.dot_dimension_numbers<[1], [0], [0], [1], [0, 0, 1, 1], [], []>} : vector<8x32xbf16>, vector<32x128xbf16>, vector<8x128xf32> -> vector<8x128xf32>
    %287 = arith.addf %284, %286 : vector<8x128xf32>
    %288 = arith.addf %287, %7 : vector<8x128xf32>
    %289 = vector.extract_strided_slice %288 {offsets = [0, 0], sizes = [8, 96], strides = [1, 1]} : vector<8x128xf32> to vector<8x96xf32>
    %290 = arith.negf %289 : vector<8x96xf32>
    %291 = math.exp %290 : vector<8x96xf32>
    %cst_66 = arith.constant 1.000000e+00 : f32
    %292 = vector.broadcast %cst_66 : f32 to vector<8x96xf32>
    %293 = arith.addf %292, %291 : vector<8x96xf32>
    %294 = arith.divf %292, %293 : vector<8x96xf32>
    %295 = vector.extract_strided_slice %288 {offsets = [0, 96], sizes = [8, 32], strides = [1, 1]} : vector<8x128xf32> to vector<8x32xf32>
    %296 = math.tanh %295 : vector<8x32xf32>
    %297 = vector.extract_strided_slice %294 {offsets = [0, 0], sizes = [8, 32], strides = [1, 1]} : vector<8x96xf32> to vector<8x32xf32>
    %298 = vector.extract_strided_slice %294 {offsets = [0, 32], sizes = [8, 32], strides = [1, 1]} : vector<8x96xf32> to vector<8x32xf32>
    %299 = vector.extract_strided_slice %294 {offsets = [0, 64], sizes = [8, 32], strides = [1, 1]} : vector<8x96xf32> to vector<8x32xf32>
    %300 = arith.mulf %298, %237 : vector<8x32xf32>
    %301 = arith.mulf %297, %296 : vector<8x32xf32>
    %302 = arith.addf %300, %301 : vector<8x32xf32>
    %303 = math.tanh %302 : vector<8x32xf32>
    %304 = arith.mulf %299, %303 : vector<8x32xf32>
    %305 = arith.truncf %304 : vector<8x32xf32> to vector<8x32xbf16>
    %306 = arith.truncf %260 : vector<8x32xf32> to vector<8x32xbf16>
    %307 = tpu.concatenate %305, %306 in 1 : vector<8x32xbf16>, vector<8x32xbf16> -> vector<8x64xbf16>
    %cst_67 = arith.constant dense<0.000000e+00> : vector<8x128xf32>
    %308 = tpu.matmul %307, %8, %cst_67 {dimension_numbers = #tpu.dot_dimension_numbers<[1], [0], [0], [1], [0, 0, 1, 1], [], []>} : vector<8x64xbf16>, vector<64x128xbf16>, vector<8x128xf32> -> vector<8x128xf32>
    %309 = arith.addf %308, %11 : vector<8x128xf32>
    %310 = vector.extract_strided_slice %309 {offsets = [0, 0], sizes = [8, 96], strides = [1, 1]} : vector<8x128xf32> to vector<8x96xf32>
    %311 = arith.negf %310 : vector<8x96xf32>
    %312 = math.exp %311 : vector<8x96xf32>
    %cst_68 = arith.constant 1.000000e+00 : f32
    %313 = vector.broadcast %cst_68 : f32 to vector<8x96xf32>
    %314 = arith.addf %313, %312 : vector<8x96xf32>
    %315 = arith.divf %313, %314 : vector<8x96xf32>
    %316 = vector.extract_strided_slice %309 {offsets = [0, 96], sizes = [8, 32], strides = [1, 1]} : vector<8x128xf32> to vector<8x32xf32>
    %317 = math.tanh %316 : vector<8x32xf32>
    %318 = vector.extract_strided_slice %315 {offsets = [0, 0], sizes = [8, 32], strides = [1, 1]} : vector<8x96xf32> to vector<8x32xf32>
    %319 = vector.extract_strided_slice %315 {offsets = [0, 32], sizes = [8, 32], strides = [1, 1]} : vector<8x96xf32> to vector<8x32xf32>
    %320 = vector.extract_strided_slice %315 {offsets = [0, 64], sizes = [8, 32], strides = [1, 1]} : vector<8x96xf32> to vector<8x32xf32>
    %321 = arith.mulf %319, %258 : vector<8x32xf32>
    %322 = arith.mulf %318, %317 : vector<8x32xf32>
    %323 = arith.addf %321, %322 : vector<8x32xf32>
    %324 = math.tanh %323 : vector<8x32xf32>
    %325 = arith.mulf %320, %324 : vector<8x32xf32>
    %326 = arith.truncf %325 : vector<8x32xf32> to vector<8x32xbf16>
    %327 = arith.truncf %281 : vector<8x32xf32> to vector<8x32xbf16>
    %328 = tpu.concatenate %326, %327 in 1 : vector<8x32xbf16>, vector<8x32xbf16> -> vector<8x64xbf16>
    %cst_69 = arith.constant dense<0.000000e+00> : vector<8x128xf32>
    %329 = tpu.matmul %328, %12, %cst_69 {dimension_numbers = #tpu.dot_dimension_numbers<[1], [0], [0], [1], [0, 0, 1, 1], [], []>} : vector<8x64xbf16>, vector<64x128xbf16>, vector<8x128xf32> -> vector<8x128xf32>
    %330 = arith.addf %329, %15 : vector<8x128xf32>
    %331 = vector.extract_strided_slice %330 {offsets = [0, 0], sizes = [8, 96], strides = [1, 1]} : vector<8x128xf32> to vector<8x96xf32>
    %332 = arith.negf %331 : vector<8x96xf32>
    %333 = math.exp %332 : vector<8x96xf32>
    %cst_70 = arith.constant 1.000000e+00 : f32
    %334 = vector.broadcast %cst_70 : f32 to vector<8x96xf32>
    %335 = arith.addf %334, %333 : vector<8x96xf32>
    %336 = arith.divf %334, %335 : vector<8x96xf32>
    %337 = vector.extract_strided_slice %330 {offsets = [0, 96], sizes = [8, 32], strides = [1, 1]} : vector<8x128xf32> to vector<8x32xf32>
    %338 = math.tanh %337 : vector<8x32xf32>
    %339 = vector.extract_strided_slice %336 {offsets = [0, 0], sizes = [8, 32], strides = [1, 1]} : vector<8x96xf32> to vector<8x32xf32>
    %340 = vector.extract_strided_slice %336 {offsets = [0, 32], sizes = [8, 32], strides = [1, 1]} : vector<8x96xf32> to vector<8x32xf32>
    %341 = vector.extract_strided_slice %336 {offsets = [0, 64], sizes = [8, 32], strides = [1, 1]} : vector<8x96xf32> to vector<8x32xf32>
    %342 = arith.mulf %340, %279 : vector<8x32xf32>
    %343 = arith.mulf %339, %338 : vector<8x32xf32>
    %344 = arith.addf %342, %343 : vector<8x32xf32>
    %345 = math.tanh %344 : vector<8x32xf32>
    %346 = arith.mulf %341, %345 : vector<8x32xf32>
    %c5 = arith.constant 5 : index
    %c0_71 = arith.constant 0 : index
    %c0_72 = arith.constant 0 : index
    %347 = vector.load %arg2[%c5, %c0_71, %c0_72] : memref<8x8x8xbf16, #tpu.memory_space<vmem>>, vector<1x8x8xbf16>
    %348 = vector.shape_cast %347 : vector<1x8x8xbf16> to vector<8x8xbf16>
    %cst_73 = arith.constant dense<0.000000e+00> : vector<8x128xf32>
    %349 = tpu.matmul %348, %3, %cst_73 {dimension_numbers = #tpu.dot_dimension_numbers<[1], [0], [0], [1], [0, 0, 1, 1], [], []>} : vector<8x8xbf16>, vector<8x128xbf16>, vector<8x128xf32> -> vector<8x128xf32>
    %350 = arith.truncf %304 : vector<8x32xf32> to vector<8x32xbf16>
    %cst_74 = arith.constant dense<0.000000e+00> : vector<8x128xf32>
    %351 = tpu.matmul %350, %4, %cst_74 {dimension_numbers = #tpu.dot_dimension_numbers<[1], [0], [0], [1], [0, 0, 1, 1], [], []>} : vector<8x32xbf16>, vector<32x128xbf16>, vector<8x128xf32> -> vector<8x128xf32>
    %352 = arith.addf %349, %351 : vector<8x128xf32>
    %353 = arith.addf %352, %7 : vector<8x128xf32>
    %354 = vector.extract_strided_slice %353 {offsets = [0, 0], sizes = [8, 96], strides = [1, 1]} : vector<8x128xf32> to vector<8x96xf32>
    %355 = arith.negf %354 : vector<8x96xf32>
    %356 = math.exp %355 : vector<8x96xf32>
    %cst_75 = arith.constant 1.000000e+00 : f32
    %357 = vector.broadcast %cst_75 : f32 to vector<8x96xf32>
    %358 = arith.addf %357, %356 : vector<8x96xf32>
    %359 = arith.divf %357, %358 : vector<8x96xf32>
    %360 = vector.extract_strided_slice %353 {offsets = [0, 96], sizes = [8, 32], strides = [1, 1]} : vector<8x128xf32> to vector<8x32xf32>
    %361 = math.tanh %360 : vector<8x32xf32>
    %362 = vector.extract_strided_slice %359 {offsets = [0, 0], sizes = [8, 32], strides = [1, 1]} : vector<8x96xf32> to vector<8x32xf32>
    %363 = vector.extract_strided_slice %359 {offsets = [0, 32], sizes = [8, 32], strides = [1, 1]} : vector<8x96xf32> to vector<8x32xf32>
    %364 = vector.extract_strided_slice %359 {offsets = [0, 64], sizes = [8, 32], strides = [1, 1]} : vector<8x96xf32> to vector<8x32xf32>
    %365 = arith.mulf %363, %302 : vector<8x32xf32>
    %366 = arith.mulf %362, %361 : vector<8x32xf32>
    %367 = arith.addf %365, %366 : vector<8x32xf32>
    %368 = math.tanh %367 : vector<8x32xf32>
    %369 = arith.mulf %364, %368 : vector<8x32xf32>
    %370 = arith.truncf %369 : vector<8x32xf32> to vector<8x32xbf16>
    %371 = arith.truncf %325 : vector<8x32xf32> to vector<8x32xbf16>
    %372 = tpu.concatenate %370, %371 in 1 : vector<8x32xbf16>, vector<8x32xbf16> -> vector<8x64xbf16>
    %cst_76 = arith.constant dense<0.000000e+00> : vector<8x128xf32>
    %373 = tpu.matmul %372, %8, %cst_76 {dimension_numbers = #tpu.dot_dimension_numbers<[1], [0], [0], [1], [0, 0, 1, 1], [], []>} : vector<8x64xbf16>, vector<64x128xbf16>, vector<8x128xf32> -> vector<8x128xf32>
    %374 = arith.addf %373, %11 : vector<8x128xf32>
    %375 = vector.extract_strided_slice %374 {offsets = [0, 0], sizes = [8, 96], strides = [1, 1]} : vector<8x128xf32> to vector<8x96xf32>
    %376 = arith.negf %375 : vector<8x96xf32>
    %377 = math.exp %376 : vector<8x96xf32>
    %cst_77 = arith.constant 1.000000e+00 : f32
    %378 = vector.broadcast %cst_77 : f32 to vector<8x96xf32>
    %379 = arith.addf %378, %377 : vector<8x96xf32>
    %380 = arith.divf %378, %379 : vector<8x96xf32>
    %381 = vector.extract_strided_slice %374 {offsets = [0, 96], sizes = [8, 32], strides = [1, 1]} : vector<8x128xf32> to vector<8x32xf32>
    %382 = math.tanh %381 : vector<8x32xf32>
    %383 = vector.extract_strided_slice %380 {offsets = [0, 0], sizes = [8, 32], strides = [1, 1]} : vector<8x96xf32> to vector<8x32xf32>
    %384 = vector.extract_strided_slice %380 {offsets = [0, 32], sizes = [8, 32], strides = [1, 1]} : vector<8x96xf32> to vector<8x32xf32>
    %385 = vector.extract_strided_slice %380 {offsets = [0, 64], sizes = [8, 32], strides = [1, 1]} : vector<8x96xf32> to vector<8x32xf32>
    %386 = arith.mulf %384, %323 : vector<8x32xf32>
    %387 = arith.mulf %383, %382 : vector<8x32xf32>
    %388 = arith.addf %386, %387 : vector<8x32xf32>
    %389 = math.tanh %388 : vector<8x32xf32>
    %390 = arith.mulf %385, %389 : vector<8x32xf32>
    %391 = arith.truncf %390 : vector<8x32xf32> to vector<8x32xbf16>
    %392 = arith.truncf %346 : vector<8x32xf32> to vector<8x32xbf16>
    %393 = tpu.concatenate %391, %392 in 1 : vector<8x32xbf16>, vector<8x32xbf16> -> vector<8x64xbf16>
    %cst_78 = arith.constant dense<0.000000e+00> : vector<8x128xf32>
    %394 = tpu.matmul %393, %12, %cst_78 {dimension_numbers = #tpu.dot_dimension_numbers<[1], [0], [0], [1], [0, 0, 1, 1], [], []>} : vector<8x64xbf16>, vector<64x128xbf16>, vector<8x128xf32> -> vector<8x128xf32>
    %395 = arith.addf %394, %15 : vector<8x128xf32>
    %396 = vector.extract_strided_slice %395 {offsets = [0, 0], sizes = [8, 96], strides = [1, 1]} : vector<8x128xf32> to vector<8x96xf32>
    %397 = arith.negf %396 : vector<8x96xf32>
    %398 = math.exp %397 : vector<8x96xf32>
    %cst_79 = arith.constant 1.000000e+00 : f32
    %399 = vector.broadcast %cst_79 : f32 to vector<8x96xf32>
    %400 = arith.addf %399, %398 : vector<8x96xf32>
    %401 = arith.divf %399, %400 : vector<8x96xf32>
    %402 = vector.extract_strided_slice %395 {offsets = [0, 96], sizes = [8, 32], strides = [1, 1]} : vector<8x128xf32> to vector<8x32xf32>
    %403 = math.tanh %402 : vector<8x32xf32>
    %404 = vector.extract_strided_slice %401 {offsets = [0, 0], sizes = [8, 32], strides = [1, 1]} : vector<8x96xf32> to vector<8x32xf32>
    %405 = vector.extract_strided_slice %401 {offsets = [0, 32], sizes = [8, 32], strides = [1, 1]} : vector<8x96xf32> to vector<8x32xf32>
    %406 = vector.extract_strided_slice %401 {offsets = [0, 64], sizes = [8, 32], strides = [1, 1]} : vector<8x96xf32> to vector<8x32xf32>
    %407 = arith.mulf %405, %344 : vector<8x32xf32>
    %408 = arith.mulf %404, %403 : vector<8x32xf32>
    %409 = arith.addf %407, %408 : vector<8x32xf32>
    %410 = math.tanh %409 : vector<8x32xf32>
    %411 = arith.mulf %406, %410 : vector<8x32xf32>
    %c6 = arith.constant 6 : index
    %c0_80 = arith.constant 0 : index
    %c0_81 = arith.constant 0 : index
    %412 = vector.load %arg2[%c6, %c0_80, %c0_81] : memref<8x8x8xbf16, #tpu.memory_space<vmem>>, vector<1x8x8xbf16>
    %413 = vector.shape_cast %412 : vector<1x8x8xbf16> to vector<8x8xbf16>
    %cst_82 = arith.constant dense<0.000000e+00> : vector<8x128xf32>
    %414 = tpu.matmul %413, %3, %cst_82 {dimension_numbers = #tpu.dot_dimension_numbers<[1], [0], [0], [1], [0, 0, 1, 1], [], []>} : vector<8x8xbf16>, vector<8x128xbf16>, vector<8x128xf32> -> vector<8x128xf32>
    %415 = arith.truncf %369 : vector<8x32xf32> to vector<8x32xbf16>
    %cst_83 = arith.constant dense<0.000000e+00> : vector<8x128xf32>
    %416 = tpu.matmul %415, %4, %cst_83 {dimension_numbers = #tpu.dot_dimension_numbers<[1], [0], [0], [1], [0, 0, 1, 1], [], []>} : vector<8x32xbf16>, vector<32x128xbf16>, vector<8x128xf32> -> vector<8x128xf32>
    %417 = arith.addf %414, %416 : vector<8x128xf32>
    %418 = arith.addf %417, %7 : vector<8x128xf32>
    %419 = vector.extract_strided_slice %418 {offsets = [0, 0], sizes = [8, 96], strides = [1, 1]} : vector<8x128xf32> to vector<8x96xf32>
    %420 = arith.negf %419 : vector<8x96xf32>
    %421 = math.exp %420 : vector<8x96xf32>
    %cst_84 = arith.constant 1.000000e+00 : f32
    %422 = vector.broadcast %cst_84 : f32 to vector<8x96xf32>
    %423 = arith.addf %422, %421 : vector<8x96xf32>
    %424 = arith.divf %422, %423 : vector<8x96xf32>
    %425 = vector.extract_strided_slice %418 {offsets = [0, 96], sizes = [8, 32], strides = [1, 1]} : vector<8x128xf32> to vector<8x32xf32>
    %426 = math.tanh %425 : vector<8x32xf32>
    %427 = vector.extract_strided_slice %424 {offsets = [0, 0], sizes = [8, 32], strides = [1, 1]} : vector<8x96xf32> to vector<8x32xf32>
    %428 = vector.extract_strided_slice %424 {offsets = [0, 32], sizes = [8, 32], strides = [1, 1]} : vector<8x96xf32> to vector<8x32xf32>
    %429 = vector.extract_strided_slice %424 {offsets = [0, 64], sizes = [8, 32], strides = [1, 1]} : vector<8x96xf32> to vector<8x32xf32>
    %430 = arith.mulf %428, %367 : vector<8x32xf32>
    %431 = arith.mulf %427, %426 : vector<8x32xf32>
    %432 = arith.addf %430, %431 : vector<8x32xf32>
    %433 = math.tanh %432 : vector<8x32xf32>
    %434 = arith.mulf %429, %433 : vector<8x32xf32>
    %435 = arith.truncf %434 : vector<8x32xf32> to vector<8x32xbf16>
    %436 = arith.truncf %390 : vector<8x32xf32> to vector<8x32xbf16>
    %437 = tpu.concatenate %435, %436 in 1 : vector<8x32xbf16>, vector<8x32xbf16> -> vector<8x64xbf16>
    %cst_85 = arith.constant dense<0.000000e+00> : vector<8x128xf32>
    %438 = tpu.matmul %437, %8, %cst_85 {dimension_numbers = #tpu.dot_dimension_numbers<[1], [0], [0], [1], [0, 0, 1, 1], [], []>} : vector<8x64xbf16>, vector<64x128xbf16>, vector<8x128xf32> -> vector<8x128xf32>
    %439 = arith.addf %438, %11 : vector<8x128xf32>
    %440 = vector.extract_strided_slice %439 {offsets = [0, 0], sizes = [8, 96], strides = [1, 1]} : vector<8x128xf32> to vector<8x96xf32>
    %441 = arith.negf %440 : vector<8x96xf32>
    %442 = math.exp %441 : vector<8x96xf32>
    %cst_86 = arith.constant 1.000000e+00 : f32
    %443 = vector.broadcast %cst_86 : f32 to vector<8x96xf32>
    %444 = arith.addf %443, %442 : vector<8x96xf32>
    %445 = arith.divf %443, %444 : vector<8x96xf32>
    %446 = vector.extract_strided_slice %439 {offsets = [0, 96], sizes = [8, 32], strides = [1, 1]} : vector<8x128xf32> to vector<8x32xf32>
    %447 = math.tanh %446 : vector<8x32xf32>
    %448 = vector.extract_strided_slice %445 {offsets = [0, 0], sizes = [8, 32], strides = [1, 1]} : vector<8x96xf32> to vector<8x32xf32>
    %449 = vector.extract_strided_slice %445 {offsets = [0, 32], sizes = [8, 32], strides = [1, 1]} : vector<8x96xf32> to vector<8x32xf32>
    %450 = vector.extract_strided_slice %445 {offsets = [0, 64], sizes = [8, 32], strides = [1, 1]} : vector<8x96xf32> to vector<8x32xf32>
    %451 = arith.mulf %449, %388 : vector<8x32xf32>
    %452 = arith.mulf %448, %447 : vector<8x32xf32>
    %453 = arith.addf %451, %452 : vector<8x32xf32>
    %454 = math.tanh %453 : vector<8x32xf32>
    %455 = arith.mulf %450, %454 : vector<8x32xf32>
    %456 = arith.truncf %455 : vector<8x32xf32> to vector<8x32xbf16>
    %457 = arith.truncf %411 : vector<8x32xf32> to vector<8x32xbf16>
    %458 = tpu.concatenate %456, %457 in 1 : vector<8x32xbf16>, vector<8x32xbf16> -> vector<8x64xbf16>
    %cst_87 = arith.constant dense<0.000000e+00> : vector<8x128xf32>
    %459 = tpu.matmul %458, %12, %cst_87 {dimension_numbers = #tpu.dot_dimension_numbers<[1], [0], [0], [1], [0, 0, 1, 1], [], []>} : vector<8x64xbf16>, vector<64x128xbf16>, vector<8x128xf32> -> vector<8x128xf32>
    %460 = arith.addf %459, %15 : vector<8x128xf32>
    %461 = vector.extract_strided_slice %460 {offsets = [0, 0], sizes = [8, 96], strides = [1, 1]} : vector<8x128xf32> to vector<8x96xf32>
    %462 = arith.negf %461 : vector<8x96xf32>
    %463 = math.exp %462 : vector<8x96xf32>
    %cst_88 = arith.constant 1.000000e+00 : f32
    %464 = vector.broadcast %cst_88 : f32 to vector<8x96xf32>
    %465 = arith.addf %464, %463 : vector<8x96xf32>
    %466 = arith.divf %464, %465 : vector<8x96xf32>
    %467 = vector.extract_strided_slice %460 {offsets = [0, 96], sizes = [8, 32], strides = [1, 1]} : vector<8x128xf32> to vector<8x32xf32>
    %468 = math.tanh %467 : vector<8x32xf32>
    %469 = vector.extract_strided_slice %466 {offsets = [0, 0], sizes = [8, 32], strides = [1, 1]} : vector<8x96xf32> to vector<8x32xf32>
    %470 = vector.extract_strided_slice %466 {offsets = [0, 32], sizes = [8, 32], strides = [1, 1]} : vector<8x96xf32> to vector<8x32xf32>
    %471 = vector.extract_strided_slice %466 {offsets = [0, 64], sizes = [8, 32], strides = [1, 1]} : vector<8x96xf32> to vector<8x32xf32>
    %472 = arith.mulf %470, %409 : vector<8x32xf32>
    %473 = arith.mulf %469, %468 : vector<8x32xf32>
    %474 = arith.addf %472, %473 : vector<8x32xf32>
    %475 = math.tanh %474 : vector<8x32xf32>
    %476 = arith.mulf %471, %475 : vector<8x32xf32>
    %c7 = arith.constant 7 : index
    %c0_89 = arith.constant 0 : index
    %c0_90 = arith.constant 0 : index
    %477 = vector.load %arg2[%c7, %c0_89, %c0_90] : memref<8x8x8xbf16, #tpu.memory_space<vmem>>, vector<1x8x8xbf16>
    %478 = vector.shape_cast %477 : vector<1x8x8xbf16> to vector<8x8xbf16>
    %cst_91 = arith.constant dense<0.000000e+00> : vector<8x128xf32>
    %479 = tpu.matmul %478, %3, %cst_91 {dimension_numbers = #tpu.dot_dimension_numbers<[1], [0], [0], [1], [0, 0, 1, 1], [], []>} : vector<8x8xbf16>, vector<8x128xbf16>, vector<8x128xf32> -> vector<8x128xf32>
    %480 = arith.truncf %434 : vector<8x32xf32> to vector<8x32xbf16>
    %cst_92 = arith.constant dense<0.000000e+00> : vector<8x128xf32>
    %481 = tpu.matmul %480, %4, %cst_92 {dimension_numbers = #tpu.dot_dimension_numbers<[1], [0], [0], [1], [0, 0, 1, 1], [], []>} : vector<8x32xbf16>, vector<32x128xbf16>, vector<8x128xf32> -> vector<8x128xf32>
    %482 = arith.addf %479, %481 : vector<8x128xf32>
    %483 = arith.addf %482, %7 : vector<8x128xf32>
    %484 = vector.extract_strided_slice %483 {offsets = [0, 0], sizes = [8, 96], strides = [1, 1]} : vector<8x128xf32> to vector<8x96xf32>
    %485 = arith.negf %484 : vector<8x96xf32>
    %486 = math.exp %485 : vector<8x96xf32>
    %cst_93 = arith.constant 1.000000e+00 : f32
    %487 = vector.broadcast %cst_93 : f32 to vector<8x96xf32>
    %488 = arith.addf %487, %486 : vector<8x96xf32>
    %489 = arith.divf %487, %488 : vector<8x96xf32>
    %490 = vector.extract_strided_slice %483 {offsets = [0, 96], sizes = [8, 32], strides = [1, 1]} : vector<8x128xf32> to vector<8x32xf32>
    %491 = math.tanh %490 : vector<8x32xf32>
    %492 = vector.extract_strided_slice %489 {offsets = [0, 0], sizes = [8, 32], strides = [1, 1]} : vector<8x96xf32> to vector<8x32xf32>
    %493 = vector.extract_strided_slice %489 {offsets = [0, 32], sizes = [8, 32], strides = [1, 1]} : vector<8x96xf32> to vector<8x32xf32>
    %494 = vector.extract_strided_slice %489 {offsets = [0, 64], sizes = [8, 32], strides = [1, 1]} : vector<8x96xf32> to vector<8x32xf32>
    %495 = arith.mulf %493, %432 : vector<8x32xf32>
    %496 = arith.mulf %492, %491 : vector<8x32xf32>
    %497 = arith.addf %495, %496 : vector<8x32xf32>
    %498 = math.tanh %497 : vector<8x32xf32>
    %499 = arith.mulf %494, %498 : vector<8x32xf32>
    %500 = arith.truncf %499 : vector<8x32xf32> to vector<8x32xbf16>
    %501 = arith.truncf %455 : vector<8x32xf32> to vector<8x32xbf16>
    %502 = tpu.concatenate %500, %501 in 1 : vector<8x32xbf16>, vector<8x32xbf16> -> vector<8x64xbf16>
    %cst_94 = arith.constant dense<0.000000e+00> : vector<8x128xf32>
    %503 = tpu.matmul %502, %8, %cst_94 {dimension_numbers = #tpu.dot_dimension_numbers<[1], [0], [0], [1], [0, 0, 1, 1], [], []>} : vector<8x64xbf16>, vector<64x128xbf16>, vector<8x128xf32> -> vector<8x128xf32>
    %504 = arith.addf %503, %11 : vector<8x128xf32>
    %505 = vector.extract_strided_slice %504 {offsets = [0, 0], sizes = [8, 96], strides = [1, 1]} : vector<8x128xf32> to vector<8x96xf32>
    %506 = arith.negf %505 : vector<8x96xf32>
    %507 = math.exp %506 : vector<8x96xf32>
    %cst_95 = arith.constant 1.000000e+00 : f32
    %508 = vector.broadcast %cst_95 : f32 to vector<8x96xf32>
    %509 = arith.addf %508, %507 : vector<8x96xf32>
    %510 = arith.divf %508, %509 : vector<8x96xf32>
    %511 = vector.extract_strided_slice %504 {offsets = [0, 96], sizes = [8, 32], strides = [1, 1]} : vector<8x128xf32> to vector<8x32xf32>
    %512 = math.tanh %511 : vector<8x32xf32>
    %513 = vector.extract_strided_slice %510 {offsets = [0, 0], sizes = [8, 32], strides = [1, 1]} : vector<8x96xf32> to vector<8x32xf32>
    %514 = vector.extract_strided_slice %510 {offsets = [0, 32], sizes = [8, 32], strides = [1, 1]} : vector<8x96xf32> to vector<8x32xf32>
    %515 = vector.extract_strided_slice %510 {offsets = [0, 64], sizes = [8, 32], strides = [1, 1]} : vector<8x96xf32> to vector<8x32xf32>
    %516 = arith.mulf %514, %453 : vector<8x32xf32>
    %517 = arith.mulf %513, %512 : vector<8x32xf32>
    %518 = arith.addf %516, %517 : vector<8x32xf32>
    %519 = math.tanh %518 : vector<8x32xf32>
    %520 = arith.mulf %515, %519 : vector<8x32xf32>
    %521 = arith.truncf %520 : vector<8x32xf32> to vector<8x32xbf16>
    %522 = arith.truncf %476 : vector<8x32xf32> to vector<8x32xbf16>
    %523 = tpu.concatenate %521, %522 in 1 : vector<8x32xbf16>, vector<8x32xbf16> -> vector<8x64xbf16>
    %cst_96 = arith.constant dense<0.000000e+00> : vector<8x128xf32>
    %524 = tpu.matmul %523, %12, %cst_96 {dimension_numbers = #tpu.dot_dimension_numbers<[1], [0], [0], [1], [0, 0, 1, 1], [], []>} : vector<8x64xbf16>, vector<64x128xbf16>, vector<8x128xf32> -> vector<8x128xf32>
    %525 = arith.addf %524, %15 : vector<8x128xf32>
    %526 = vector.extract_strided_slice %525 {offsets = [0, 0], sizes = [8, 96], strides = [1, 1]} : vector<8x128xf32> to vector<8x96xf32>
    %527 = arith.negf %526 : vector<8x96xf32>
    %528 = math.exp %527 : vector<8x96xf32>
    %cst_97 = arith.constant 1.000000e+00 : f32
    %529 = vector.broadcast %cst_97 : f32 to vector<8x96xf32>
    %530 = arith.addf %529, %528 : vector<8x96xf32>
    %531 = arith.divf %529, %530 : vector<8x96xf32>
    %532 = vector.extract_strided_slice %525 {offsets = [0, 96], sizes = [8, 32], strides = [1, 1]} : vector<8x128xf32> to vector<8x32xf32>
    %533 = math.tanh %532 : vector<8x32xf32>
    %534 = vector.extract_strided_slice %531 {offsets = [0, 0], sizes = [8, 32], strides = [1, 1]} : vector<8x96xf32> to vector<8x32xf32>
    %535 = vector.extract_strided_slice %531 {offsets = [0, 32], sizes = [8, 32], strides = [1, 1]} : vector<8x96xf32> to vector<8x32xf32>
    %536 = vector.extract_strided_slice %531 {offsets = [0, 64], sizes = [8, 32], strides = [1, 1]} : vector<8x96xf32> to vector<8x32xf32>
    %537 = arith.mulf %535, %474 : vector<8x32xf32>
    %538 = arith.mulf %534, %533 : vector<8x32xf32>
    %539 = arith.addf %537, %538 : vector<8x32xf32>
    %540 = math.tanh %539 : vector<8x32xf32>
    %541 = arith.mulf %536, %540 : vector<8x32xf32>
    %c0_98 = arith.constant 0 : index
    %c0_99 = arith.constant 0 : index
    %542 = vector.load %arg13[%c0_98, %c0_99] : memref<8x32xf32, #tpu.memory_space<vmem>>, vector<8x32xf32>
    tpu.vector_store %arg13[%c0_98, %c0_99], %499 {strides = array<i32>} : memref<8x32xf32, #tpu.memory_space<vmem>>, vector<8x32xf32>,
    %c0_100 = arith.constant 0 : index
    %c0_101 = arith.constant 0 : index
    %543 = vector.load %arg14[%c0_100, %c0_101] : memref<8x32xf32, #tpu.memory_space<vmem>>, vector<8x32xf32>
    tpu.vector_store %arg14[%c0_100, %c0_101], %497 {strides = array<i32>} : memref<8x32xf32, #tpu.memory_space<vmem>>, vector<8x32xf32>,
    %c0_102 = arith.constant 0 : index
    %c0_103 = arith.constant 0 : index
    %544 = vector.load %arg15[%c0_102, %c0_103] : memref<8x32xf32, #tpu.memory_space<vmem>>, vector<8x32xf32>
    tpu.vector_store %arg15[%c0_102, %c0_103], %520 {strides = array<i32>} : memref<8x32xf32, #tpu.memory_space<vmem>>, vector<8x32xf32>,
    %c0_104 = arith.constant 0 : index
    %c0_105 = arith.constant 0 : index
    %545 = vector.load %arg16[%c0_104, %c0_105] : memref<8x32xf32, #tpu.memory_space<vmem>>, vector<8x32xf32>
    tpu.vector_store %arg16[%c0_104, %c0_105], %518 {strides = array<i32>} : memref<8x32xf32, #tpu.memory_space<vmem>>, vector<8x32xf32>,
    %c0_106 = arith.constant 0 : index
    %c0_107 = arith.constant 0 : index
    %546 = vector.load %arg17[%c0_106, %c0_107] : memref<8x32xf32, #tpu.memory_space<vmem>>, vector<8x32xf32>
    tpu.vector_store %arg17[%c0_106, %c0_107], %541 {strides = array<i32>} : memref<8x32xf32, #tpu.memory_space<vmem>>, vector<8x32xf32>,
    %c0_108 = arith.constant 0 : index
    %c0_109 = arith.constant 0 : index
    %547 = vector.load %arg18[%c0_108, %c0_109] : memref<8x32xf32, #tpu.memory_space<vmem>>, vector<8x32xf32>
    tpu.vector_store %arg18[%c0_108, %c0_109], %539 {strides = array<i32>} : memref<8x32xf32, #tpu.memory_space<vmem>>, vector<8x32xf32>,
    %c0_i32_110 = arith.constant 0 : i32
    %548 = arith.cmpi eq, %arg1, %c0_i32_110 : i32
    %549 = arith.extui %548 : i1 to i32
    %c0_i32_111 = arith.constant 0 : i32
    %550 = arith.cmpi ne, %549, %c0_i32_111 : i32
    scf.if %550 {
      %c0_112 = arith.constant 0 : index
      %c0_113 = arith.constant 0 : index
      %551 = vector.load %arg10[%c0_112, %c0_113] : memref<32x1xf32, #tpu.memory_space<vmem>>, vector<32x1xf32>
      %cst_114 = arith.constant dense<0.000000e+00> : vector<8x1xf32>
      %552 = tpu.matmul %541, %551, %cst_114 {dimension_numbers = #tpu.dot_dimension_numbers<[1], [0], [0], [1], [0, 0, 1, 1], [], []>} : vector<8x32xf32>, vector<32x1xf32>, vector<8x1xf32> -> vector<8x1xf32>
      %c0_115 = arith.constant 0 : index
      %c0_116 = arith.constant 0 : index
      %553 = vector.load %arg11[%c0_115, %c0_116] : memref<1x1xf32, #tpu.memory_space<vmem>>, vector<1x1xf32>
      %554 = vector.broadcast %553 : vector<1x1xf32> to vector<8x1xf32>
      %555 = arith.addf %552, %554 : vector<8x1xf32>
      %c0_117 = arith.constant 0 : index
      %c0_118 = arith.constant 0 : index
      %556 = vector.load %arg12[%c0_117, %c0_118] : memref<8x1xf32, #tpu.memory_space<vmem>>, vector<8x1xf32>
      tpu.vector_store %arg12[%c0_117, %c0_118], %555 {strides = array<i32>} : memref<8x1xf32, #tpu.memory_space<vmem>>, vector<8x1xf32>,
    } else {
    }
    return
  }
  func.func @transform_0(%arg0: i32, %arg1: i32) -> (i32, i32, i32) {
    %c0_i32 = arith.constant 0 : i32
    %c0_i32_0 = arith.constant 0 : i32
    return %arg1, %arg0, %c0_i32 : i32, i32, i32
  }
  func.func @transform_1(%arg0: i32, %arg1: i32) -> (i32, i32) {
    %c0_i32 = arith.constant 0 : i32
    %c0_i32_0 = arith.constant 0 : i32
    %c0_i32_1 = arith.constant 0 : i32
    return %c0_i32, %c0_i32_0 : i32, i32
  }
  func.func @transform_2(%arg0: i32, %arg1: i32) -> (i32, i32) {
    %c0_i32 = arith.constant 0 : i32
    %c0_i32_0 = arith.constant 0 : i32
    %c0_i32_1 = arith.constant 0 : i32
    return %c0_i32, %c0_i32_0 : i32, i32
  }
  func.func @transform_3(%arg0: i32, %arg1: i32) -> (i32, i32) {
    %c0_i32 = arith.constant 0 : i32
    %c0_i32_0 = arith.constant 0 : i32
    %c0_i32_1 = arith.constant 0 : i32
    return %c0_i32, %c0_i32_0 : i32, i32
  }
  func.func @transform_4(%arg0: i32, %arg1: i32) -> (i32, i32) {
    %c0_i32 = arith.constant 0 : i32
    %c0_i32_0 = arith.constant 0 : i32
    %c0_i32_1 = arith.constant 0 : i32
    return %c0_i32, %c0_i32_0 : i32, i32
  }
  func.func @transform_5(%arg0: i32, %arg1: i32) -> (i32, i32) {
    %c0_i32 = arith.constant 0 : i32
    %c0_i32_0 = arith.constant 0 : i32
    %c0_i32_1 = arith.constant 0 : i32
    return %c0_i32, %c0_i32_0 : i32, i32
  }
  func.func @transform_6(%arg0: i32, %arg1: i32) -> (i32, i32) {
    %c0_i32 = arith.constant 0 : i32
    %c0_i32_0 = arith.constant 0 : i32
    %c0_i32_1 = arith.constant 0 : i32
    return %c0_i32, %c0_i32_0 : i32, i32
  }
  func.func @transform_7(%arg0: i32, %arg1: i32) -> (i32, i32) {
    %c0_i32 = arith.constant 0 : i32
    %c0_i32_0 = arith.constant 0 : i32
    %c0_i32_1 = arith.constant 0 : i32
    return %c0_i32, %c0_i32_0 : i32, i32
  }
  func.func @transform_8(%arg0: i32, %arg1: i32) -> (i32, i32) {
    %c0_i32 = arith.constant 0 : i32
    %c0_i32_0 = arith.constant 0 : i32
    %c0_i32_1 = arith.constant 0 : i32
    return %c0_i32, %c0_i32_0 : i32, i32
  }
  func.func @transform_9(%arg0: i32, %arg1: i32) -> (i32, i32) {
    %c0_i32 = arith.constant 0 : i32
    %c0_i32_0 = arith.constant 0 : i32
    %c0_i32_1 = arith.constant 0 : i32
    return %c0_i32, %c0_i32_0 : i32, i32
  }
  func.func @transform_10(%arg0: i32, %arg1: i32) -> (i32, i32) {
    %c0_i32 = arith.constant 0 : i32
    %c0_i32_0 = arith.constant 0 : i32
    return %arg0, %c0_i32 : i32, i32
  }
}

</mosaic_0001>

<bundles_post_ra>
// kernel: tpu_custom_call.1
= control target key start
LH: loop header
LB: loop body
LE: loop exit
PB: predicated region body
PF: predicated region fallthrough
CT: control target
= control target key end

     0   :  { %s2947_s0 = inlined_call_operand.vmem [shape: bf16[8,8,8], index: 0, kind: input, shape index: {}]   ;;  %s2948_s1 = inlined_call_operand.hbm [shape: bf16[8,128], index: 1, kind: input, shape index: {}]   ;;  %s2949_s2 = inlined_call_operand.hbm [shape: bf16[32,128], index: 2, kind: input, shape index: {}]   ;;  %s2950_s3 = inlined_call_operand.vmem [shape: f32[1,128], index: 3, kind: input, shape index: {}]   ;;  %s2951_s4 = inlined_call_operand.hbm [shape: bf16[64,128], index: 4, kind: input, shape index: {}]   ;;  %s2952_s5 = inlined_call_operand.vmem [shape: f32[1,128], index: 5, kind: input, shape index: {}]   ;;  %s2953_s6 = inlined_call_operand.hbm [shape: bf16[64,128], index: 6, kind: input, shape index: {}]   ;;  %s2954_s7 = inlined_call_operand.vmem [shape: f32[1,128], index: 7, kind: input, shape index: {}]   ;;  %s2955_s8 = inlined_call_operand.vmem [shape: f32[32,1], index: 8, kind: input, shape index: {}]   ;;  %s2956_s9 = inlined_call_operand.<no memory space> [shape: f32[1,1], index: 9, kind: input, shape index: {}]   ;;  %s2957_s10 = inlined_call_operand.vmem [shape: f32[8,1], index: 10, kind: output, shape index: {}]  }
   0x1   :  { %v15_v0 = vstv %s2956_s9 }
   0x2   :  { %16 = vst [vmem:[#allocation8] sm:$0x1] %v15_v0 }
   0x3   :  { %17 = vsyncpa [#allocation10], 0 }
   0x4   :  { %18 = vsyncpa [#allocation12], 0  ;;  %s37_s17 = sshll.u32 %s2949_s2, 4  ;;  %s38_s17 = int_to_ptr.hbm [resolvable:$true] %s37_s17 }
   0x5   :  { %19 = vsyncpa [#allocation15], 0  ;;  %s2347_s18 = smov [#allocation11]   ;;  %s27_s22 = sshll.u32 %s2948_s1, 4  ;;  %s28_s22 = int_to_ptr.hbm [resolvable:$true] %s27_s22 }
   0x6   :  { %s39_s19 = sshll.u32 %s2347_s18, 4  ;;  %s2348_s23 = smov 64   ;;  %s40_s19 = int_to_ptr.vmem [resolvable:$true] %s39_s19 }
   0x7   :  { %s2349_s24 = smov 4   ;;  %s2350_s9 = smov [#allocation9]  }
   0x8   :  { %45 = dma.hbm_to_vmem [thread:$0]  %s38_s17, 256, %s40_s19, [#allocation12], %s2348_s23, %s2348_s23, %s2349_s24  }
   0x9   :  { %s29_s25 = sshll.u32 %s2350_s9, 4  ;;  %s52_s2 = sshll.u32 %s2951_s4, 4  ;;  %s30_s25 = int_to_ptr.vmem [resolvable:$true] %s29_s25  ;;  %s53_s2 = int_to_ptr.hbm [resolvable:$true] %s52_s2 }
   0xa   :  { %32 = dma.hbm_to_vmem [thread:$0]  %s28_s22, 64, %s30_s25, [#allocation10]  }
   0xb   :  { %s67_s30 = sshll.u32 %s2953_s6, 4  ;;  %s2351_s1 = smov [#allocation13]   ;;  %s68_s30 = int_to_ptr.hbm [resolvable:$true] %s67_s30 }
   0xc   :  { %s54_s11 = sshll.u32 %s2351_s1, 4  ;;  %s2352_s12 = smov [#allocation14]   ;;  %s55_s11 = int_to_ptr.vmem [resolvable:$true] %s54_s11 }
   0xd   :  { %60 = dma.hbm_to_vmem [thread:$0]  %s53_s2, 512, %s55_s11, [#allocation12], %s2348_s23, %s2348_s23, %s2349_s24  }
   0xe   :  { %s69_s13 = sshll.u32 %s2352_s12, 4  ;;  %s70_s13 = int_to_ptr.vmem [resolvable:$true] %s69_s13 }
   0xf   :  { %75 = dma.hbm_to_vmem [thread:$0]  %s68_s30, 512, %s70_s13, [#allocation15], %s2348_s23, %s2348_s23, %s2349_s24  }
  0x10   :  { %2341 = dma.done.wait [#allocation10], 64  }
  0x11   :  { %2342 = vsyncadd [#allocation10], 4294967232 }
  0x12   :  { %2343 = dma.done.wait [#allocation12], 768  }
  0x13   :  { %2344 = vsyncadd [#allocation12], 4294966528 }
  0x14   :  { %2345 = dma.done.wait [#allocation15], 512  }
  0x15   :  { %2346 = vsyncadd [#allocation15], 4294966784  ;;  %vm103_vm0 = vcmask 261120   ;;  %v2353_v1 = vmov 0.0   ;;  %vm184_vm1 = vcmask 1043456   ;;  %v2438_v3 = vld [vmem:[#allocation11 + $0x8] sm:$0xff] }
  0x16   :  { %104 = vst.msk [vmem:[#allocation2] sm:$0xff] %vm103_vm0, %v2353_v1  ;;  %v110_v2 = vld [vmem:[#allocation9] sm:$0xf]  ;;  %v149_v4 = vld [vmem:[%s2947_s0] sm:$0xf]  ;;  %vm180_vm2 = vcmask 64512   ;;  %173 = vmatpush.bf16.msra.mxu0 %v2438_v3 }
  0x17   :  { %105 = vst.msk [vmem:[#allocation3] sm:$0xff] %vm103_vm0, %v2353_v1  ;;  %v2443_v5 = vsel %vm184_vm1, %v110_v2, 0  ;;  %v2445_v6 = vld [vmem:[#allocation11] sm:$0xff]  ;;  %v2461_v10 = vld [vmem:[%s2950_s3] ss:$0 sm:$0xff]  ;;  %s2354_s16 = smov 32  }
  0x18   :  { %106 = vst.msk [vmem:[#allocation4] sm:$0xff] %vm103_vm0, %v2353_v1  ;;  %195 = vmatpush.bf16.msra.mxu1 %v2443_v5  ;;  %v1960_v38 = vld [vmem:[%s2947_s0 + $0x4] sm:$0xf]  ;;  %v2478_v40 = vld [vmem:[#allocation13 + $0x10] sm:$0xff]  ;;  %v2484_v50 = vld [vmem:[#allocation13 + $0x8] sm:$0xff]  ;;  %vm282_vm7 = vcmask 523264  }
  0x19   :  { %107 = vst.msk [vmem:[#allocation5] sm:$0xff] %vm103_vm0, %v2353_v1  ;;  %v2474_v39 = vld [vmem:[#allocation13 + $0x18] sm:$0xff]  ;;  %v2487_v51 = vld [vmem:[#allocation13] sm:$0xff]  ;;  %s2355_s21 = smov 96  }
  0x1a   :  { %108 = vst.msk [vmem:[#allocation6] sm:$0xff] %vm103_vm0, %v2353_v1  ;;  %174 = vmatpush.bf16.msra.mxu0 %v2445_v6  ;;  %289 = vmatpush.bf16.msra.mxu2 %v2474_v39  ;;  %v2509_v63 = vld [vmem:[%s2952_s5] ss:$0 sm:$0xff] }
  0x1b   :  { %109 = vst.msk [vmem:[#allocation7] sm:$0xff] %vm103_vm0, %v2353_v1  ;;  %1922 = vmatmul.msk.bf16.vlgmr.msra.gmra.mxu1 %vm180_vm2, %v149_v4 }
  0x1c   :  { %444 = vmatpush.bf16.msrb.mxu1 %v2438_v3 }
  0x1d   :  { %v143_v7 = vld [vmem:[#allocation2] sm:$0xff] }
  0x1e   :  { %v150_v8 = vpack.c.bf16 %v143_v7, %v143_v7  ;;  %461 = vmatpush.bf16.msrb.mxu0 %v2443_v5  ;;  %v144_v17 = vld [vmem:[#allocation3] sm:$0xff]  ;;  %290 = vmatpush.bf16.msra.mxu2 %v2478_v40 }
  0x1f   :  { %v145_v43 = vld [vmem:[#allocation4] sm:$0xff] }
  0x20   :  { %445 = vmatpush.bf16.msrb.mxu1 %v2445_v6  ;;  %1921 = vmatmul.msk.bf16.vlgmr.msra.gmra.mxu0 %vm103_vm0, %v150_v8  ;;  %v244_v46 = vpack.c.bf16 %v145_v43, %v145_v43  ;;  %v146_v52 = vld [vmem:[#allocation5] sm:$0xff] }
  0x22   :  { %662 = vmatpush.bf16.msra.mxu0 %v2443_v5  ;;  %v251_v48 = vunpack.c.l.b16 %v244_v46  ;;  %291 = vmatpush.bf16.msra.mxu2 %v2484_v50 }
  0x24   :  { %645 = vmatpush.bf16.msra.mxu1 %v2438_v3  ;;  %v252_v49 = vpack.c.b16 %v251_v48, %v251_v48 }
  0x26   :  { %292 = vmatpush.bf16.msra.mxu2 %v2487_v51 }
  0x28   :  { %646 = vmatpush.bf16.msra.mxu1 %v2445_v6 }
  0x2a   :  { %522 = vmatpush.bf16.msrb.mxu2 %v2474_v39 }
  0x2e   :  { %523 = vmatpush.bf16.msrb.mxu2 %v2478_v40 }
  0x30   :  { %1962 = vmatmul.msk.bf16.vlgmr.msrb.gmra.mxu0 %vm180_vm2, %v1960_v38 }
  0x31   :  { %863 = vmatpush.bf16.msrb.mxu0 %v2443_v5 }
  0x32   :  { %524 = vmatpush.bf16.msrb.mxu2 %v2484_v50 }
  0x36   :  { %525 = vmatpush.bf16.msrb.mxu2 %v2487_v51 }
  0x98   :  { %v197_v9 = vpop.f32.mrf.mxu1 }
  0x9d   :  { %v176_v11 = vpop.f32.mrf.mxu0 }
  0x9e   :  { %v198_v12 = vadd.f32 %v197_v9, %v176_v11 }
  0xa0   :  { %v201_v13 = vadd.f32 %v2461_v10, %v198_v12  ;;  %v199_v14 = vpop.f32.mrf.mxu1 }
  0xa2   :  { %2040 = vtanh.f32 %v201_v13  ;;  %v1923_v18 = vmul.f32 -1.442695, %v201_v13 }
  0xa4   :  { %2042 = vpow2.f32 %v1923_v18 }
  0xa5   :  { %v178_v15 = vpop.f32.mrf.mxu0 }
  0xa8   :  { %v2041_v16 = vpop.eup %2040 }
  0xa9   :  { %228 = vrot.lane.b32.xlu0 %v2041_v16, %s2354_s16 }
  0xaa   :  { %v2043_v19 = vpop.eup %2042 }
  0xab   :  { %v205_v20 = vadd.f32 1.0, %v2043_v19 }
  0xad   :  { %2044 = vrcp.f32 %v205_v20  ;;  %v217_v26 = vand.u32 2147483648, %v205_v20  ;;  %vm211_vm4 = vweird.f32 %v205_v20  ;;  %v215_v27 = vand.u32 2147483647, %v205_v20  ;;  %v463_v56 = vpop.f32.mrf.mxu0 }
  0xaf   :  { %v218_v29 = vor.u32 1.1754944e-38, %v217_v26  ;;  %vm216_vm6 = vcmp.eq.f32.partialorder %v215_v27, 8.507059e+37 }
  0xb1   :  { %223 = vrot.lane.b32.xlu0 %v144_v17, %s2354_s16 }
  0xb3   :  { %v2045_v21 = vpop.eup %2044 }
  0xb4   :  { %v207_v22 = vmul.f32 %v2045_v21, %v205_v20  ;;  %vm212_vm3 = vweird.f32 %v2045_v21 }
  0xb5   :  { %vm213_vm5 = vmor %vm211_vm4, %vm212_vm3  ;;  %v465_v57 = vpop.f32.mrf.mxu0 }
  0xb6   :  { %v208_v23 = vsub.f32 1.0, %v207_v22  ;;  %v2530_v57 = vld [vmem:[#allocation14 + $0x8] sm:$0xff] }
  0xb8   :  { %v209_v24 = vmul.f32 %v2045_v21, %v208_v23 }
  0xba   :  { %v210_v25 = vadd.f32 %v2045_v21, %v209_v24 }
  0xbc   :  { %v214_v28 = vsel %vm213_vm5, %v2045_v21, %v210_v25 }
  0xbd   :  { %v219_v31 = vsel %vm216_vm6, %v218_v29, %v214_v28 }
 0x11b   :  { %v229_v30 = vpop.permute.xlu0 %228 }
 0x11c   :  { %v231_v32 = vmul.f32 %v229_v30, %v219_v31 }
 0x11e   :  { %233 = vrot.lane.b32.xlu1 %v231_v32, %s2354_s16 }
 0x123   :  { %v224_v33 = vpop.permute.xlu0 %223 }
 0x124   :  { %v226_v34 = vmul.f32 %v224_v33, %v219_v31 }
 0x190   :  { %v234_v35 = vpop.permute.xlu1 %233 }
 0x191   :  { %v2467_v36 = vadd.f32 %v234_v35, %v226_v34 }
 0x193   :  { %2046 = vtanh.f32 %v2467_v36 }
 0x199   :  { %v2047_v37 = vpop.eup %2046 }
 0x19a   :  { %239 = vrot.lane.b32.xlu1 %v2047_v37, %s2354_s16 }
 0x20c   :  { %v240_v41 = vpop.permute.xlu1 %239 }
 0x20d   :  { %v242_v42 = vmul.f32 %v240_v41, %v219_v31 }
 0x20f   :  { %v243_v44 = vpack.c.bf16 %v242_v42, %v242_v42 }
 0x211   :  { %v246_v45 = vunpack.c.l.b16 %v243_v44 }
 0x213   :  { %v247_v47 = vpack.c.b16 %v246_v45, %v246_v45 }
 0x215   :  { %248 = vrot.lane.b32.xlu2 %v247_v47, %s2348_s23 }
 0x21d   :  { %253 = vrot.lane.b32.xlu2 %v252_v49, %s2354_s16 }
 0x225   :  { %319 = vrot.lane.b32.xlu2 %v146_v52, %s2354_s16  ;;  %v147_v52 = vld [vmem:[#allocation6] sm:$0xff] }
 0x26f   :  { %v249_v53 = vpop.permute.xlu2 %248 }
 0x270   :  { %1961 = vmatmul.msk.bf16.vlgmr.msrb.gmra.mxu1 %vm103_vm0, %v249_v53 }
 0x271   :  { %846 = vmatpush.bf16.msrb.mxu1 %v2438_v3 }
 0x275   :  { %847 = vmatpush.bf16.msrb.mxu1 %v2445_v6 }
 0x277   :  { %v254_v54 = vpop.permute.xlu2 %253 }
 0x278   :  { %v257_v55 = vsel %vm103_vm0, %v249_v53, %v254_v54  ;;  %v340_v53 = vpack.c.bf16 %v147_v52, %v147_v52  ;;  %v2527_v54 = vld [vmem:[#allocation14 + $0x10] sm:$0xff] }
 0x279   :  { %1940 = vmatmul.msk.bf16.vlgmr.msra.gmra.mxu2 %vm282_vm7, %v257_v55 }
 0x27a   :  { %723 = vmatpush.bf16.msra.mxu2 %v2474_v39  ;;  %v347_v55 = vunpack.c.l.b16 %v340_v53 }
 0x27e   :  { %724 = vmatpush.bf16.msra.mxu2 %v2478_v40 }
 0x27f   :  { %v320_v45 = vpop.permute.xlu2 %319 }
 0x282   :  { %725 = vmatpush.bf16.msra.mxu2 %v2484_v50 }
 0x286   :  { %726 = vmatpush.bf16.msra.mxu2 %v2487_v51 }
 0x2ed   :  { %v447_v58 = vpop.f32.mrf.mxu1 }
 0x2ee   :  { %v464_v59 = vadd.f32 %v463_v56, %v447_v58  ;;  %v348_v56 = vpack.c.b16 %v347_v55, %v347_v55  ;;  %v2534_v58 = vld [vmem:[#allocation14] sm:$0xff] }
 0x2f0   :  { %v467_v60 = vadd.f32 %v2461_v10, %v464_v59 }
 0x2f2   :  { %2048 = vtanh.f32 %v467_v60  ;;  %v1963_v7 = vmul.f32 -1.442695, %v467_v60 }
 0x2f5   :  { %v449_v61 = vpop.f32.mrf.mxu1 }
 0x2f8   :  { %v2049_v62 = vpop.eup %2048 }
 0x2f9   :  { %490 = vrot.lane.b32.xlu1 %v2049_v62, %s2354_s16 }
 0x2fc   :  { %v294_v0 = vpop.f32.mrf.mxu2 }
 0x2fd   :  { %v295_v1 = vadd.f32 %v2509_v63, %v294_v0 }
 0x2ff   :  { %2050 = vtanh.f32 %v295_v1  ;;  %v1941_v11 = vmul.f32 -1.442695, %v295_v1 }
 0x300   :  { %2052 = vpow2.f32 %v1963_v7 }
 0x304   :  { %v296_v2 = vpop.f32.mrf.mxu2 }
 0x305   :  { %v2051_v4 = vpop.eup %2050 }
 0x306   :  { %324 = vrot.lane.b32.xlu0 %v2051_v4, %s2354_s16  ;;  %v2053_v8 = vpop.eup %2052 }
 0x307   :  { %v471_v9 = vadd.f32 1.0, %v2053_v8 }
 0x309   :  { %2054 = vrcp.f32 %v471_v9  ;;  %v483_v21 = vand.u32 2147483648, %v471_v9  ;;  %vm477_vm9 = vweird.f32 %v471_v9  ;;  %v481_v22 = vand.u32 2147483647, %v471_v9 }
 0x30a   :  { %2056 = vpow2.f32 %v1941_v11 }
 0x30b   :  { %v484_v25 = vor.u32 1.1754944e-38, %v483_v21  ;;  %vm482_vm11 = vcmp.eq.f32.partialorder %v481_v22, 8.507059e+37 }
 0x30f   :  { %v2055_v12 = vpop.eup %2054 }
 0x310   :  { %v2057_v13 = vpop.eup %2056  ;;  %v473_v15 = vmul.f32 %v2055_v12, %v471_v9  ;;  %vm478_vm8 = vweird.f32 %v2055_v12  ;;  %v1968_v9 = vld [vmem:[%s2947_s0 + $0x8] sm:$0xf] }
 0x311   :  { %v301_v14 = vadd.f32 1.0, %v2057_v13  ;;  %vm479_vm10 = vmor %vm477_vm9, %vm478_vm8  ;;  %1970 = vmatmul.msk.bf16.vlgmr.msra.gmra.mxu0 %vm180_vm2, %v1968_v9 }
 0x312   :  { %v474_v16 = vsub.f32 1.0, %v473_v15  ;;  %1064 = vmatpush.bf16.msra.mxu0 %v2443_v5 }
 0x313   :  { %2058 = vrcp.f32 %v301_v14  ;;  %v313_v31 = vand.u32 2147483648, %v301_v14  ;;  %vm307_vm13 = vweird.f32 %v301_v14  ;;  %v311_v32 = vand.u32 2147483647, %v301_v14 }
 0x314   :  { %v475_v17 = vmul.f32 %v2055_v12, %v474_v16 }
 0x315   :  { %v314_v34 = vor.u32 1.1754944e-38, %v313_v31  ;;  %vm312_vm15 = vcmp.eq.f32.partialorder %v311_v32, 8.507059e+37  ;;  %v148_v31 = vld [vmem:[#allocation7] sm:$0xff] }
 0x316   :  { %v476_v19 = vadd.f32 %v2055_v12, %v475_v17 }
 0x318   :  { %v480_v23 = vsel %vm479_vm10, %v2055_v12, %v476_v19  ;;  %v2567_v19 = vld [vmem:[%s2954_s7] ss:$0 sm:$0xff] }
 0x319   :  { %v2059_v18 = vpop.eup %2058  ;;  %v485_v27 = vsel %vm482_vm11, %v484_v25, %v480_v23 }
 0x31a   :  { %v303_v20 = vmul.f32 %v2059_v18, %v301_v14  ;;  %vm308_vm12 = vweird.f32 %v2059_v18  ;;  %v488_v41 = vmul.f32 %v485_v27, %v2467_v36  ;;  %v2524_v36 = vld [vmem:[#allocation14 + $0x18] sm:$0xff] }
 0x31b   :  { %vm309_vm14 = vmor %vm307_vm13, %vm308_vm12  ;;  %384 = vmatpush.bf16.msra.mxu3 %v2524_v36 }
 0x31c   :  { %v304_v24 = vsub.f32 1.0, %v303_v20 }
 0x31e   :  { %v305_v29 = vmul.f32 %v2059_v18, %v304_v24 }
 0x31f   :  { %385 = vmatpush.bf16.msra.mxu3 %v2527_v54 }
 0x320   :  { %v306_v30 = vadd.f32 %v2059_v18, %v305_v29 }
 0x322   :  { %v310_v33 = vsel %vm309_vm14, %v2059_v18, %v306_v30 }
 0x323   :  { %v315_v35 = vsel %vm312_vm15, %v314_v34, %v310_v33  ;;  %386 = vmatpush.bf16.msra.mxu3 %v2530_v57 }
 0x324   :  { %v322_v46 = vmul.f32 %v320_v45, %v315_v35 }
 0x327   :  { %387 = vmatpush.bf16.msra.mxu3 %v2534_v58 }
 0x32b   :  { %589 = vmatpush.bf16.msrb.mxu3 %v2524_v36 }
 0x32f   :  { %590 = vmatpush.bf16.msrb.mxu3 %v2527_v54 }
 0x333   :  { %591 = vmatpush.bf16.msrb.mxu3 %v2530_v57 }
 0x337   :  { %592 = vmatpush.bf16.msrb.mxu3 %v2534_v58 }
 0x36b   :  { %v491_v26 = vpop.permute.xlu1 %490 }
 0x36c   :  { %v493_v28 = vmul.f32 %v491_v26, %v485_v27 }
 0x36e   :  { %495 = vrot.lane.b32.xlu1 %v493_v28, %s2354_s16 }
 0x378   :  { %v325_v37 = vpop.permute.xlu0 %324 }
 0x379   :  { %v327_v38 = vmul.f32 %v325_v37, %v315_v35 }
 0x37b   :  { %329 = vrot.lane.b32.xlu0 %v327_v38, %s2354_s16 }
 0x38e   :  { %v664_v17 = vpop.f32.mrf.mxu0 }
 0x396   :  { %v666_v18 = vpop.f32.mrf.mxu0 }
 0x3e0   :  { %v496_v42 = vpop.permute.xlu1 %495 }
 0x3e1   :  { %v2516_v43 = vadd.f32 %v496_v42, %v488_v41 }
 0x3e3   :  { %2060 = vtanh.f32 %v2516_v43 }
 0x3e9   :  { %v2061_v44 = vpop.eup %2060 }
 0x3ea   :  { %501 = vrot.lane.b32.xlu0 %v2061_v44, %s2354_s16 }
 0x3ed   :  { %v330_v47 = vpop.permute.xlu0 %329 }
 0x3ee   :  { %v2520_v48 = vadd.f32 %v330_v47, %v322_v46 }
 0x3f0   :  { %2062 = vtanh.f32 %v2520_v48 }
 0x3f6   :  { %v2063_v49 = vpop.eup %2062 }
 0x3f7   :  { %335 = vrot.lane.b32.xlu2 %v2063_v49, %s2354_s16 }
 0x3ff   :  { %349 = vrot.lane.b32.xlu2 %v348_v56, %s2354_s16 }
 0x451   :  { %v336_v59 = vpop.permute.xlu2 %335 }
 0x452   :  { %v338_v60 = vmul.f32 %v336_v59, %v315_v35 }
 0x454   :  { %v339_v61 = vpack.c.bf16 %v338_v60, %v338_v60 }
 0x456   :  { %v342_v62 = vunpack.c.l.b16 %v339_v61 }
 0x458   :  { %v343_v0 = vpack.c.b16 %v342_v62, %v342_v62 }
 0x459   :  { %v350_v11 = vpop.permute.xlu2 %349 }
 0x45a   :  { %344 = vrot.lane.b32.xlu1 %v343_v0, %s2348_s23 }
 0x45c   :  { %v502_v1 = vpop.permute.xlu0 %501 }
 0x45d   :  { %v504_v2 = vmul.f32 %v502_v1, %v485_v27 }
 0x45f   :  { %v505_v4 = vpack.c.bf16 %v504_v2, %v504_v2 }
 0x461   :  { %v507_v7 = vunpack.c.l.b16 %v505_v4 }
 0x462   :  { %511 = vrot.lane.b32.xlu1 %v343_v0, %s2355_s21 }
 0x463   :  { %v508_v8 = vpack.c.b16 %v507_v7, %v507_v7 }
 0x465   :  { %509 = vrot.lane.b32.xlu0 %v508_v8, %s2348_s23 }
 0x4cc   :  { %v345_v12 = vpop.permute.xlu1 %344 }
 0x4cd   :  { %v353_v13 = vsel %vm103_vm0, %v345_v12, %v350_v11 }
 0x4ce   :  { %1958 = vmatmul.msk.bf16.vlgmr.msra.gmra.mxu3 %vm282_vm7, %v353_v13 }
 0x4cf   :  { %790 = vmatpush.bf16.msra.mxu3 %v2524_v36 }
 0x4d3   :  { %791 = vmatpush.bf16.msra.mxu3 %v2527_v54 }
 0x4d4   :  { %v512_v14 = vpop.permute.xlu1 %511 }
 0x4d7   :  { %v510_v15 = vpop.permute.xlu0 %509  ;;  %792 = vmatpush.bf16.msra.mxu3 %v2530_v57 }
 0x4d8   :  { %v515_v16 = vsel %vm103_vm0, %v510_v15, %v512_v14  ;;  %1969 = vmatmul.msk.bf16.vlgmr.msra.gmra.mxu1 %vm103_vm0, %v510_v15 }
 0x4d9   :  { %1964 = vmatmul.msk.bf16.vlgmr.msrb.gmra.mxu2 %vm282_vm7, %v515_v16  ;;  %1047 = vmatpush.bf16.msra.mxu1 %v2438_v3 }
 0x4da   :  { %924 = vmatpush.bf16.msrb.mxu2 %v2474_v39 }
 0x4db   :  { %793 = vmatpush.bf16.msra.mxu3 %v2534_v58 }
 0x4dd   :  { %1048 = vmatpush.bf16.msra.mxu1 %v2445_v6 }
 0x4de   :  { %925 = vmatpush.bf16.msrb.mxu2 %v2478_v40 }
 0x4e2   :  { %926 = vmatpush.bf16.msrb.mxu2 %v2484_v50 }
 0x4e6   :  { %927 = vmatpush.bf16.msrb.mxu2 %v2487_v51 }
 0x551   :  { %v389_v20 = vpop.f32.mrf.mxu3 }
 0x552   :  { %v390_v21 = vadd.f32 %v2567_v19, %v389_v20 }
 0x554   :  { %2064 = vtanh.f32 %v390_v21  ;;  %v1959_v34 = vmul.f32 -1.442695, %v390_v21 }
 0x555   :  { %v648_v22 = vpop.f32.mrf.mxu1 }
 0x556   :  { %v665_v23 = vadd.f32 %v664_v17, %v648_v22 }
 0x558   :  { %v668_v24 = vadd.f32 %v2461_v10, %v665_v23 }
 0x559   :  { %v391_v25 = vpop.f32.mrf.mxu3 }
 0x55a   :  { %v2065_v26 = vpop.eup %2064  ;;  %2066 = vtanh.f32 %v668_v24  ;;  %v1971_v42 = vmul.f32 -1.442695, %v668_v24 }
 0x55b   :  { %419 = vrot.lane.b32.xlu2 %v2065_v26, %s2354_s16 }
 0x55c   :  { %v527_v27 = vpop.f32.mrf.mxu2 }
 0x55d   :  { %v528_v28 = vadd.f32 %v2509_v63, %v527_v27  ;;  %v650_v29 = vpop.f32.mrf.mxu1 }
 0x55f   :  { %2068 = vtanh.f32 %v528_v28  ;;  %v1965_v46 = vmul.f32 -1.442695, %v528_v28 }
 0x560   :  { %v2067_v30 = vpop.eup %2066  ;;  %2070 = vpow2.f32 %v1959_v34 }
 0x561   :  { %691 = vrot.lane.b32.xlu1 %v2067_v30, %s2354_s16 }
 0x563   :  { %414 = vrot.lane.b32.xlu2 %v148_v31, %s2354_s16 }
 0x564   :  { %v529_v32 = vpop.f32.mrf.mxu2 }
 0x565   :  { %v2069_v33 = vpop.eup %2068 }
 0x566   :  { %553 = vrot.lane.b32.xlu0 %v2069_v33, %s2354_s16  ;;  %v2071_v35 = vpop.eup %2070 }
 0x567   :  { %v396_v37 = vadd.f32 1.0, %v2071_v35 }
 0x569   :  { %2072 = vrcp.f32 %v396_v37  ;;  %v408_v49 = vand.u32 2147483648, %v396_v37  ;;  %vm402_vm3 = vweird.f32 %v396_v37  ;;  %v406_v53 = vand.u32 2147483647, %v396_v37 }
 0x56a   :  { %2074 = vpow2.f32 %v1971_v42 }
 0x56b   :  { %2076 = vpow2.f32 %v1965_v46  ;;  %v409_v59 = vor.u32 1.1754944e-38, %v408_v49  ;;  %vm407_vm5 = vcmp.eq.f32.partialorder %v406_v53, 8.507059e+37 }
 0x56f   :  { %v2073_v38 = vpop.eup %2072 }
 0x570   :  { %v398_v41 = vmul.f32 %v2073_v38, %v396_v37  ;;  %vm403_vm1 = vweird.f32 %v2073_v38  ;;  %v2075_v52 = vpop.eup %2074 }
 0x571   :  { %vm404_vm4 = vmor %vm402_vm3, %vm403_vm1  ;;  %v672_v56 = vadd.f32 1.0, %v2075_v52  ;;  %v2077_v62 = vpop.eup %2076 }
 0x572   :  { %v399_v44 = vsub.f32 1.0, %v398_v41  ;;  %v534_v1 = vadd.f32 1.0, %v2077_v62 }
 0x573   :  { %2078 = vrcp.f32 %v672_v56  ;;  %v684_v14 = vand.u32 2147483648, %v672_v56  ;;  %vm678_vm8 = vweird.f32 %v672_v56  ;;  %v682_v15 = vand.u32 2147483647, %v672_v56 }
 0x574   :  { %v400_v45 = vmul.f32 %v2073_v38, %v399_v44  ;;  %2080 = vrcp.f32 %v534_v1  ;;  %v546_v23 = vand.u32 2147483648, %v534_v1  ;;  %vm540_vm12 = vweird.f32 %v534_v1 }
 0x575   :  { %v685_v18 = vor.u32 1.1754944e-38, %v684_v14  ;;  %vm683_vm10 = vcmp.eq.f32.partialorder %v682_v15, 8.507059e+37  ;;  %v544_v25 = vand.u32 2147483647, %v534_v1 }
 0x576   :  { %v401_v47 = vadd.f32 %v2073_v38, %v400_v45  ;;  %v547_v27 = vor.u32 1.1754944e-38, %v546_v23 }
 0x577   :  { %vm545_vm14 = vcmp.eq.f32.partialorder %v544_v25, 8.507059e+37 }
 0x578   :  { %v405_v55 = vsel %vm404_vm4, %v2073_v38, %v401_v47 }
 0x579   :  { %v2576_v61 = vsel %vm407_vm5, %v409_v59, %v405_v55  ;;  %v2079_v2 = vpop.eup %2078 }
 0x57a   :  { %v674_v4 = vmul.f32 %v2079_v2, %v672_v56  ;;  %v2081_v7 = vpop.eup %2080  ;;  %vm679_vm6 = vweird.f32 %v2079_v2 }
 0x57b   :  { %v536_v9 = vmul.f32 %v2081_v7, %v534_v1  ;;  %vm680_vm9 = vmor %vm678_vm8, %vm679_vm6  ;;  %vm541_vm11 = vweird.f32 %v2081_v7 }
 0x57c   :  { %v675_v8 = vsub.f32 1.0, %v674_v4  ;;  %vm542_vm13 = vmor %vm540_vm12, %vm541_vm11 }
 0x57d   :  { %v537_v12 = vsub.f32 1.0, %v536_v9 }
 0x57e   :  { %v676_v11 = vmul.f32 %v2079_v2, %v675_v8  ;;  %v1976_v8 = vld [vmem:[%s2947_s0 + $0xc] sm:$0xf] }
 0x57f   :  { %v538_v16 = vmul.f32 %v2081_v7, %v537_v12  ;;  %1978 = vmatmul.msk.bf16.vlgmr.msrb.gmra.mxu0 %vm180_vm2, %v1976_v8 }
 0x580   :  { %v677_v13 = vadd.f32 %v2079_v2, %v676_v11  ;;  %1265 = vmatpush.bf16.msrb.mxu0 %v2443_v5 }
 0x581   :  { %v539_v20 = vadd.f32 %v2081_v7, %v538_v16 }
 0x582   :  { %v681_v17 = vsel %vm680_vm9, %v2079_v2, %v677_v13 }
 0x583   :  { %v686_v22 = vsel %vm683_vm10, %v685_v18, %v681_v17  ;;  %v543_v26 = vsel %vm542_vm13, %v2081_v7, %v539_v20 }
 0x584   :  { %v548_v29 = vsel %vm545_vm14, %v547_v27, %v543_v26  ;;  %v689_v35 = vmul.f32 %v686_v22, %v2516_v43 }
 0x585   :  { %v551_v44 = vmul.f32 %v548_v29, %v2520_v48 }
 0x5b5   :  { %v420_v60 = vpop.permute.xlu2 %419 }
 0x5b6   :  { %v422_v0 = vmul.f32 %v420_v60, %v2576_v61 }
 0x5b8   :  { %424 = vrot.lane.b32.xlu0 %v422_v0, %s2354_s16 }
 0x5bd   :  { %v415_v31 = vpop.permute.xlu2 %414 }
 0x5be   :  { %v417_v32 = vmul.f32 %v415_v31, %v2576_v61 }
 0x5d3   :  { %v692_v21 = vpop.permute.xlu1 %691 }
 0x5d4   :  { %v694_v24 = vmul.f32 %v692_v21, %v686_v22 }
 0x5d6   :  { %696 = vrot.lane.b32.xlu2 %v694_v24, %s2354_s16 }
 0x5d8   :  { %v554_v28 = vpop.permute.xlu0 %553 }
 0x5d9   :  { %v556_v30 = vmul.f32 %v554_v28, %v548_v29 }
 0x5db   :  { %558 = vrot.lane.b32.xlu1 %v556_v30, %s2354_s16 }
 0x5fc   :  { %v865_v15 = vpop.f32.mrf.mxu0 }
 0x604   :  { %v867_v16 = vpop.f32.mrf.mxu0 }
 0x62a   :  { %v425_v33 = vpop.permute.xlu0 %424 }
 0x62b   :  { %v2583_v34 = vadd.f32 %v425_v33, %v417_v32 }
 0x62d   :  { %2082 = vtanh.f32 %v2583_v34 }
 0x630   :  { %v697_v37 = vpop.permute.xlu2 %696 }
 0x631   :  { %v2587_v38 = vadd.f32 %v697_v37, %v689_v35 }
 0x633   :  { %v2083_v41 = vpop.eup %2082  ;;  %2084 = vtanh.f32 %v2587_v38 }
 0x634   :  { %430 = vrot.lane.b32.xlu0 %v2083_v41, %s2354_s16 }
 0x639   :  { %v2085_v42 = vpop.eup %2084 }
 0x63a   :  { %702 = vrot.lane.b32.xlu2 %v2085_v42, %s2354_s16 }
 0x64d   :  { %v559_v45 = vpop.permute.xlu1 %558 }
 0x64e   :  { %v2593_v46 = vadd.f32 %v559_v45, %v551_v44 }
 0x650   :  { %2086 = vtanh.f32 %v2593_v46 }
 0x656   :  { %v2087_v47 = vpop.eup %2086 }
 0x657   :  { %564 = vrot.lane.b32.xlu1 %v2087_v47, %s2354_s16 }
 0x694   :  { %v703_v43 = vpop.permute.xlu2 %702 }
 0x695   :  { %v705_v49 = vmul.f32 %v703_v43, %v686_v22 }
 0x697   :  { %v706_v52 = vpack.c.bf16 %v705_v49, %v705_v49 }
 0x699   :  { %v708_v53 = vunpack.c.l.b16 %v706_v52 }
 0x69b   :  { %v709_v55 = vpack.c.b16 %v708_v53, %v708_v53 }
 0x69d   :  { %710 = vrot.lane.b32.xlu2 %v709_v55, %s2348_s23 }
 0x6a6   :  { %v431_v56 = vpop.permute.xlu0 %430 }
 0x6a7   :  { %v433_v59 = vmul.f32 %v431_v56, %v2576_v61 }
 0x6a9   :  { %v569_v60 = vpack.c.bf16 %v433_v59, %v433_v59 }
 0x6ab   :  { %v576_v48 = vunpack.c.l.b16 %v569_v60 }
 0x6ad   :  { %v577_v62 = vpack.c.b16 %v576_v48, %v576_v48 }
 0x6af   :  { %578 = vrot.lane.b32.xlu1 %v577_v62, %s2355_s21 }
 0x6c9   :  { %v565_v0 = vpop.permute.xlu1 %564 }
 0x6ca   :  { %v567_v1 = vmul.f32 %v565_v0, %v548_v29 }
 0x6cc   :  { %v568_v2 = vpack.c.bf16 %v567_v1, %v567_v1 }
 0x6ce   :  { %v571_v4 = vunpack.c.l.b16 %v568_v2 }
 0x6d0   :  { %v572_v7 = vpack.c.b16 %v571_v4, %v571_v4 }
 0x6d2   :  { %573 = vrot.lane.b32.xlu0 %v572_v7, %s2348_s23 }
 0x6da   :  { %712 = vrot.lane.b32.xlu0 %v572_v7, %s2355_s21 }
 0x6f7   :  { %v711_v61 = vpop.permute.xlu2 %710 }
 0x6f8   :  { %1977 = vmatmul.msk.bf16.vlgmr.msrb.gmra.mxu1 %vm103_vm0, %v711_v61 }
 0x6f9   :  { %1248 = vmatpush.bf16.msrb.mxu1 %v2438_v3 }
 0x6fd   :  { %1249 = vmatpush.bf16.msrb.mxu1 %v2445_v6 }
 0x721   :  { %v579_v9 = vpop.permute.xlu1 %578 }
 0x744   :  { %v574_v11 = vpop.permute.xlu0 %573 }
 0x745   :  { %v582_v12 = vsel %vm103_vm0, %v574_v11, %v579_v9 }
 0x746   :  { %1966 = vmatmul.msk.bf16.vlgmr.msrb.gmra.mxu3 %vm282_vm7, %v582_v12 }
 0x747   :  { %991 = vmatpush.bf16.msrb.mxu3 %v2524_v36 }
 0x74b   :  { %992 = vmatpush.bf16.msrb.mxu3 %v2527_v54 }
 0x74c   :  { %v713_v13 = vpop.permute.xlu0 %712 }
 0x74d   :  { %v716_v14 = vsel %vm103_vm0, %v711_v61, %v713_v13 }
 0x74e   :  { %1972 = vmatmul.msk.bf16.vlgmr.msra.gmra.mxu2 %vm282_vm7, %v716_v14 }
 0x74f   :  { %1125 = vmatpush.bf16.msra.mxu2 %v2474_v39  ;;  %993 = vmatpush.bf16.msrb.mxu3 %v2530_v57 }
 0x753   :  { %1126 = vmatpush.bf16.msra.mxu2 %v2478_v40  ;;  %994 = vmatpush.bf16.msrb.mxu3 %v2534_v58 }
 0x757   :  { %1127 = vmatpush.bf16.msra.mxu2 %v2484_v50 }
 0x75b   :  { %1128 = vmatpush.bf16.msra.mxu2 %v2487_v51 }
 0x775   :  { %v849_v17 = vpop.f32.mrf.mxu1 }
 0x776   :  { %v866_v18 = vadd.f32 %v865_v15, %v849_v17 }
 0x778   :  { %v869_v20 = vadd.f32 %v2461_v10, %v866_v18 }
 0x77a   :  { %2088 = vtanh.f32 %v869_v20  ;;  %v1979_v23 = vmul.f32 -1.442695, %v869_v20 }
 0x77c   :  { %2090 = vpow2.f32 %v1979_v23 }
 0x77d   :  { %v851_v21 = vpop.f32.mrf.mxu1 }
 0x780   :  { %v2089_v22 = vpop.eup %2088 }
 0x781   :  { %892 = vrot.lane.b32.xlu0 %v2089_v22, %s2354_s16 }
 0x782   :  { %v2091_v26 = vpop.eup %2090 }
 0x783   :  { %v873_v30 = vadd.f32 1.0, %v2091_v26 }
 0x785   :  { %v885_v45 = vand.u32 2147483648, %v873_v30  ;;  %vm879_vm1 = vweird.f32 %v873_v30  ;;  %v883_v47 = vand.u32 2147483647, %v873_v30 }
 0x787   :  { %v886_v49 = vor.u32 1.1754944e-38, %v885_v45  ;;  %vm884_vm4 = vcmp.eq.f32.partialorder %v883_v47, 8.507059e+37 }
 0x7c9   :  { %v594_v24 = vpop.f32.mrf.mxu3 }
 0x7ca   :  { %v595_v25 = vadd.f32 %v2567_v19, %v594_v24 }
 0x7cc   :  { %2092 = vtanh.f32 %v595_v25  ;;  %v1967_v48 = vmul.f32 -1.442695, %v595_v25 }
 0x7d1   :  { %v596_v27 = vpop.f32.mrf.mxu3  ;;  %v728_v28 = vpop.f32.mrf.mxu2 }
 0x7d2   :  { %v2093_v29 = vpop.eup %2092  ;;  %v729_v31 = vadd.f32 %v2509_v63, %v728_v28 }
 0x7d3   :  { %620 = vrot.lane.b32.xlu1 %v2093_v29, %s2354_s16 }
 0x7d4   :  { %2094 = vtanh.f32 %v729_v31  ;;  %v1973_v56 = vmul.f32 -1.442695, %v729_v31 }
 0x7d5   :  { %2096 = vrcp.f32 %v873_v30 }
 0x7d6   :  { %2098 = vpow2.f32 %v1973_v56 }
 0x7d9   :  { %v730_v32 = vpop.f32.mrf.mxu2 }
 0x7da   :  { %v2095_v33 = vpop.eup %2094 }
 0x7db   :  { %754 = vrot.lane.b32.xlu2 %v2095_v33, %s2354_s16  ;;  %v2097_v35 = vpop.eup %2096 }
 0x7dc   :  { %v875_v37 = vmul.f32 %v2097_v35, %v873_v30  ;;  %vm880_vm15 = vweird.f32 %v2097_v35  ;;  %v2099_v59 = vpop.eup %2098 }
 0x7dd   :  { %vm881_vm3 = vmor %vm879_vm1, %vm880_vm15  ;;  %v735_v60 = vadd.f32 1.0, %v2099_v59 }
 0x7de   :  { %v876_v41 = vsub.f32 1.0, %v875_v37 }
 0x7df   :  { %2100 = vrcp.f32 %v735_v60  ;;  %v747_v9 = vand.u32 2147483648, %v735_v60  ;;  %vm741_vm6 = vweird.f32 %v735_v60  ;;  %v745_v11 = vand.u32 2147483647, %v735_v60 }
 0x7e0   :  { %v877_v42 = vmul.f32 %v2097_v35, %v876_v41  ;;  %2102 = vpow2.f32 %v1967_v48 }
 0x7e1   :  { %v748_v14 = vor.u32 1.1754944e-38, %v747_v9  ;;  %vm746_vm9 = vcmp.eq.f32.partialorder %v745_v11, 8.507059e+37 }
 0x7e2   :  { %v878_v44 = vadd.f32 %v2097_v35, %v877_v42 }
 0x7e4   :  { %v882_v43 = vsel %vm881_vm3, %v2097_v35, %v878_v44 }
 0x7e5   :  { %v2628_v52 = vsel %vm884_vm4, %v886_v49, %v882_v43  ;;  %v2101_v62 = vpop.eup %2100 }
 0x7e6   :  { %v2103_v0 = vpop.eup %2102  ;;  %v737_v1 = vmul.f32 %v2101_v62, %v735_v60  ;;  %vm742_vm5 = vweird.f32 %v2101_v62  ;;  %v890_v29 = vmul.f32 %v2628_v52, %v2587_v38 }
 0x7e7   :  { %v601_v2 = vadd.f32 1.0, %v2103_v0  ;;  %vm743_vm8 = vmor %vm741_vm6, %vm742_vm5 }
 0x7e8   :  { %v738_v4 = vsub.f32 1.0, %v737_v1 }
 0x7e9   :  { %2104 = vrcp.f32 %v601_v2  ;;  %v613_v22 = vand.u32 2147483648, %v601_v2  ;;  %vm607_vm11 = vweird.f32 %v601_v2  ;;  %v611_v23 = vand.u32 2147483647, %v601_v2 }
 0x7ea   :  { %v739_v7 = vmul.f32 %v2101_v62, %v738_v4 }
 0x7eb   :  { %v614_v25 = vor.u32 1.1754944e-38, %v613_v22  ;;  %vm612_vm13 = vcmp.eq.f32.partialorder %v611_v23, 8.507059e+37 }
 0x7ec   :  { %v740_v8 = vadd.f32 %v2101_v62, %v739_v7 }
 0x7ee   :  { %v744_v12 = vsel %vm743_vm8, %v2101_v62, %v740_v8 }
 0x7ef   :  { %v2105_v61 = vpop.eup %2104  ;;  %v749_v16 = vsel %vm746_vm9, %v748_v14, %v744_v12 }
 0x7f0   :  { %v603_v13 = vmul.f32 %v2105_v61, %v601_v2  ;;  %vm608_vm10 = vweird.f32 %v2105_v61  ;;  %v752_v33 = vmul.f32 %v749_v16, %v2593_v46 }
 0x7f1   :  { %vm609_vm12 = vmor %vm607_vm11, %vm608_vm10 }
 0x7f2   :  { %v604_v18 = vsub.f32 1.0, %v603_v13 }
 0x7f3   :  { %v893_v53 = vpop.permute.xlu0 %892 }
 0x7f4   :  { %v895_v55 = vmul.f32 %v893_v53, %v2628_v52  ;;  %v605_v20 = vmul.f32 %v2105_v61, %v604_v18 }
 0x7f6   :  { %897 = vrot.lane.b32.xlu0 %v895_v55, %s2354_s16  ;;  %v606_v21 = vadd.f32 %v2105_v61, %v605_v20 }
 0x7f8   :  { %v610_v24 = vsel %vm609_vm12, %v2105_v61, %v606_v21 }
 0x7f9   :  { %v615_v27 = vsel %vm612_vm13, %v614_v25, %v610_v24 }
 0x7fa   :  { %v618_v38 = vmul.f32 %v615_v27, %v2583_v34 }
 0x835   :  { %v755_v15 = vpop.permute.xlu2 %754 }
 0x836   :  { %v757_v17 = vmul.f32 %v755_v15, %v749_v16 }
 0x838   :  { %759 = vrot.lane.b32.xlu2 %v757_v17, %s2354_s16 }
 0x845   :  { %v621_v26 = vpop.permute.xlu1 %620 }
 0x846   :  { %v623_v28 = vmul.f32 %v621_v26, %v615_v27 }
 0x848   :  { %625 = vrot.lane.b32.xlu1 %v623_v28, %s2354_s16 }
 0x868   :  { %v898_v30 = vpop.permute.xlu0 %897 }
 0x869   :  { %v2636_v31 = vadd.f32 %v898_v30, %v890_v29 }
 0x86b   :  { %2106 = vtanh.f32 %v2636_v31 }
 0x871   :  { %v2107_v32 = vpop.eup %2106 }
 0x872   :  { %903 = vrot.lane.b32.xlu0 %v2107_v32, %s2354_s16 }
 0x892   :  { %v760_v35 = vpop.permute.xlu2 %759 }
 0x893   :  { %v2641_v37 = vadd.f32 %v760_v35, %v752_v33 }
 0x895   :  { %2108 = vtanh.f32 %v2641_v37 }
 0x89b   :  { %v2109_v41 = vpop.eup %2108 }
 0x89c   :  { %765 = vrot.lane.b32.xlu2 %v2109_v41, %s2354_s16 }
 0x8ba   :  { %v626_v42 = vpop.permute.xlu1 %625 }
 0x8bb   :  { %v2646_v44 = vadd.f32 %v626_v42, %v618_v38 }
 0x8bd   :  { %2110 = vtanh.f32 %v2646_v44 }
 0x8c3   :  { %v2111_v45 = vpop.eup %2110 }
 0x8c4   :  { %631 = vrot.lane.b32.xlu1 %v2111_v45, %s2354_s16 }
 0x8e4   :  { %v904_v47 = vpop.permute.xlu0 %903 }
 0x8e5   :  { %v906_v46 = vmul.f32 %v904_v47, %v2628_v52  ;;  %v1984_v52 = vld [vmem:[%s2947_s0 + $0x10] sm:$0xf] }
 0x8e6   :  { %1986 = vmatmul.msk.bf16.vlgmr.msra.gmra.mxu0 %vm180_vm2, %v1984_v52 }
 0x8e7   :  { %v907_v43 = vpack.c.bf16 %v906_v46, %v906_v46  ;;  %1466 = vmatpush.bf16.msra.mxu0 %v2443_v5 }
 0x8e9   :  { %v909_v49 = vunpack.c.l.b16 %v907_v43 }
 0x8eb   :  { %v910_v53 = vpack.c.b16 %v909_v49, %v909_v49 }
 0x8ed   :  { %911 = vrot.lane.b32.xlu0 %v910_v53, %s2348_s23 }
 0x8f6   :  { %v766_v55 = vpop.permute.xlu2 %765 }
 0x8f7   :  { %v768_v56 = vmul.f32 %v766_v55, %v749_v16 }
 0x8f9   :  { %v769_v59 = vpack.c.bf16 %v768_v56, %v768_v56 }
 0x8fb   :  { %v772_v34 = vunpack.c.l.b16 %v769_v59 }
 0x8fd   :  { %v773_v60 = vpack.c.b16 %v772_v34, %v772_v34 }
 0x8ff   :  { %774 = vrot.lane.b32.xlu1 %v773_v60, %s2348_s23 }
 0x907   :  { %913 = vrot.lane.b32.xlu1 %v773_v60, %s2355_s21 }
 0x936   :  { %v632_v48 = vpop.permute.xlu1 %631 }
 0x937   :  { %v634_v62 = vmul.f32 %v632_v48, %v615_v27 }
 0x939   :  { %v770_v0 = vpack.c.bf16 %v634_v62, %v634_v62 }
 0x93b   :  { %v777_v1 = vunpack.c.l.b16 %v770_v0 }
 0x93d   :  { %v778_v2 = vpack.c.b16 %v777_v1, %v777_v1 }
 0x93f   :  { %779 = vrot.lane.b32.xlu2 %v778_v2, %s2355_s21 }
 0x95f   :  { %v912_v4 = vpop.permute.xlu0 %911 }
 0x960   :  { %1985 = vmatmul.msk.bf16.vlgmr.msra.gmra.mxu1 %vm103_vm0, %v912_v4 }
 0x961   :  { %1449 = vmatpush.bf16.msra.mxu1 %v2438_v3 }
 0x963   :  { %v1066_v3 = vpop.f32.mrf.mxu0 }
 0x965   :  { %1450 = vmatpush.bf16.msra.mxu1 %v2445_v6 }
 0x96b   :  { %v1068_v6 = vpop.f32.mrf.mxu0 }
 0x971   :  { %v775_v7 = vpop.permute.xlu1 %774 }
 0x979   :  { %v914_v8 = vpop.permute.xlu1 %913 }
 0x97a   :  { %v917_v61 = vsel %vm103_vm0, %v912_v4, %v914_v8 }
 0x97b   :  { %1980 = vmatmul.msk.bf16.vlgmr.msrb.gmra.mxu2 %vm282_vm7, %v917_v61 }
 0x97c   :  { %1326 = vmatpush.bf16.msrb.mxu2 %v2474_v39 }
 0x980   :  { %1327 = vmatpush.bf16.msrb.mxu2 %v2478_v40 }
 0x984   :  { %1328 = vmatpush.bf16.msrb.mxu2 %v2484_v50 }
 0x988   :  { %1329 = vmatpush.bf16.msrb.mxu2 %v2487_v51 }
 0x999   :  { %v780_v9 = vpop.permute.xlu2 %779 }
 0x99a   :  { %v783_v11 = vsel %vm103_vm0, %v775_v7, %v780_v9 }
 0x99b   :  { %1974 = vmatmul.msk.bf16.vlgmr.msra.gmra.mxu3 %vm282_vm7, %v783_v11 }
 0x99c   :  { %1192 = vmatpush.bf16.msra.mxu3 %v2524_v36 }
 0x9a0   :  { %1193 = vmatpush.bf16.msra.mxu3 %v2527_v54 }
 0x9a4   :  { %1194 = vmatpush.bf16.msra.mxu3 %v2530_v57 }
 0x9a8   :  { %1195 = vmatpush.bf16.msra.mxu3 %v2534_v58 }
 0x9dd   :  { %v1050_v39 = vpop.f32.mrf.mxu1 }
 0x9de   :  { %v1067_v40 = vadd.f32 %v1066_v3, %v1050_v39 }
 0x9e0   :  { %v1070_v50 = vadd.f32 %v2461_v10, %v1067_v40 }
 0x9e2   :  { %2112 = vtanh.f32 %v1070_v50  ;;  %v1987_v10 = vmul.f32 -1.442695, %v1070_v50 }
 0x9e5   :  { %v1052_v51 = vpop.f32.mrf.mxu1 }
 0x9e8   :  { %v2113_v12 = vpop.eup %2112 }
 0x9e9   :  { %1093 = vrot.lane.b32.xlu1 %v2113_v12, %s2354_s16 }
 0x9fe   :  { %v929_v13 = vpop.f32.mrf.mxu2 }
 0x9ff   :  { %v930_v14 = vadd.f32 %v2509_v63, %v929_v13 }
 0xa01   :  { %2114 = vtanh.f32 %v930_v14  ;;  %v1981_v26 = vmul.f32 -1.442695, %v930_v14 }
 0xa06   :  { %v931_v15 = vpop.f32.mrf.mxu2 }
 0xa07   :  { %v2115_v16 = vpop.eup %2114 }
 0xa08   :  { %955 = vrot.lane.b32.xlu0 %v2115_v16, %s2354_s16 }
 0xa1e   :  { %v795_v17 = vpop.f32.mrf.mxu3 }
 0xa1f   :  { %v796_v18 = vadd.f32 %v2567_v19, %v795_v17 }
 0xa21   :  { %2116 = vtanh.f32 %v796_v18  ;;  %v1975_v30 = vmul.f32 -1.442695, %v796_v18 }
 0xa22   :  { %2118 = vpow2.f32 %v1987_v10 }
 0xa26   :  { %v797_v20 = vpop.f32.mrf.mxu3 }
 0xa27   :  { %v2117_v21 = vpop.eup %2116 }
 0xa28   :  { %821 = vrot.lane.b32.xlu2 %v2117_v21, %s2354_s16  ;;  %v2119_v22 = vpop.eup %2118 }
 0xa29   :  { %v1074_v23 = vadd.f32 1.0, %v2119_v22 }
 0xa2b   :  { %2120 = vrcp.f32 %v1074_v23  ;;  %v1086_v29 = vand.u32 2147483648, %v1074_v23  ;;  %vm1080_vm15 = vweird.f32 %v1074_v23  ;;  %v1084_v32 = vand.u32 2147483647, %v1074_v23 }
 0xa2c   :  { %2122 = vpow2.f32 %v1981_v26 }
 0xa2d   :  { %v1087_v41 = vor.u32 1.1754944e-38, %v1086_v29  ;;  %2124 = vpow2.f32 %v1975_v30  ;;  %vm1085_vm3 = vcmp.eq.f32.partialorder %v1084_v32, 8.507059e+37 }
 0xa31   :  { %v2121_v24 = vpop.eup %2120 }
 0xa32   :  { %v1076_v63 = vmul.f32 %v2121_v24, %v1074_v23  ;;  %vm1081_vm14 = vweird.f32 %v2121_v24  ;;  %v2123_v33 = vpop.eup %2122 }
 0xa33   :  { %vm1082_vm1 = vmor %vm1080_vm15, %vm1081_vm14  ;;  %v936_v38 = vadd.f32 1.0, %v2123_v33  ;;  %v2125_v46 = vpop.eup %2124 }
 0xa34   :  { %v1077_v25 = vsub.f32 1.0, %v1076_v63  ;;  %v802_v43 = vadd.f32 1.0, %v2125_v46 }
 0xa35   :  { %2126 = vrcp.f32 %v936_v38  ;;  %v948_v62 = vand.u32 2147483648, %v936_v38  ;;  %vm942_vm5 = vweird.f32 %v936_v38  ;;  %v946_v0 = vand.u32 2147483647, %v936_v38 }
 0xa36   :  { %v1078_v27 = vmul.f32 %v2121_v24, %v1077_v25  ;;  %2128 = vrcp.f32 %v802_v43  ;;  %v814_v9 = vand.u32 2147483648, %v802_v43  ;;  %vm808_vm10 = vweird.f32 %v802_v43 }
 0xa37   :  { %v949_v52 = vor.u32 1.1754944e-38, %v948_v62  ;;  %vm947_vm8 = vcmp.eq.f32.partialorder %v946_v0, 8.507059e+37  ;;  %v812_v11 = vand.u32 2147483647, %v802_v43 }
 0xa38   :  { %v1079_v28 = vadd.f32 %v2121_v24, %v1078_v27  ;;  %v815_v6 = vor.u32 1.1754944e-38, %v814_v9 }
 0xa39   :  { %vm813_vm12 = vcmp.eq.f32.partialorder %v812_v11, 8.507059e+37 }
 0xa3a   :  { %v1083_v35 = vsel %vm1082_vm1, %v2121_v24, %v1079_v28 }
 0xa3b   :  { %v2681_v42 = vsel %vm1085_vm3, %v1087_v41, %v1083_v35  ;;  %v2127_v49 = vpop.eup %2126  ;;  %v1992_v41 = vld [vmem:[%s2947_s0 + $0x14] sm:$0xf] }
 0xa3c   :  { %v938_v53 = vmul.f32 %v2127_v49, %v936_v38  ;;  %v2129_v56 = vpop.eup %2128  ;;  %vm943_vm4 = vweird.f32 %v2127_v49  ;;  %v1091_v51 = vmul.f32 %v2681_v42, %v2636_v31  ;;  %1994 = vmatmul.msk.bf16.vlgmr.msrb.gmra.mxu0 %vm180_vm2, %v1992_v41 }
 0xa3d   :  { %v804_v34 = vmul.f32 %v2129_v56, %v802_v43  ;;  %vm944_vm6 = vmor %vm942_vm5, %vm943_vm4  ;;  %vm809_vm9 = vweird.f32 %v2129_v56  ;;  %1667 = vmatpush.bf16.msrb.mxu0 %v2443_v5 }
 0xa3e   :  { %v939_v55 = vsub.f32 1.0, %v938_v53  ;;  %vm810_vm11 = vmor %vm808_vm10, %vm809_vm9  ;;  %v2720_v53 = vld [vmem:[#allocation13 + $0x18] sm:$0xff] }
 0xa3f   :  { %v805_v48 = vsub.f32 1.0, %v804_v34 }
 0xa40   :  { %v940_v59 = vmul.f32 %v2127_v49, %v939_v55  ;;  %v2724_v55 = vld [vmem:[#allocation13 + $0x10] sm:$0xff] }
 0xa41   :  { %v806_v2 = vmul.f32 %v2129_v56, %v805_v48 }
 0xa42   :  { %v941_v60 = vadd.f32 %v2127_v49, %v940_v59 }
 0xa43   :  { %v807_v61 = vadd.f32 %v2129_v56, %v806_v2 }
 0xa44   :  { %v945_v1 = vsel %vm944_vm6, %v2127_v49, %v941_v60 }
 0xa45   :  { %v950_v7 = vsel %vm947_vm8, %v949_v52, %v945_v1  ;;  %v811_v3 = vsel %vm810_vm11, %v2129_v56, %v807_v61 }
 0xa46   :  { %v816_v40 = vsel %vm813_vm12, %v815_v6, %v811_v3  ;;  %v953_v31 = vmul.f32 %v950_v7, %v2641_v37 }
 0xa47   :  { %v819_v15 = vmul.f32 %v816_v40, %v2646_v44 }
 0xa5b   :  { %v1094_v45 = vpop.permute.xlu1 %1093 }
 0xa5c   :  { %v1096_v47 = vmul.f32 %v1094_v45, %v2681_v42  ;;  %v2233_v45 = vld [vmem:[#allocation11] sm:$0xff] }
 0xa5e   :  { %1098 = vrot.lane.b32.xlu1 %v1096_v47, %s2354_s16 }
 0xa7a   :  { %v956_v4 = vpop.permute.xlu0 %955 }
 0xa7b   :  { %v958_v8 = vmul.f32 %v956_v4, %v950_v7 }
 0xa7d   :  { %960 = vrot.lane.b32.xlu0 %v958_v8, %s2354_s16 }
 0xa82   :  { %v822_v39 = vpop.permute.xlu2 %821 }
 0xa83   :  { %v824_v50 = vmul.f32 %v822_v39, %v816_v40 }
 0xa85   :  { %826 = vrot.lane.b32.xlu2 %v824_v50, %s2354_s16 }
 0xab9   :  { %v1267_v56 = vpop.f32.mrf.mxu0 }
 0xac1   :  { %v1269_v59 = vpop.f32.mrf.mxu0 }
 0xad0   :  { %v1099_v12 = vpop.permute.xlu1 %1098 }
 0xad1   :  { %v2689_v13 = vadd.f32 %v1099_v12, %v1091_v51 }
 0xad3   :  { %2130 = vtanh.f32 %v2689_v13 }
 0xad9   :  { %v2131_v14 = vpop.eup %2130 }
 0xada   :  { %1104 = vrot.lane.b32.xlu1 %v2131_v14, %s2354_s16 }
 0xadf   :  { %v827_v16 = vpop.permute.xlu2 %826 }
 0xae0   :  { %v2694_v17 = vadd.f32 %v827_v16, %v819_v15 }
 0xae2   :  { %2132 = vtanh.f32 %v2694_v17 }
 0xae8   :  { %v2133_v18 = vpop.eup %2132 }
 0xae9   :  { %832 = vrot.lane.b32.xlu2 %v2133_v18, %s2354_s16 }
 0xaef   :  { %v961_v20 = vpop.permute.xlu0 %960 }
 0xaf0   :  { %v2699_v21 = vadd.f32 %v961_v20, %v953_v31 }
 0xaf2   :  { %2134 = vtanh.f32 %v2699_v21 }
 0xaf8   :  { %v2135_v10 = vpop.eup %2134 }
 0xaf9   :  { %966 = vrot.lane.b32.xlu0 %v2135_v10, %s2354_s16 }
 0xb43   :  { %v833_v22 = vpop.permute.xlu2 %832 }
 0xb44   :  { %v835_v44 = vmul.f32 %v833_v22, %v816_v40 }
 0xb46   :  { %v971_v23 = vpack.c.bf16 %v835_v44, %v835_v44 }
 0xb48   :  { %v978_v24 = vunpack.c.l.b16 %v971_v23 }
 0xb4a   :  { %v979_v63 = vpack.c.b16 %v978_v24, %v978_v24 }
 0xb4c   :  { %v1105_v25 = vpop.permute.xlu1 %1104  ;;  %980 = vrot.lane.b32.xlu0 %v979_v63, %s2355_s21 }
 0xb4d   :  { %v1107_v26 = vmul.f32 %v1105_v25, %v2681_v42  ;;  %v2232_v42 = vld [vmem:[#allocation11 + $0x8] sm:$0xff] }
 0xb4f   :  { %v1108_v27 = vpack.c.bf16 %v1107_v26, %v1107_v26 }
 0xb51   :  { %v1110_v37 = vunpack.c.l.b16 %v1108_v27 }
 0xb53   :  { %v1111_v28 = vpack.c.b16 %v1110_v37, %v1110_v37 }
 0xb55   :  { %1112 = vrot.lane.b32.xlu1 %v1111_v28, %s2348_s23 }
 0xb6b   :  { %v967_v29 = vpop.permute.xlu0 %966 }
 0xb6c   :  { %v969_v30 = vmul.f32 %v967_v29, %v950_v7  ;;  %v2745_v7 = vld [vmem:[%s2952_s5] ss:$0 sm:$0xff] }
 0xb6e   :  { %v970_v32 = vpack.c.bf16 %v969_v30, %v969_v30 }
 0xb70   :  { %v973_v33 = vunpack.c.l.b16 %v970_v32 }
 0xb72   :  { %v974_v35 = vpack.c.b16 %v973_v33, %v973_v33 }
 0xb74   :  { %975 = vrot.lane.b32.xlu2 %v974_v35, %s2348_s23 }
 0xb7c   :  { %1114 = vrot.lane.b32.xlu2 %v974_v35, %s2355_s21 }
 0xbbe   :  { %v981_v47 = vpop.permute.xlu0 %980 }
 0xbc7   :  { %v1113_v38 = vpop.permute.xlu1 %1112 }
 0xbc8   :  { %1993 = vmatmul.msk.bf16.vlgmr.msrb.gmra.mxu1 %vm103_vm0, %v1113_v38 }
 0xbc9   :  { %1650 = vmatpush.bf16.msrb.mxu1 %v2232_v42 }
 0xbcd   :  { %1651 = vmatpush.bf16.msrb.mxu1 %v2233_v45 }
 0xbce   :  { %v976_v46 = vpop.permute.xlu2 %975 }
 0xbcf   :  { %v984_v43 = vsel %vm103_vm0, %v976_v46, %v981_v47 }
 0xbd0   :  { %1982 = vmatmul.msk.bf16.vlgmr.msrb.gmra.mxu3 %vm282_vm7, %v984_v43 }
 0xbd1   :  { %1393 = vmatpush.bf16.msrb.mxu3 %v2524_v36  ;;  %v2728_v36 = vld [vmem:[#allocation13 + $0x8] sm:$0xff] }
 0xbd5   :  { %1394 = vmatpush.bf16.msrb.mxu3 %v2527_v54  ;;  %v2731_v54 = vld [vmem:[#allocation13] sm:$0xff] }
 0xbd6   :  { %v1115_v49 = vpop.permute.xlu2 %1114 }
 0xbd7   :  { %v1118_v5 = vsel %vm103_vm0, %v1113_v38, %v1115_v49 }
 0xbd8   :  { %1988 = vmatmul.msk.bf16.vlgmr.msra.gmra.mxu2 %vm282_vm7, %v1118_v5 }
 0xbd9   :  { %1527 = vmatpush.bf16.msra.mxu2 %v2720_v53  ;;  %1395 = vmatpush.bf16.msrb.mxu3 %v2530_v57  ;;  %v2737_v57 = vld [vmem:[%s2950_s3] ss:$0 sm:$0xff] }
 0xbdd   :  { %1528 = vmatpush.bf16.msra.mxu2 %v2724_v55  ;;  %1396 = vmatpush.bf16.msrb.mxu3 %v2534_v58 }
 0xbe1   :  { %1529 = vmatpush.bf16.msra.mxu2 %v2728_v36 }
 0xbe5   :  { %1530 = vmatpush.bf16.msra.mxu2 %v2731_v54 }
 0xc45   :  { %v1251_v34 = vpop.f32.mrf.mxu1 }
 0xc46   :  { %v1268_v60 = vadd.f32 %v1267_v56, %v1251_v34 }
 0xc48   :  { %v1271_v48 = vadd.f32 %v2737_v57, %v1268_v60 }
 0xc4a   :  { %2136 = vtanh.f32 %v1271_v48  ;;  %v1995_v11 = vmul.f32 -1.442695, %v1271_v48 }
 0xc4d   :  { %v1253_v58 = vpop.f32.mrf.mxu1 }
 0xc50   :  { %v2137_v62 = vpop.eup %2136 }
 0xc51   :  { %1294 = vrot.lane.b32.xlu2 %v2137_v62, %s2354_s16 }
 0xc53   :  { %v996_v0 = vpop.f32.mrf.mxu3 }
 0xc54   :  { %v997_v1 = vadd.f32 %v2567_v19, %v996_v0 }
 0xc56   :  { %2138 = vtanh.f32 %v997_v1  ;;  %v1983_v51 = vmul.f32 -1.442695, %v997_v1 }
 0xc5b   :  { %v998_v2 = vpop.f32.mrf.mxu3  ;;  %v1130_v52 = vpop.f32.mrf.mxu2 }
 0xc5c   :  { %v2139_v4 = vpop.eup %2138  ;;  %v1131_v8 = vadd.f32 %v2745_v7, %v1130_v52 }
 0xc5d   :  { %1022 = vrot.lane.b32.xlu0 %v2139_v4, %s2354_s16 }
 0xc5e   :  { %2140 = vtanh.f32 %v1131_v8  ;;  %v1989_v31 = vmul.f32 -1.442695, %v1131_v8 }
 0xc5f   :  { %2142 = vpow2.f32 %v1995_v11 }
 0xc63   :  { %v1132_v61 = vpop.f32.mrf.mxu2 }
 0xc64   :  { %v2141_v9 = vpop.eup %2140 }
 0xc65   :  { %1156 = vrot.lane.b32.xlu1 %v2141_v9, %s2354_s16  ;;  %v2143_v19 = vpop.eup %2142 }
 0xc66   :  { %v1275_v3 = vadd.f32 1.0, %v2143_v19 }
 0xc68   :  { %2144 = vrcp.f32 %v1275_v3  ;;  %v1287_v14 = vand.u32 2147483648, %v1275_v3  ;;  %vm1281_vm14 = vweird.f32 %v1275_v3  ;;  %v1285_v15 = vand.u32 2147483647, %v1275_v3 }
 0xc69   :  { %2146 = vpow2.f32 %v1983_v51 }
 0xc6a   :  { %v1288_v18 = vor.u32 1.1754944e-38, %v1287_v14  ;;  %vm1286_vm1 = vcmp.eq.f32.partialorder %v1285_v15, 8.507059e+37  ;;  %2148 = vpow2.f32 %v1989_v31 }
 0xc6e   :  { %v2145_v6 = vpop.eup %2144 }
 0xc6f   :  { %v1277_v39 = vmul.f32 %v2145_v6, %v1275_v3  ;;  %vm1282_vm13 = vweird.f32 %v2145_v6  ;;  %v2147_v44 = vpop.eup %2146 }
 0xc70   :  { %vm1283_vm15 = vmor %vm1281_vm14, %vm1282_vm13  ;;  %v1003_v23 = vadd.f32 1.0, %v2147_v44  ;;  %v2149_v24 = vpop.eup %2148 }
 0xc71   :  { %v1278_v40 = vsub.f32 1.0, %v1277_v39  ;;  %v1137_v63 = vadd.f32 1.0, %v2149_v24 }
 0xc72   :  { %2150 = vrcp.f32 %v1003_v23  ;;  %v1015_v33 = vand.u32 2147483648, %v1003_v23  ;;  %vm1009_vm4 = vweird.f32 %v1003_v23  ;;  %v1013_v35 = vand.u32 2147483647, %v1003_v23 }
 0xc73   :  { %v1279_v50 = vmul.f32 %v2145_v6, %v1278_v40  ;;  %2152 = vrcp.f32 %v1137_v63  ;;  %v1149_v49 = vand.u32 2147483648, %v1137_v63  ;;  %vm1143_vm9 = vweird.f32 %v1137_v63 }
 0xc74   :  { %v1016_v42 = vor.u32 1.1754944e-38, %v1015_v33  ;;  %vm1014_vm6 = vcmp.eq.f32.partialorder %v1013_v35, 8.507059e+37  ;;  %v1147_v5 = vand.u32 2147483647, %v1137_v63  ;;  %v2798_v33 = vld [vmem:[#allocation14] sm:$0xff] }
 0xc75   :  { %v1280_v12 = vadd.f32 %v2145_v6, %v1279_v50  ;;  %v1150_v59 = vor.u32 1.1754944e-38, %v1149_v49 }
 0xc76   :  { %vm1148_vm11 = vcmp.eq.f32.partialorder %v1147_v5, 8.507059e+37 }
 0xc77   :  { %v1284_v16 = vsel %vm1283_vm15, %v2145_v6, %v1280_v12 }
 0xc78   :  { %v2750_v10 = vsel %vm1286_vm1, %v1288_v18, %v1284_v16  ;;  %v2151_v25 = vpop.eup %2150 }
 0xc79   :  { %v1005_v26 = vmul.f32 %v2151_v25, %v1003_v23  ;;  %v2153_v37 = vpop.eup %2152  ;;  %vm1010_vm3 = vweird.f32 %v2151_v25  ;;  %v1292_v58 = vmul.f32 %v2750_v10, %v2689_v13 }
 0xc7a   :  { %v1139_v29 = vmul.f32 %v2153_v37, %v1137_v63  ;;  %vm1011_vm5 = vmor %vm1009_vm4, %vm1010_vm3  ;;  %vm1144_vm8 = vweird.f32 %v2153_v37 }
 0xc7b   :  { %v1006_v27 = vsub.f32 1.0, %v1005_v26  ;;  %vm1145_vm10 = vmor %vm1143_vm9, %vm1144_vm8  ;;  %v2787_v26 = vld [vmem:[#allocation14 + $0x10] sm:$0xff] }
 0xc7c   :  { %v1140_v32 = vsub.f32 1.0, %v1139_v29 }
 0xc7d   :  { %v1007_v28 = vmul.f32 %v2151_v25, %v1006_v27 }
 0xc7e   :  { %v1141_v38 = vmul.f32 %v2153_v37, %v1140_v32 }
 0xc7f   :  { %v1008_v30 = vadd.f32 %v2151_v25, %v1007_v28 }
 0xc80   :  { %v1142_v43 = vadd.f32 %v2153_v37, %v1141_v38 }
 0xc81   :  { %v1012_v41 = vsel %vm1011_vm5, %v2151_v25, %v1008_v30  ;;  %v2784_v25 = vld [vmem:[#allocation14 + $0x18] sm:$0xff]  ;;  %v2793_v30 = vld [vmem:[#allocation14 + $0x8] sm:$0xff] }
 0xc82   :  { %v1017_v47 = vsel %vm1014_vm6, %v1016_v42, %v1012_v41  ;;  %v1146_v56 = vsel %vm1145_vm10, %v2153_v37, %v1142_v43 }
 0xc83   :  { %v1151_v60 = vsel %vm1148_vm11, %v1150_v59, %v1146_v56  ;;  %v1020_v2 = vmul.f32 %v1017_v47, %v2694_v17 }
 0xc84   :  { %v1154_v8 = vmul.f32 %v1151_v60, %v2699_v21  ;;  %v2000_v21 = vld [vmem:[%s2947_s0 + $0x18] sm:$0xf] }
 0xc85   :  { %2002 = vmatmul.msk.bf16.vlgmr.msra.gmra.mxu0 %vm180_vm2, %v2000_v21 }
 0xcab   :  { %v1295_v20 = vpop.permute.xlu2 %1294 }
 0xcac   :  { %v1297_v22 = vmul.f32 %v1295_v20, %v2750_v10 }
 0xcae   :  { %1299 = vrot.lane.b32.xlu2 %v1297_v22, %s2354_s16 }
 0xccf   :  { %v1023_v45 = vpop.permute.xlu0 %1022 }
 0xcd0   :  { %v1025_v46 = vmul.f32 %v1023_v45, %v1017_v47 }
 0xcd2   :  { %1027 = vrot.lane.b32.xlu0 %v1025_v46, %s2354_s16 }
 0xcd7   :  { %v1157_v34 = vpop.permute.xlu1 %1156 }
 0xcd8   :  { %v1159_v48 = vmul.f32 %v1157_v34, %v1151_v60 }
 0xcda   :  { %1161 = vrot.lane.b32.xlu1 %v1159_v48, %s2354_s16 }
 0xd02   :  { %v1468_v22 = vpop.f32.mrf.mxu0 }
 0xd08   :  { %v1300_v62 = vpop.permute.xlu2 %1299 }
 0xd09   :  { %v2758_v0 = vadd.f32 %v1300_v62, %v1292_v58 }
 0xd0a   :  { %v1470_v44 = vpop.f32.mrf.mxu0 }
 0xd0b   :  { %2154 = vtanh.f32 %v2758_v0 }
 0xd11   :  { %v2155_v1 = vpop.eup %2154 }
 0xd12   :  { %1305 = vrot.lane.b32.xlu2 %v2155_v1, %s2354_s16 }
 0xd44   :  { %v1028_v52 = vpop.permute.xlu0 %1027 }
 0xd45   :  { %v2763_v4 = vadd.f32 %v1028_v52, %v1020_v2 }
 0xd47   :  { %2156 = vtanh.f32 %v2763_v4 }
 0xd4c   :  { %v1162_v61 = vpop.permute.xlu1 %1161 }
 0xd4d   :  { %v2157_v9 = vpop.eup %2156  ;;  %v2767_v13 = vadd.f32 %v1162_v61, %v1154_v8 }
 0xd4e   :  { %1033 = vrot.lane.b32.xlu0 %v2157_v9, %s2354_s16 }
 0xd4f   :  { %2158 = vtanh.f32 %v2767_v13 }
 0xd55   :  { %v2159_v11 = vpop.eup %2158 }
 0xd56   :  { %1167 = vrot.lane.b32.xlu1 %v2159_v11, %s2354_s16 }
 0xd6c   :  { %v1306_v19 = vpop.permute.xlu2 %1305 }
 0xd6d   :  { %v1308_v17 = vmul.f32 %v1306_v19, %v2750_v10 }
 0xd6f   :  { %v1309_v3 = vpack.c.bf16 %v1308_v17, %v1308_v17 }
 0xd71   :  { %v1311_v6 = vunpack.c.l.b16 %v1309_v3 }
 0xd73   :  { %v1312_v39 = vpack.c.b16 %v1311_v6, %v1311_v6 }
 0xd75   :  { %1313 = vrot.lane.b32.xlu2 %v1312_v39, %s2348_s23 }
 0xdc0   :  { %v1034_v40 = vpop.permute.xlu0 %1033 }
 0xdc1   :  { %v1036_v50 = vmul.f32 %v1034_v40, %v1017_v47 }
 0xdc3   :  { %v1172_v51 = vpack.c.bf16 %v1036_v50, %v1036_v50 }
 0xdc5   :  { %v1179_v12 = vunpack.c.l.b16 %v1172_v51 }
 0xdc7   :  { %v1180_v14 = vpack.c.b16 %v1179_v12, %v1179_v12 }
 0xdc8   :  { %v1168_v15 = vpop.permute.xlu1 %1167 }
 0xdc9   :  { %v1170_v16 = vmul.f32 %v1168_v15, %v1151_v60  ;;  %1181 = vrot.lane.b32.xlu1 %v1180_v14, %s2355_s21 }
 0xdcb   :  { %v1171_v18 = vpack.c.bf16 %v1170_v16, %v1170_v16 }
 0xdcd   :  { %v1174_v31 = vunpack.c.l.b16 %v1171_v18 }
 0xdcf   :  { %v1314_v20 = vpop.permute.xlu2 %1313  ;;  %v1175_v10 = vpack.c.b16 %v1174_v31, %v1174_v31 }
 0xdd0   :  { %2001 = vmatmul.msk.bf16.vlgmr.msra.gmra.mxu1 %vm103_vm0, %v1314_v20 }
 0xdd1   :  { %1176 = vrot.lane.b32.xlu0 %v1175_v10, %s2348_s23 }
 0xdd9   :  { %1315 = vrot.lane.b32.xlu0 %v1175_v10, %s2355_s21 }
 0xe3b   :  { %v1182_v23 = vpop.permute.xlu1 %1181 }
 0xe43   :  { %v1177_v24 = vpop.permute.xlu0 %1176 }
 0xe44   :  { %v1185_v63 = vsel %vm103_vm0, %v1177_v24, %v1182_v23 }
 0xe45   :  { %1990 = vmatmul.msk.bf16.vlgmr.msra.gmra.mxu3 %vm282_vm7, %v1185_v63 }
 0xe46   :  { %1594 = vmatpush.bf16.msra.mxu3 %v2784_v25 }
 0xe4a   :  { %1595 = vmatpush.bf16.msra.mxu3 %v2787_v26 }
 0xe4b   :  { %v1316_v27 = vpop.permute.xlu0 %1315 }
 0xe4c   :  { %v1319_v37 = vsel %vm103_vm0, %v1314_v20, %v1316_v27 }
 0xe4d   :  { %v1452_v28 = vpop.f32.mrf.mxu1  ;;  %1996 = vmatmul.msk.bf16.vlgmr.msrb.gmra.mxu2 %vm282_vm7, %v1319_v37 }
 0xe4e   :  { %v1469_v29 = vadd.f32 %v1468_v22, %v1452_v28  ;;  %1728 = vmatpush.bf16.msrb.mxu2 %v2720_v53  ;;  %1596 = vmatpush.bf16.msra.mxu3 %v2793_v30 }
 0xe50   :  { %v1472_v32 = vadd.f32 %v2737_v57, %v1469_v29 }
 0xe52   :  { %2160 = vtanh.f32 %v1472_v32  ;;  %1729 = vmatpush.bf16.msrb.mxu2 %v2724_v55  ;;  %1597 = vmatpush.bf16.msra.mxu3 %v2798_v33  ;;  %v2003_v53 = vmul.f32 -1.442695, %v1472_v32 }
 0xe54   :  { %2162 = vpow2.f32 %v2003_v53 }
 0xe55   :  { %v1454_v35 = vpop.f32.mrf.mxu1 }
 0xe56   :  { %1730 = vmatpush.bf16.msrb.mxu2 %v2728_v36 }
 0xe58   :  { %v2161_v41 = vpop.eup %2160 }
 0xe59   :  { %1495 = vrot.lane.b32.xlu0 %v2161_v41, %s2354_s16 }
 0xe5a   :  { %1731 = vmatpush.bf16.msrb.mxu2 %v2731_v54  ;;  %v2163_v38 = vpop.eup %2162  ;;  %v2807_v54 = vld [vmem:[%s2954_s7] ss:$0 sm:$0xff] }
 0xe5b   :  { %v1476_v42 = vadd.f32 1.0, %v2163_v38 }
 0xe5d   :  { %2164 = vrcp.f32 %v1476_v42  ;;  %v1488_v49 = vand.u32 2147483648, %v1476_v42  ;;  %vm1482_vm13 = vweird.f32 %v1476_v42  ;;  %v1486_v5 = vand.u32 2147483647, %v1476_v42 }
 0xe5f   :  { %v1489_v59 = vor.u32 1.1754944e-38, %v1488_v49  ;;  %vm1487_vm15 = vcmp.eq.f32.partialorder %v1486_v5, 8.507059e+37 }
 0xe63   :  { %v2165_v45 = vpop.eup %2164 }
 0xe64   :  { %v1478_v47 = vmul.f32 %v2165_v45, %v1476_v42  ;;  %vm1483_vm12 = vweird.f32 %v2165_v45 }
 0xe65   :  { %vm1484_vm14 = vmor %vm1482_vm13, %vm1483_vm12 }
 0xe66   :  { %v1479_v55 = vsub.f32 1.0, %v1478_v47 }
 0xe68   :  { %v1480_v46 = vmul.f32 %v2165_v45, %v1479_v55 }
 0xe6a   :  { %v1481_v43 = vadd.f32 %v2165_v45, %v1480_v46 }
 0xe6c   :  { %v1485_v36 = vsel %vm1484_vm14, %v2165_v45, %v1481_v43 }
 0xe6d   :  { %v2810_v60 = vsel %vm1487_vm15, %v1489_v59, %v1485_v36 }
 0xe6e   :  { %v1493_v63 = vmul.f32 %v2810_v60, %v2758_v0 }
 0xec8   :  { %v1197_v56 = vpop.f32.mrf.mxu3 }
 0xec9   :  { %v1198_v34 = vadd.f32 %v2807_v54, %v1197_v56 }
 0xecb   :  { %v1496_v48 = vpop.permute.xlu0 %1495  ;;  %2166 = vtanh.f32 %v1198_v34  ;;  %v1991_v17 = vmul.f32 -1.442695, %v1198_v34 }
 0xecc   :  { %v1498_v58 = vmul.f32 %v1496_v48, %v2810_v60 }
 0xece   :  { %1500 = vrot.lane.b32.xlu0 %v1498_v58, %s2354_s16 }
 0xed0   :  { %v1199_v62 = vpop.f32.mrf.mxu3  ;;  %v1331_v1 = vpop.f32.mrf.mxu2 }
 0xed1   :  { %v2167_v2 = vpop.eup %2166  ;;  %v1332_v52 = vadd.f32 %v2745_v7, %v1331_v1 }
 0xed2   :  { %1223 = vrot.lane.b32.xlu1 %v2167_v2, %s2354_s16 }
 0xed3   :  { %2168 = vtanh.f32 %v1332_v52  ;;  %v1997_v9 = vmul.f32 -1.442695, %v1332_v52 }
 0xed5   :  { %2170 = vpow2.f32 %v1997_v9 }
 0xed8   :  { %v1333_v8 = vpop.f32.mrf.mxu2 }
 0xed9   :  { %v2169_v61 = vpop.eup %2168 }
 0xeda   :  { %1357 = vrot.lane.b32.xlu2 %v2169_v61, %s2354_s16 }
 0xedb   :  { %v2171_v11 = vpop.eup %2170 }
 0xedc   :  { %v1338_v19 = vadd.f32 1.0, %v2171_v11 }
 0xede   :  { %2172 = vrcp.f32 %v1338_v19  ;;  %v1350_v14 = vand.u32 2147483648, %v1338_v19  ;;  %vm1344_vm3 = vweird.f32 %v1338_v19  ;;  %v1348_v15 = vand.u32 2147483647, %v1338_v19 }
 0xedf   :  { %2174 = vpow2.f32 %v1991_v17 }
 0xee0   :  { %v1351_v31 = vor.u32 1.1754944e-38, %v1350_v14  ;;  %vm1349_vm5 = vcmp.eq.f32.partialorder %v1348_v15, 8.507059e+37 }
 0xee4   :  { %v2173_v3 = vpop.eup %2172 }
 0xee5   :  { %v2175_v6 = vpop.eup %2174  ;;  %v1340_v39 = vmul.f32 %v2173_v3, %v1338_v19  ;;  %vm1345_vm1 = vweird.f32 %v2173_v3 }
 0xee6   :  { %v1204_v21 = vadd.f32 1.0, %v2175_v6  ;;  %vm1346_vm4 = vmor %vm1344_vm3, %vm1345_vm1 }
 0xee7   :  { %v1341_v40 = vsub.f32 1.0, %v1340_v39 }
 0xee8   :  { %2176 = vrcp.f32 %v1204_v21  ;;  %v1216_v27 = vand.u32 2147483648, %v1204_v21  ;;  %vm1210_vm8 = vweird.f32 %v1204_v21  ;;  %v1214_v28 = vand.u32 2147483647, %v1204_v21 }
 0xee9   :  { %v1342_v50 = vmul.f32 %v2173_v3, %v1341_v40 }
 0xeea   :  { %v1217_v35 = vor.u32 1.1754944e-38, %v1216_v27  ;;  %vm1215_vm10 = vcmp.eq.f32.partialorder %v1214_v28, 8.507059e+37 }
 0xeeb   :  { %v1343_v51 = vadd.f32 %v2173_v3, %v1342_v50 }
 0xeed   :  { %v1347_v16 = vsel %vm1346_vm4, %v2173_v3, %v1343_v51 }
 0xeee   :  { %v2177_v12 = vpop.eup %2176  ;;  %v1352_v10 = vsel %vm1349_vm5, %v1351_v31, %v1347_v16 }
 0xeef   :  { %v1206_v18 = vmul.f32 %v2177_v12, %v1204_v21  ;;  %vm1211_vm6 = vweird.f32 %v2177_v12  ;;  %v1355_v0 = vmul.f32 %v1352_v10, %v2767_v13 }
 0xef0   :  { %vm1212_vm9 = vmor %vm1210_vm8, %vm1211_vm6 }
 0xef1   :  { %v1207_v44 = vsub.f32 1.0, %v1206_v18 }
 0xef3   :  { %v1208_v23 = vmul.f32 %v2177_v12, %v1207_v44 }
 0xef5   :  { %v1209_v24 = vadd.f32 %v2177_v12, %v1208_v23 }
 0xef7   :  { %v1213_v32 = vsel %vm1212_vm9, %v2177_v12, %v1209_v24 }
 0xef8   :  { %v1218_v53 = vsel %vm1215_vm10, %v1217_v35, %v1213_v32 }
 0xef9   :  { %v1221_v46 = vmul.f32 %v1218_v53, %v2763_v4 }
 0xf34   :  { %v1358_v20 = vpop.permute.xlu2 %1357 }
 0xf35   :  { %v1360_v22 = vmul.f32 %v1358_v20, %v1352_v10 }
 0xf37   :  { %1362 = vrot.lane.b32.xlu2 %v1360_v22, %s2354_s16 }
 0xf40   :  { %v1501_v37 = vpop.permute.xlu0 %1500 }
 0xf41   :  { %v2820_v29 = vadd.f32 %v1501_v37, %v1493_v63 }
 0xf43   :  { %2178 = vtanh.f32 %v2820_v29 }
 0xf44   :  { %v1224_v41 = vpop.permute.xlu1 %1223 }
 0xf45   :  { %v1226_v38 = vmul.f32 %v1224_v41, %v1218_v53 }
 0xf47   :  { %1228 = vrot.lane.b32.xlu1 %v1226_v38, %s2354_s16 }
 0xf49   :  { %v2179_v42 = vpop.eup %2178 }
 0xf4a   :  { %1506 = vrot.lane.b32.xlu0 %v2179_v42, %s2354_s16 }
 0xf91   :  { %v1363_v45 = vpop.permute.xlu2 %1362 }
 0xf92   :  { %v2826_v47 = vadd.f32 %v1363_v45, %v1355_v0 }
 0xf94   :  { %2180 = vtanh.f32 %v2826_v47 }
 0xf9a   :  { %v2181_v55 = vpop.eup %2180 }
 0xf9b   :  { %1368 = vrot.lane.b32.xlu2 %v2181_v55, %s2354_s16 }
 0xfb9   :  { %v1229_v43 = vpop.permute.xlu1 %1228 }
 0xfba   :  { %v2831_v49 = vadd.f32 %v1229_v43, %v1221_v46 }
 0xfbc   :  { %v1507_v5 = vpop.permute.xlu0 %1506  ;;  %2182 = vtanh.f32 %v2831_v49 }
 0xfbd   :  { %v1509_v36 = vmul.f32 %v1507_v5, %v2810_v60  ;;  %v2008_v60 = vld [vmem:[%s2947_s0 + $0x1c] sm:$0xf] }
 0xfbe   :  { %2010 = vmatmul.msk.bf16.vlgmr.msrb.gmra.mxu0 %vm180_vm2, %v2008_v60 }
 0xfbf   :  { %v1510_v56 = vpack.c.bf16 %v1509_v36, %v1509_v36 }
 0xfc1   :  { %v1512_v13 = vunpack.c.l.b16 %v1510_v56 }
 0xfc2   :  { %v2183_v59 = vpop.eup %2182 }
 0xfc3   :  { %v1513_v34 = vpack.c.b16 %v1512_v13, %v1512_v13  ;;  %1234 = vrot.lane.b32.xlu1 %v2183_v59, %s2354_s16 }
 0xfc5   :  { %1514 = vrot.lane.b32.xlu0 %v1513_v34, %s2348_s23 }
 0xff5   :  { %v1369_v48 = vpop.permute.xlu2 %1368 }
 0xff6   :  { %v1371_v58 = vmul.f32 %v1369_v48, %v1352_v10 }
 0xff8   :  { %v1372_v62 = vpack.c.bf16 %v1371_v58, %v1371_v58 }
 0xffa   :  { %v1375_v4 = vunpack.c.l.b16 %v1372_v62 }
 0xffc   :  { %v1376_v1 = vpack.c.b16 %v1375_v4, %v1375_v4 }
 0xffe   :  { %1377 = vrot.lane.b32.xlu1 %v1376_v1, %s2348_s23 }
0x1006   :  { %1516 = vrot.lane.b32.xlu1 %v1376_v1, %s2355_s21 }
0x1035   :  { %v1235_v2 = vpop.permute.xlu1 %1234 }
0x1036   :  { %v1237_v52 = vmul.f32 %v1235_v2, %v1218_v53 }
0x1037   :  { %v1515_v8 = vpop.permute.xlu0 %1514 }
0x1038   :  { %2009 = vmatmul.msk.bf16.vlgmr.msrb.gmra.mxu1 %vm103_vm0, %v1515_v8  ;;  %v1373_v61 = vpack.c.bf16 %v1237_v52, %v1237_v52 }
0x103a   :  { %v1380_v9 = vunpack.c.l.b16 %v1373_v61 }
0x103b   :  { %v1669_v6 = vpop.f32.mrf.mxu0 }
0x103c   :  { %v1381_v11 = vpack.c.b16 %v1380_v9, %v1380_v9 }
0x103e   :  { %1382 = vrot.lane.b32.xlu2 %v1381_v11, %s2355_s21 }
0x1043   :  { %v1671_v40 = vpop.f32.mrf.mxu0 }
0x1070   :  { %v1378_v19 = vpop.permute.xlu1 %1377 }
0x1078   :  { %v1517_v17 = vpop.permute.xlu1 %1516 }
0x1079   :  { %v1520_v3 = vsel %vm103_vm0, %v1515_v8, %v1517_v17 }
0x107a   :  { %2004 = vmatmul.msk.bf16.vlgmr.msra.gmra.mxu2 %vm282_vm7, %v1520_v3 }
0x1098   :  { %v1383_v39 = vpop.permute.xlu2 %1382 }
0x1099   :  { %v1386_v21 = vsel %vm103_vm0, %v1378_v19, %v1383_v39 }
0x109a   :  { %1998 = vmatmul.msk.bf16.vlgmr.msrb.gmra.mxu3 %vm282_vm7, %v1386_v21 }
0x109b   :  { %1795 = vmatpush.bf16.msrb.mxu3 %v2784_v25 }
0x109f   :  { %1796 = vmatpush.bf16.msrb.mxu3 %v2787_v26 }
0x10a3   :  { %1797 = vmatpush.bf16.msrb.mxu3 %v2793_v30 }
0x10a7   :  { %1798 = vmatpush.bf16.msrb.mxu3 %v2798_v33 }
0x10b5   :  { %v1653_v50 = vpop.f32.mrf.mxu1 }
0x10b6   :  { %v1670_v51 = vadd.f32 %v1669_v6, %v1653_v50 }
0x10b8   :  { %v1673_v12 = vadd.f32 %v2737_v57, %v1670_v51 }
0x10ba   :  { %2184 = vtanh.f32 %v1673_v12  ;;  %v2011_v25 = vmul.f32 -1.442695, %v1673_v12 }
0x10bd   :  { %v1655_v14 = vpop.f32.mrf.mxu1 }
0x10c0   :  { %v2185_v15 = vpop.eup %2184 }
0x10c1   :  { %1696 = vrot.lane.b32.xlu1 %v2185_v15, %s2354_s16 }
0x10fd   :  { %v1532_v16 = vpop.f32.mrf.mxu2 }
0x10fe   :  { %v1533_v18 = vadd.f32 %v2745_v7, %v1532_v16 }
0x1100   :  { %2186 = vtanh.f32 %v1533_v18  ;;  %v2005_v42 = vmul.f32 -1.442695, %v1533_v18 }
0x1101   :  { %2188 = vpow2.f32 %v2011_v25 }
0x1105   :  { %v1534_v31 = vpop.f32.mrf.mxu2 }
0x1106   :  { %v2187_v26 = vpop.eup %2186 }
0x1107   :  { %1558 = vrot.lane.b32.xlu0 %v2187_v26, %s2354_s16  ;;  %v2189_v30 = vpop.eup %2188 }
0x1108   :  { %v1677_v33 = vadd.f32 1.0, %v2189_v30 }
0x110a   :  { %2190 = vrcp.f32 %v1677_v33  ;;  %v1689_v37 = vand.u32 2147483648, %v1677_v33  ;;  %vm1683_vm11 = vweird.f32 %v1677_v33  ;;  %v1687_v28 = vand.u32 2147483647, %v1677_v33 }
0x110c   :  { %v1690_v35 = vor.u32 1.1754944e-38, %v1689_v37  ;;  %vm1688_vm13 = vcmp.eq.f32.partialorder %v1687_v28, 8.507059e+37 }
0x1110   :  { %v2191_v20 = vpop.eup %2190 }
0x1111   :  { %v1679_v22 = vmul.f32 %v2191_v20, %v1677_v33  ;;  %vm1684_vm2 = vweird.f32 %v2191_v20 }
0x1112   :  { %vm1685_vm12 = vmor %vm1683_vm11, %vm1684_vm2 }
0x1113   :  { %v1680_v44 = vsub.f32 1.0, %v1679_v22 }
0x1115   :  { %v1681_v63 = vmul.f32 %v2191_v20, %v1680_v44 }
0x1117   :  { %v1682_v27 = vadd.f32 %v2191_v20, %v1681_v63 }
0x1119   :  { %v1686_v32 = vsel %vm1685_vm12, %v2191_v20, %v1682_v27 }
0x111a   :  { %v2859_v41 = vsel %vm1688_vm13, %v1690_v35, %v1686_v32 }
0x111b   :  { %v1694_v40 = vmul.f32 %v2859_v41, %v2820_v29 }
0x111d   :  { %v1398_v57 = vpop.f32.mrf.mxu3 }
0x111e   :  { %v1399_v10 = vadd.f32 %v2807_v54, %v1398_v57 }
0x1120   :  { %2192 = vtanh.f32 %v1399_v10  ;;  %v1999_v0 = vmul.f32 -1.442695, %v1399_v10 }
0x1121   :  { %2194 = vpow2.f32 %v2005_v42 }
0x1122   :  { %2196 = vpow2.f32 %v1999_v0 }
0x1125   :  { %v1400_v23 = vpop.f32.mrf.mxu3 }
0x1126   :  { %v2193_v24 = vpop.eup %2192 }
0x1127   :  { %1424 = vrot.lane.b32.xlu2 %v2193_v24, %s2354_s16  ;;  %v2195_v45 = vpop.eup %2194 }
0x1128   :  { %v1539_v55 = vadd.f32 1.0, %v2195_v45  ;;  %v2197_v46 = vpop.eup %2196 }
0x1129   :  { %v1405_v43 = vadd.f32 1.0, %v2197_v46 }
0x112a   :  { %2198 = vrcp.f32 %v1539_v55  ;;  %v1551_v62 = vand.u32 2147483648, %v1539_v55  ;;  %vm1545_vm15 = vweird.f32 %v1539_v55  ;;  %v1549_v4 = vand.u32 2147483647, %v1539_v55 }
0x112b   :  { %2200 = vrcp.f32 %v1405_v43  ;;  %v1417_v11 = vand.u32 2147483648, %v1405_v43  ;;  %vm1411_vm5 = vweird.f32 %v1405_v43  ;;  %v1415_v19 = vand.u32 2147483647, %v1405_v43 }
0x112c   :  { %v1552_v2 = vor.u32 1.1754944e-38, %v1551_v62  ;;  %vm1550_vm3 = vcmp.eq.f32.partialorder %v1549_v4, 8.507059e+37 }
0x112d   :  { %v1418_v3 = vor.u32 1.1754944e-38, %v1417_v11  ;;  %vm1416_vm8 = vcmp.eq.f32.partialorder %v1415_v19, 8.507059e+37 }
0x1130   :  { %v2199_v5 = vpop.eup %2198 }
0x1131   :  { %v1541_v36 = vmul.f32 %v2199_v5, %v1539_v55  ;;  %v2201_v13 = vpop.eup %2200  ;;  %vm1546_vm14 = vweird.f32 %v2199_v5 }
0x1132   :  { %v1407_v34 = vmul.f32 %v2201_v13, %v1405_v43  ;;  %vm1547_vm1 = vmor %vm1545_vm15, %vm1546_vm14  ;;  %vm1412_vm4 = vweird.f32 %v2201_v13 }
0x1133   :  { %v1697_v53 = vpop.permute.xlu1 %1696  ;;  %v1542_v56 = vsub.f32 1.0, %v1541_v36  ;;  %vm1413_vm6 = vmor %vm1411_vm5, %vm1412_vm4  ;;  %vm1904_vm5 = vcmask 7168  }
0x1134   :  { %v1699_v38 = vmul.f32 %v1697_v53, %v2859_v41  ;;  %v1408_v58 = vsub.f32 1.0, %v1407_v34 }
0x1135   :  { %v1543_v59 = vmul.f32 %v2199_v5, %v1542_v56 }
0x1136   :  { %1701 = vrot.lane.b32.xlu1 %v1699_v38, %s2354_s16  ;;  %v1409_v60 = vmul.f32 %v2201_v13, %v1408_v58 }
0x1137   :  { %v1544_v48 = vadd.f32 %v2199_v5, %v1543_v59 }
0x1138   :  { %v1410_v9 = vadd.f32 %v2201_v13, %v1409_v60 }
0x1139   :  { %v1548_v1 = vsel %vm1547_vm1, %v2199_v5, %v1544_v48 }
0x113a   :  { %v1553_v8 = vsel %vm1550_vm3, %v1552_v2, %v1548_v1  ;;  %v1414_v17 = vsel %vm1413_vm6, %v2201_v13, %v1410_v9 }
0x113b   :  { %v1419_v39 = vsel %vm1416_vm8, %v1418_v3, %v1414_v17  ;;  %v1556_v29 = vmul.f32 %v1553_v8, %v2826_v47 }
0x113c   :  { %v1422_v14 = vmul.f32 %v1419_v39, %v2831_v49 }
0x1179   :  { %v1559_v52 = vpop.permute.xlu0 %1558 }
0x117a   :  { %v1561_v61 = vmul.f32 %v1559_v52, %v1553_v8 }
0x117c   :  { %1563 = vrot.lane.b32.xlu0 %v1561_v61, %s2354_s16 }
0x1181   :  { %v1425_v6 = vpop.permute.xlu2 %1424 }
0x1182   :  { %v1427_v21 = vmul.f32 %v1425_v6, %v1419_v39 }
0x1184   :  { %1429 = vrot.lane.b32.xlu2 %v1427_v21, %s2354_s16 }
0x11a8   :  { %v1702_v50 = vpop.permute.xlu1 %1701 }
0x11a9   :  { %v2867_v51 = vadd.f32 %v1702_v50, %v1694_v40 }
0x11ab   :  { %2202 = vtanh.f32 %v2867_v51 }
0x11b1   :  { %v2203_v12 = vpop.eup %2202 }
0x11b2   :  { %1707 = vrot.lane.b32.xlu1 %v2203_v12, %s2354_s16 }
0x11de   :  { %v1430_v15 = vpop.permute.xlu2 %1429 }
0x11df   :  { %v2872_v16 = vadd.f32 %v1430_v15, %v1422_v14 }
0x11e1   :  { %2204 = vtanh.f32 %v2872_v16 }
0x11e7   :  { %v2205_v18 = vpop.eup %2204 }
0x11e8   :  { %1435 = vrot.lane.b32.xlu2 %v2205_v18, %s2354_s16 }
0x11ee   :  { %v1564_v25 = vpop.permute.xlu0 %1563 }
0x11ef   :  { %v2877_v31 = vadd.f32 %v1564_v25, %v1556_v29 }
0x11f1   :  { %2206 = vtanh.f32 %v2877_v31 }
0x11f7   :  { %v2207_v26 = vpop.eup %2206 }
0x11f8   :  { %1569 = vrot.lane.b32.xlu0 %v2207_v26, %s2354_s16 }
0x1224   :  { %v1708_v30 = vpop.permute.xlu1 %1707 }
0x1225   :  { %v2882_v49 = vmul.f32 %v1708_v30, %v2859_v41 }
0x1227   :  { %v1711_v33 = vpack.c.bf16 %v2882_v49, %v2882_v49 }
0x1229   :  { %v1713_v20 = vunpack.c.l.b16 %v1711_v33 }
0x122b   :  { %v1714_v57 = vpack.c.b16 %v1713_v20, %v1713_v20 }
0x122d   :  { %1715 = vrot.lane.b32.xlu1 %v1714_v57, %s2348_s23 }
0x1242   :  { %v1436_v47 = vpop.permute.xlu2 %1435 }
0x1243   :  { %v1438_v10 = vmul.f32 %v1436_v47, %v1419_v39 }
0x1245   :  { %v1574_v22 = vpack.c.bf16 %v1438_v10, %v1438_v10 }
0x1247   :  { %v1581_v44 = vunpack.c.l.b16 %v1574_v22 }
0x1249   :  { %v1582_v23 = vpack.c.b16 %v1581_v44, %v1581_v44 }
0x124b   :  { %1583 = vrot.lane.b32.xlu0 %v1582_v23, %s2355_s21 }
0x126a   :  { %v1570_v24 = vpop.permute.xlu0 %1569 }
0x126b   :  { %v1572_v63 = vmul.f32 %v1570_v24, %v1553_v8 }
0x126d   :  { %v1573_v27 = vpack.c.bf16 %v1572_v63, %v1572_v63 }
0x126f   :  { %v1576_v37 = vunpack.c.l.b16 %v1573_v27 }
0x1271   :  { %v1577_v28 = vpack.c.b16 %v1576_v37, %v1576_v37 }
0x1273   :  { %1578 = vrot.lane.b32.xlu2 %v1577_v28, %s2348_s23 }
0x127b   :  { %1717 = vrot.lane.b32.xlu2 %v1577_v28, %s2355_s21 }
0x129f   :  { %v1716_v53 = vpop.permute.xlu1 %1715 }
0x12bd   :  { %v1584_v32 = vpop.permute.xlu0 %1583 }
0x12cd   :  { %v1579_v35 = vpop.permute.xlu2 %1578 }
0x12ce   :  { %v1587_v41 = vsel %vm103_vm0, %v1579_v35, %v1584_v32 }
0x12cf   :  { %2006 = vmatmul.msk.bf16.vlgmr.msra.gmra.mxu3 %vm282_vm7, %v1587_v41 }
0x12d5   :  { %v1718_v38 = vpop.permute.xlu2 %1717 }
0x12d6   :  { %v1721_v42 = vsel %vm103_vm0, %v1716_v53, %v1718_v38 }
0x12d7   :  { %2012 = vmatmul.msk.bf16.vlgmr.msrb.gmra.mxu2 %vm282_vm7, %v1721_v42 }
0x1352   :  { %v1599_v0 = vpop.f32.mrf.mxu3 }
0x1353   :  { %v1600_v45 = vadd.f32 %v2807_v54, %v1599_v0 }
0x1355   :  { %2208 = vtanh.f32 %v1600_v45  ;;  %v2007_v13 = vmul.f32 -1.442695, %v1600_v45 }
0x135a   :  { %v1601_v55 = vpop.f32.mrf.mxu3  ;;  %v1733_v46 = vpop.f32.mrf.mxu2 }
0x135b   :  { %v2209_v43 = vpop.eup %2208  ;;  %v1734_v5 = vadd.f32 %v2745_v7, %v1733_v46 }
0x135c   :  { %1625 = vrot.lane.b32.xlu0 %v2209_v43, %s2354_s16 }
0x135d   :  { %2210 = vtanh.f32 %v1734_v5  ;;  %v2013_v59 = vmul.f32 -1.442695, %v1734_v5 }
0x135e   :  { %2212 = vpow2.f32 %v2007_v13 }
0x135f   :  { %2214 = vpow2.f32 %v2013_v59 }
0x1362   :  { %v1735_v36 = vpop.f32.mrf.mxu2 }
0x1363   :  { %v2211_v56 = vpop.eup %2210 }
0x1364   :  { %1759 = vrot.lane.b32.xlu1 %v2211_v56, %s2354_s16  ;;  %v2213_v34 = vpop.eup %2212 }
0x1365   :  { %v1606_v48 = vadd.f32 1.0, %v2213_v34  ;;  %v2215_v58 = vpop.eup %2214 }
0x1366   :  { %v1740_v62 = vadd.f32 1.0, %v2215_v58 }
0x1367   :  { %2216 = vrcp.f32 %v1606_v48  ;;  %v1618_v9 = vand.u32 2147483648, %v1606_v48  ;;  %vm1612_vm10 = vweird.f32 %v1606_v48  ;;  %v1616_v11 = vand.u32 2147483647, %v1606_v48 }
0x1368   :  { %2218 = vrcp.f32 %v1740_v62  ;;  %v1752_v50 = vand.u32 2147483648, %v1740_v62  ;;  %vm1746_vm13 = vweird.f32 %v1740_v62  ;;  %v1750_v12 = vand.u32 2147483647, %v1740_v62 }
0x1369   :  { %v1619_v3 = vor.u32 1.1754944e-38, %v1618_v9  ;;  %vm1617_vm11 = vcmp.eq.f32.partialorder %v1616_v11, 8.507059e+37  ;;  %v1876_v9 = vld [vmem:[%s2955_s8 + $0x10] sm:$0xff]  ;;  %v1875_v11 = vld [vmem:[%s2955_s8 + $0x8] sm:$0xff] }
0x136a   :  { %v1753_v15 = vor.u32 1.1754944e-38, %v1752_v50  ;;  %vm1751_vm15 = vcmp.eq.f32.partialorder %v1750_v12, 8.507059e+37 }
0x136d   :  { %v2217_v4 = vpop.eup %2216 }
0x136e   :  { %v1608_v1 = vmul.f32 %v2217_v4, %v1606_v48  ;;  %v2219_v60 = vpop.eup %2218  ;;  %vm1613_vm9 = vweird.f32 %v2217_v4 }
0x136f   :  { %v1742_v52 = vmul.f32 %v2219_v60, %v1740_v62  ;;  %vm1614_vm2 = vmor %vm1612_vm10, %vm1613_vm9  ;;  %vm1747_vm12 = vweird.f32 %v2219_v60 }
0x1370   :  { %v1609_v7 = vsub.f32 1.0, %v1608_v1  ;;  %vm1748_vm14 = vmor %vm1746_vm13, %vm1747_vm12 }
0x1371   :  { %v1743_v61 = vsub.f32 1.0, %v1742_v52 }
0x1372   :  { %v1610_v2 = vmul.f32 %v2217_v4, %v1609_v7 }
0x1373   :  { %v1744_v17 = vmul.f32 %v2219_v60, %v1743_v61 }
0x1374   :  { %v1611_v8 = vadd.f32 %v2217_v4, %v1610_v2 }
0x1375   :  { %v1745_v40 = vadd.f32 %v2219_v60, %v1744_v17 }
0x1376   :  { %v1615_v19 = vsel %vm1614_vm2, %v2217_v4, %v1611_v8 }
0x1377   :  { %v1620_v39 = vsel %vm1617_vm11, %v1619_v3, %v1615_v19  ;;  %v1749_v14 = vsel %vm1748_vm14, %v2219_v60, %v1745_v40  ;;  %v2039_v40 = vld [vmem:[#allocation8] ss:$0 sm:$0xff] }
0x1378   :  { %v1754_v29 = vsel %vm1751_vm15, %v1753_v15, %v1749_v14  ;;  %v1623_v26 = vmul.f32 %v1620_v39, %v2872_v16 }
0x1379   :  { %v1757_v57 = vmul.f32 %v1754_v29, %v2877_v31 }
0x13ce   :  { %v1626_v6 = vpop.permute.xlu0 %1625 }
0x13cf   :  { %v1628_v21 = vmul.f32 %v1626_v6, %v1620_v39 }
0x13d1   :  { %1630 = vrot.lane.b32.xlu2 %v1628_v21, %s2354_s16 }
0x13d6   :  { %v1760_v18 = vpop.permute.xlu1 %1759 }
0x13d7   :  { %v1762_v25 = vmul.f32 %v1760_v18, %v1754_v29 }
0x13d9   :  { %1764 = vrot.lane.b32.xlu0 %v1762_v25, %s2354_s16 }
0x142b   :  { %v1631_v30 = vpop.permute.xlu2 %1630 }
0x142c   :  { %v1633_v33 = vadd.f32 %v1631_v30, %v1623_v26 }
0x142e   :  { %2220 = vtanh.f32 %v1633_v33 }
0x1434   :  { %v2221_v20 = vpop.eup %2220 }
0x1435   :  { %1636 = vrot.lane.b32.xlu1 %v2221_v20, %s2354_s16 }
0x144b   :  { %v1765_v47 = vpop.permute.xlu0 %1764 }
0x144c   :  { %v1767_v10 = vadd.f32 %v1765_v47, %v1757_v57 }
0x144e   :  { %2222 = vtanh.f32 %v1767_v10 }
0x1454   :  { %v2223_v22 = vpop.eup %2222 }
0x1455   :  { %1770 = vrot.lane.b32.xlu2 %v2223_v22, %s2354_s16 }
0x14a7   :  { %v1637_v44 = vpop.permute.xlu1 %1636 }
0x14a8   :  { %v1639_v23 = vmul.f32 %v1637_v44, %v1620_v39 }
0x14aa   :  { %v1775_v24 = vpack.c.bf16 %v1639_v23, %v1639_v23 }
0x14ac   :  { %v1782_v63 = vunpack.c.l.b16 %v1775_v24 }
0x14ae   :  { %v1783_v27 = vpack.c.b16 %v1782_v63, %v1782_v63 }
0x14af   :  { %v1771_v16 = vpop.permute.xlu2 %1770 }
0x14b0   :  { %v2904_v37 = vmul.f32 %v1771_v16, %v1754_v29  ;;  %1784 = vrot.lane.b32.xlu1 %v1783_v27, %s2355_s21 }
0x14b2   :  { %v1774_v28 = vpack.c.bf16 %v2904_v37, %v2904_v37 }
0x14b4   :  { %v1777_v31 = vunpack.c.l.b16 %v1774_v28 }
0x14b6   :  { %v1778_v32 = vpack.c.b16 %v1777_v31, %v1777_v31 }
0x14b8   :  { %1779 = vrot.lane.b32.xlu0 %v1778_v32, %s2348_s23 }
0x1522   :  { %v1785_v35 = vpop.permute.xlu1 %1784 }
0x152a   :  { %v1780_v41 = vpop.permute.xlu0 %1779 }
0x152b   :  { %v1788_v53 = vsel %vm103_vm0, %v1780_v41, %v1785_v35 }
0x152c   :  { %2014 = vmatmul.msk.bf16.vlgmr.msrb.gmra.mxu3 %vm282_vm7, %v1788_v53 }
0x15af   :  { %v1800_v38 = vpop.f32.mrf.mxu3 }
0x15b0   :  { %v1801_v42 = vadd.f32 %v2807_v54, %v1800_v38 }
0x15b2   :  { %2224 = vtanh.f32 %v1801_v42  ;;  %v2015_v55 = vmul.f32 -1.442695, %v1801_v42 }
0x15b4   :  { %2226 = vpow2.f32 %v2015_v55 }
0x15b7   :  { %v1802_v0 = vpop.f32.mrf.mxu3 }
0x15b8   :  { %v2225_v45 = vpop.eup %2224 }
0x15b9   :  { %1826 = vrot.lane.b32.xlu2 %v2225_v45, %s2354_s16 }
0x15ba   :  { %v2227_v46 = vpop.eup %2226 }
0x15bb   :  { %v1807_v43 = vadd.f32 1.0, %v2227_v46 }
0x15bd   :  { %2228 = vrcp.f32 %v1807_v43  ;;  %v1819_v34 = vand.u32 2147483648, %v1807_v43  ;;  %vm1813_vm7 = vweird.f32 %v1807_v43  ;;  %v1817_v48 = vand.u32 2147483647, %v1807_v43 }
0x15bf   :  { %v1820_v58 = vor.u32 1.1754944e-38, %v1819_v34  ;;  %vm1818_vm4 = vcmp.eq.f32.partialorder %v1817_v48, 8.507059e+37 }
0x15c3   :  { %v2229_v5 = vpop.eup %2228 }
0x15c4   :  { %v1809_v36 = vmul.f32 %v2229_v5, %v1807_v43  ;;  %vm1814_vm1 = vweird.f32 %v2229_v5 }
0x15c5   :  { %vm1815_vm3 = vmor %vm1813_vm7, %vm1814_vm1 }
0x15c6   :  { %v1810_v56 = vsub.f32 1.0, %v1809_v36 }
0x15c8   :  { %v1811_v13 = vmul.f32 %v2229_v5, %v1810_v56 }
0x15ca   :  { %v1812_v59 = vadd.f32 %v2229_v5, %v1811_v13 }
0x15cc   :  { %v1816_v54 = vsel %vm1815_vm3, %v2229_v5, %v1812_v59 }
0x15cd   :  { %v1821_v4 = vsel %vm1818_vm4, %v1820_v58, %v1816_v54 }
0x15ce   :  { %v1824_v7 = vmul.f32 %v1821_v4, %v1633_v33 }
0x1613   :  { %v1827_v62 = vpop.permute.xlu2 %1826 }
0x1614   :  { %v1829_v1 = vmul.f32 %v1827_v62, %v1821_v4 }
0x1616   :  { %1831 = vrot.lane.b32.xlu0 %v1829_v1, %s2354_s16 }
0x161e   :  { %1842 = vrot.lane.b32.xlu0 %v2882_v49, %s2348_s23  ;;  %v1877_v49 = vld [vmem:[%s2955_s8 + $0x18] sm:$0xff] }
0x161f   :  { %1896 = vmatpush.msra.mxu1 %v1877_v49 }
0x1621   :  { %1897 = vmatpush.msra.mxu1 %v1876_v9 }
0x1623   :  { %1898 = vmatpush.msra.mxu1 %v1875_v11 }
0x1626   :  { %1857 = vrot.lane.b32.xlu0 %v1767_v10, %s2355_s21 }
0x1688   :  { %v1832_v60 = vpop.permute.xlu0 %1831 }
0x1689   :  { %v1834_v2 = vadd.f32 %v1832_v60, %v1824_v7 }
0x168b   :  { %2230 = vtanh.f32 %v1834_v2 }
0x1690   :  { %v1843_v52 = vpop.permute.xlu0 %1842 }
0x1691   :  { %v2231_v8 = vpop.eup %2230  ;;  %1845 = vst.msk [vmem:[#allocation2] sm:$0xff] %vm103_vm0, %v1843_v52 }
0x1692   :  { %1837 = vrot.lane.b32.xlu1 %v2231_v8, %s2354_s16 }
0x1698   :  { %v1858_v61 = vpop.permute.xlu0 %1857 }
0x1699   :  { %1860 = vst.msk [vmem:[#allocation5] sm:$0xff] %vm103_vm0, %v1858_v61 }
0x169a   :  { %1847 = vrot.lane.b32.xlu1 %v2867_v51, %s2355_s21  ;;  %v1874_v51 = vld [vmem:[%s2955_s8] sm:$0xff] }
0x169b   :  { %1899 = vmatpush.msra.mxu1 %v1874_v51 }
0x16a2   :  { %1867 = vrot.lane.b32.xlu1 %v1834_v2, %s2355_s21 }
0x1704   :  { %v1838_v19 = vpop.permute.xlu1 %1837 }
0x1705   :  { %v1840_v17 = vmul.f32 %v1838_v19, %v1821_v4 }
0x1707   :  { %1862 = vrot.lane.b32.xlu2 %v1840_v17, %s2348_s23 }
0x170c   :  { %v1848_v3 = vpop.permute.xlu1 %1847 }
0x170d   :  { %1850 = vst.msk [vmem:[#allocation3] sm:$0xff] %vm103_vm0, %v1848_v3 }
0x170f   :  { %1852 = vrot.lane.b32.xlu2 %v2904_v37, %s2348_s23 }
0x1714   :  { %v1868_v6 = vpop.permute.xlu1 %1867 }
0x1715   :  { %1870 = vst.msk [vmem:[#allocation7] sm:$0xff] %vm103_vm0, %v1868_v6 }
0x1761   :  { %v1863_v39 = vpop.permute.xlu2 %1862 }
0x1762   :  { %1865 = vst.msk [vmem:[#allocation6] sm:$0xff] %vm103_vm0, %v1863_v39  ;;  %2016 = vmatmul.msk.f32.vlgmr.msra.gmra.mxu1 %vm103_vm0, %v1863_v39 }
0x1769   :  { %v1853_v21 = vpop.permute.xlu2 %1852 }
0x176a   :  { %1855 = vst.msk [vmem:[#allocation4] sm:$0xff] %vm103_vm0, %v1853_v21 }
0x17df   :  { %v1901_v50 = vpop.f32.mrf.mxu1 }
0x17e0   :  { %v1902_v12 = vadd.f32 %v2039_v40, %v1901_v50 }
0x17e2   :  { %1905 = vst.msk [vmem:[%s2957_s10] sm:$0xff] %vm1904_vm5, %v1902_v12 }
0x17e3   :  { %1910 = vsyncpa [#allocation10], 1 }
0x17e4   :  { %1911 = vsyncpa [#allocation12], 1 }
0x17e5   :  { %1912 = vsyncpa [#allocation15], 1 }

</bundles_post_ra>
